<compile_context>
chip_gen: v7x
topology: tpu7x:2x2x1
jax: 0.10.0
libtpu: 0.0.40
codegen_flags: <defaults>
</compile_context>

<pallas_src>
import functools

import jax
import jax.numpy as jnp
from jax.experimental import pallas as pl
from jax.experimental.pallas import tpu as pltpu

PAD_INDEX = 0

_IFGO_TO_IFOG = (0, 1, 3, 2)  # PyTorch gate order [i,f,g,o] -> kernel order [i,f,o,g]


def _round_up(x, m):
    return ((x + m - 1) // m) * m


def _gates_ifgo_to_ifog(a, hidden_dim):
    """Permute the trailing 4*H gate axis from PyTorch (i,f,g,o) to (i,f,o,g)."""
    lead = a.shape[:-1]
    a = a.reshape(*lead, 4, hidden_dim)
    a = a[..., jnp.array(_IFGO_TO_IFOG), :]
    return a.reshape(*lead, 4 * hidden_dim)


# ----------------------------- Pallas kernel -------------------------------
def _lstm_chunk_kernel(gx_ref, whh_ref, o_ref, h_sc, c_sc, *, t_chunk, hp):
    """Recurrence over one (batch_tile, t_chunk) block.

    gx_ref : (t_chunk, B_tile, 4*Hp) bf16  precomputed x@W_ih^T + (b_ih+b_hh),
             gate order (i, f, o, g), per-gate zero-padded to Hp lanes.
    whh_ref: (Hp, 4*Hp)              bf16  recurrent weight (transposed), same order.
    o_ref  : (t_chunk, B_tile, Hp)   f32   hidden outputs, time-major.
    h_sc/c_sc : (B_tile, Hp) f32 VMEM scratch — persistent across the time grid axis.

    NOTE: the h/c carry relies on the grid being (batch_tiles, time_chunks) with the
    time (recurrent) axis LAST so it is iterated innermost & sequentially per batch
    tile ('arbitrary'), and on scratch being per-core when the 'parallel' batch axis
    is sharded across TensorCores.  Do not reorder the grid axes.
    """
    # New batch tile -> reset the recurrent state.
    @pl.when(pl.program_id(1) == 0)
    def _():
        h_sc[...] = jnp.zeros_like(h_sc)
        c_sc[...] = jnp.zeros_like(c_sc)

    w_hh = whh_ref[...]   # bf16 resident weight, loaded once per chunk
    h = h_sc[...]         # f32 carries live in vregs across the unrolled chunk
    c = c_sc[...]

    # Statically unrolled inner time loop: lets the scheduler overlap the EUP
    # sigmoid/tanh of step t with the MXU push of step t+1.
    for lt in range(t_chunk):
        gates = gx_ref[lt].astype(jnp.float32) + jnp.dot(
            h.astype(jnp.bfloat16), w_hh, preferred_element_type=jnp.float32
        )                                              # (B_tile, 4*Hp) f32

        sig = jax.nn.sigmoid(gates[:, : 3 * hp])       # i | f | o contiguous
        g_g = jnp.tanh(gates[:, 3 * hp:])
        i_g = sig[:, :hp]
        f_g = sig[:, hp:2 * hp]
        o_g = sig[:, 2 * hp:3 * hp]

        c = f_g * c + i_g * g_g
        h = o_g * jnp.tanh(c)
        o_ref[lt] = h.astype(o_ref.dtype)              # full (B_tile, Hp) lane-dense store

    # Single scratch write-back per chunk (state for the next time grid step).
    h_sc[...] = h
    c_sc[...] = c


def lstm_recurrence_pallas(gates_x, w_hh_t, hidden_dim, *, t_chunk=8, b_tile=None,
                           vmem_limit_bytes=None, single_buffer_whh=True):
    """Run the LSTM recurrence over precomputed input gates.

    gates_x : (S, B, 4H) f32, time-major, gate order (i,f,o,g),
              = x @ W_ih^T + (b_ih + b_hh)
    w_hh_t  : (H, 4H) f32, gate order (i,f,o,g)
    returns : (S, B, H) f32 hidden states (time-major).
    """
    S, B, G = gates_x.shape
    H = hidden_dim
    assert G == 4 * H and w_hh_t.shape == (H, 4 * H)

    # Pad to TPU-friendly tiles: lanes (hidden) to 128, sublanes (batch) to 8.
    # Per-gate zero padding is exact: padded units see gate preactivation 0, so
    # i=f=o=0.5 and g=tanh(0)=0  =>  c stays 0 and h stays 0 forever.
    Hp = _round_up(H, 128)
    Bp = _round_up(B, 8)
    Sp = _round_up(S, t_chunk)

    if b_tile is None:
        # >=2 batch tiles when the batch is large enough so the 'parallel' axis can
        # shard across v7x's two TensorCores; keep tiles 16-sublane aligned so the
        # bf16 gx blocks stay on native (16,128) packed tiles.
        b_tile = Bp if Bp < 32 else _round_up(pl.cdiv(Bp, 2), 16)
    Bp = _round_up(Bp, b_tile)
    assert b_tile % 8 == 0 and Bp % b_tile == 0

    # gx is the dominant HBM stream (written once by the projection, read once here):
    # store it in bf16; upcast at the add inside the kernel.
    gx = gates_x.reshape(S, B, 4, H)
    gx = jnp.pad(gx, ((0, Sp - S), (0, Bp - B), (0, 0), (0, Hp - H)))
    gx = gx.reshape(Sp, Bp, 4 * Hp).astype(jnp.bfloat16)

    whh = w_hh_t.reshape(H, 4, H)
    whh = jnp.pad(whh, ((0, Hp - H), (0, 0), (0, Hp - H)))
    whh = whh.reshape(Hp, 4 * Hp).astype(jnp.bfloat16)

    n_b = Bp // b_tile
    n_t = Sp // t_chunk

    # Explicit VMEM budget (double-buffered gx/out blocks, single- or double-buffered
    # W_hh, h/c scratch), capped at 64 MiB so it also fits v7x's physical VMEM.
    gx_block_bytes = t_chunk * b_tile * 4 * Hp * 2      # bf16
    out_block_bytes = t_chunk * b_tile * Hp * 4         # f32
    whh_bytes = Hp * 4 * Hp * 2                         # bf16
    scratch_bytes = 2 * b_tile * Hp * 4                 # f32 h/c
    whh_bufs = 1 if single_buffer_whh else 2
    needed = (2 * gx_block_bytes + 2 * out_block_bytes
              + whh_bufs * whh_bytes + scratch_bytes)
    if vmem_limit_bytes is None:
        vmem_limit_bytes = min(max(int(1.25 * needed) + (2 << 20), 16 << 20), 64 << 20)

    whh_spec_kwargs = {}
    if single_buffer_whh:
        # Constant index_map already avoids re-DMA; Buffered(1) also drops the second
        # (never-used) VMEM buffer for the resident weight.
        whh_spec_kwargs["pipeline_mode"] = pl.Buffered(1)

    kernel = functools.partial(_lstm_chunk_kernel, t_chunk=t_chunk, hp=Hp)

    out = pl.pallas_call(
        kernel,
        out_shape=jax.ShapeDtypeStruct((Sp, Bp, Hp), jnp.float32),
        grid_spec=pltpu.PrefetchScalarGridSpec(
            num_scalar_prefetch=0,
            grid=(n_b, n_t),   # batch tiles outer (parallel), time LAST (recurrent)
            in_specs=[
                # precomputed x-gates: one (t_chunk, B_tile, 4Hp) slab per grid step
                pl.BlockSpec((t_chunk, b_tile, 4 * Hp), lambda b, t: (t, b, 0)),
                # recurrent weight: constant index_map -> staged once & revisited
                pl.BlockSpec((Hp, 4 * Hp), lambda b, t: (0, 0), **whh_spec_kwargs),
            ],
            out_specs=pl.BlockSpec((t_chunk, b_tile, Hp), lambda b, t: (t, b, 0)),
            scratch_shapes=[
                pltpu.VMEM((b_tile, Hp), jnp.float32),   # h state
                pltpu.VMEM((b_tile, Hp), jnp.float32),   # c state
            ],
        ),
        compiler_params=pltpu.CompilerParams(
            dimension_semantics=("parallel", "arbitrary"),
            vmem_limit_bytes=vmem_limit_bytes,
        ),
    )(gx, whh)

    return out[:S, :B, :H]


# ------------------------------ Module glue --------------------------------
def init_params(key, n_words_en, n_words_trans, emb_dim, hidden_dim):
    """Deterministic synthetic parameters (shapes match the PyTorch module)."""
    ks = jax.random.split(key, 6)
    scale = 0.1
    emb_en = scale * jax.random.normal(ks[0], (n_words_en, emb_dim), jnp.float32)
    emb_tr = scale * jax.random.normal(ks[1], (n_words_trans, emb_dim), jnp.float32)
    # padding_idx=PAD_INDEX -> zero row
    emb_en = emb_en.at[PAD_INDEX].set(0.0)
    emb_tr = emb_tr.at[PAD_INDEX].set(0.0)

    # PyTorch LSTM params: weight_ih (4H, E), weight_hh (4H, H), b_ih, b_hh (4H,)
    w_ih = scale * jax.random.normal(ks[2], (4 * hidden_dim, emb_dim), jnp.float32)
    w_hh = scale * jax.random.normal(ks[3], (4 * hidden_dim, hidden_dim), jnp.float32)
    b_ih = scale * jax.random.normal(ks[4], (4 * hidden_dim,), jnp.float32)
    b_hh = scale * jax.random.normal(ks[5], (4 * hidden_dim,), jnp.float32)

    return {
        "embedding_en": emb_en,
        "embedding_trans": emb_tr,
        "w_ih_t": w_ih.T,                              # (E, 4H), PyTorch gate order
        "w_hh_t": w_hh.T,                              # (H, 4H), PyTorch gate order
        "bias": b_ih + b_hh,                           # (4H,)
    }


@functools.partial(jax.jit, static_argnames=("lang", "single_buffer_whh"))
def lstm_nlu_forward(params, x, lang="en", single_buffer_whh=True):
    """
    x: int32 token ids (bsz, seq_len)
    returns: (bsz, seq_len, hidden_dim)
    """
    table = params["embedding_en"] if lang == "en" else params["embedding_trans"]
    hidden_dim = params["w_hh_t"].shape[0]

    embeddings = jnp.take(table, x, axis=0)            # (B, S, E) — XLA-glue gather
    # F.dropout with training=False is identity (eval semantics).

    # Reorder gate columns once in the tiny weights/bias (i,f,g,o -> i,f,o,g) so the
    # big gx tensor is produced directly in kernel gate order.
    w_ih_t = _gates_ifgo_to_ifog(params["w_ih_t"], hidden_dim)   # (E, 4H)
    w_hh_t = _gates_ifgo_to_ifog(params["w_hh_t"], hidden_dim)   # (H, 4H)
    bias = _gates_ifgo_to_ifog(params["bias"], hidden_dim)       # (4H,)

    # Hoisted, time-parallel input projection.  'bse,eg->sbg' folds the
    # batch_first -> time-major transpose into the contraction; bias folded in.
    gates_x = jnp.einsum(
        "bse,eg->sbg", embeddings, w_ih_t, preferred_element_type=jnp.float32,
    ) + bias                                            # (S, B, 4H) f32

    out_tm = lstm_recurrence_pallas(
        gates_x, w_hh_t, hidden_dim, t_chunk=8, single_buffer_whh=single_buffer_whh)
    # Module contract is batch_first: single transpose back.
    return jnp.transpose(out_tm, (1, 0, 2))             # (B, S, H)


def lstm_nlu_reference(params, x, lang="en"):
    """Pure-JAX f32 reference (lax.scan LSTM, PyTorch gate order) for verification."""
    table = params["embedding_en"] if lang == "en" else params["embedding_trans"]
    H = params["w_hh_t"].shape[0]
    emb = jnp.take(table, x, axis=0)                                      # (B,S,E)
    gx = jnp.einsum("bse,eg->sbg", emb, params["w_ih_t"]) + params["bias"]  # (S,B,4H)

    def step(carry, g_t):
        h, c = carry
        gates = g_t + h @ params["w_hh_t"]
        i = jax.nn.sigmoid(gates[:, 0 * H:1 * H])
        f = jax.nn.sigmoid(gates[:, 1 * H:2 * H])
        g = jnp.tanh(gates[:, 2 * H:3 * H])
        o = jax.nn.sigmoid(gates[:, 3 * H:4 * H])
        c = f * c + i * g
        h = o * jnp.tanh(c)
        return (h, c), h

    B = x.shape[0]
    init = (jnp.zeros((B, H), jnp.float32), jnp.zeros((B, H), jnp.float32))
    _, hs = jax.lax.scan(step, init, gx)                                  # (S,B,H)
    return jnp.transpose(hs, (1, 0, 2))


# --------------------------------- Main -------------------------------------
if __name__ == "__main__":
    n_words_en, n_words_trans = 50, 60
    emb_dim, hidden_dim = 32, 32
    bsz, seq_len = 2, 8

    key = jax.random.PRNGKey(0)
    pkey, xkey = jax.random.split(key)
    params = init_params(pkey, n_words_en, n_words_trans, emb_dim, hidden_dim)

    x = jax.random.randint(xkey, (bsz, seq_len), 0, n_words_en, dtype=jnp.int32)

    try:
        out = lstm_nlu_forward(params, x, lang="en", single_buffer_whh=True)
        out = jax.block_until_ready(out)
    except Exception:
        # Fallback for JAX versions that reject pipeline_mode=pl.Buffered(1) on a
        # top-level pallas_call BlockSpec; only the W_hh buffering (perf) changes.
        out = lstm_nlu_forward(params, x, lang="en", single_buffer_whh=False)
        out = jax.block_until_ready(out)

    assert out.shape == (bsz, seq_len, hidden_dim)
    assert out.dtype == jnp.float32
    assert bool(jnp.all(jnp.isfinite(out)))

    ref = lstm_nlu_reference(params, x, lang="en")
    err = float(jnp.max(jnp.abs(out - ref)))
    assert err < 3e-2, f"max abs err vs f32 reference: {err}"

    print("KERNEL_OK")
</pallas_src>

<mosaic_0001>
module attributes {stable_mosaic.version = 11 : i64} {
  func.func @_lstm_chunk_kernel(%arg0: i32, %arg1: i32, %arg2: memref<8x8x512xbf16, #tpu.memory_space<vmem>>, %arg3: memref<128x512xbf16, #tpu.memory_space<vmem>>, %arg4: memref<8x8x128xf32, #tpu.memory_space<vmem>>, %arg5: memref<8x128xf32, #tpu.memory_space<vmem>>, %arg6: memref<8x128xf32, #tpu.memory_space<vmem>>) attributes {dimension_semantics = [#tpu.dimension_semantics<parallel>, #tpu.dimension_semantics<arbitrary>], iteration_bounds = array<i64: 1, 1>, scalar_prefetch = 0 : i64, scratch_operands = 2 : i64, tpu.core_type = #tpu.core_type<tc>, window_params = [{transform_indices = @transform_0, window_bounds = array<i64: 8, 8, 512>}, {pipeline_mode = #tpu.pipeline_mode<synchronous>, transform_indices = @transform_1, window_bounds = array<i64: 128, 512>}, {transform_indices = @transform_2, window_bounds = array<i64: 8, 8, 128>}]} {
    %c0_i32 = arith.constant 0 : i32
    %0 = arith.cmpi eq, %arg1, %c0_i32 : i32
    %1 = arith.extui %0 : i1 to i32
    %c0_i32_0 = arith.constant 0 : i32
    %2 = arith.cmpi ne, %1, %c0_i32_0 : i32
    scf.if %2 {
      %cst_66 = arith.constant 0.000000e+00 : f32
      %208 = vector.broadcast %cst_66 : f32 to vector<8x128xf32>
      %c0_67 = arith.constant 0 : index
      %c0_68 = arith.constant 0 : index
      %209 = vector.load %arg5[%c0_67, %c0_68] : memref<8x128xf32, #tpu.memory_space<vmem>>, vector<8x128xf32>
      tpu.vector_store %arg5[%c0_67, %c0_68], %208 {strides = array<i32>} : memref<8x128xf32, #tpu.memory_space<vmem>>, vector<8x128xf32>,
      %cst_69 = arith.constant 0.000000e+00 : f32
      %210 = vector.broadcast %cst_69 : f32 to vector<8x128xf32>
      %c0_70 = arith.constant 0 : index
      %c0_71 = arith.constant 0 : index
      %211 = vector.load %arg6[%c0_70, %c0_71] : memref<8x128xf32, #tpu.memory_space<vmem>>, vector<8x128xf32>
      tpu.vector_store %arg6[%c0_70, %c0_71], %210 {strides = array<i32>} : memref<8x128xf32, #tpu.memory_space<vmem>>, vector<8x128xf32>,
    } else {
    }
    %c0 = arith.constant 0 : index
    %c0_1 = arith.constant 0 : index
    %3 = vector.load %arg3[%c0, %c0_1] : memref<128x512xbf16, #tpu.memory_space<vmem>>, vector<128x512xbf16>
    %c0_2 = arith.constant 0 : index
    %c0_3 = arith.constant 0 : index
    %4 = vector.load %arg5[%c0_2, %c0_3] : memref<8x128xf32, #tpu.memory_space<vmem>>, vector<8x128xf32>
    %c0_4 = arith.constant 0 : index
    %c0_5 = arith.constant 0 : index
    %5 = vector.load %arg6[%c0_4, %c0_5] : memref<8x128xf32, #tpu.memory_space<vmem>>, vector<8x128xf32>
    %c0_6 = arith.constant 0 : index
    %c0_7 = arith.constant 0 : index
    %c0_8 = arith.constant 0 : index
    %6 = vector.load %arg2[%c0_6, %c0_7, %c0_8] : memref<8x8x512xbf16, #tpu.memory_space<vmem>>, vector<1x8x512xbf16>
    %7 = vector.shape_cast %6 : vector<1x8x512xbf16> to vector<8x512xbf16>
    %8 = arith.extf %7 : vector<8x512xbf16> to vector<8x512xf32>
    %9 = arith.truncf %4 : vector<8x128xf32> to vector<8x128xbf16>
    %cst = arith.constant dense<0.000000e+00> : vector<8x512xf32>
    %10 = tpu.matmul %9, %3, %cst {dimension_numbers = #tpu.dot_dimension_numbers<[1], [0], [0], [1], [0, 0, 1, 1], [], []>} : vector<8x128xbf16>, vector<128x512xbf16>, vector<8x512xf32> -> vector<8x512xf32>
    %11 = arith.addf %8, %10 : vector<8x512xf32>
    %12 = vector.extract_strided_slice %11 {offsets = [0, 0], sizes = [8, 384], strides = [1, 1]} : vector<8x512xf32> to vector<8x384xf32>
    %13 = arith.negf %12 : vector<8x384xf32>
    %14 = math.exp %13 : vector<8x384xf32>
    %cst_9 = arith.constant 1.000000e+00 : f32
    %15 = vector.broadcast %cst_9 : f32 to vector<8x384xf32>
    %16 = arith.addf %15, %14 : vector<8x384xf32>
    %17 = arith.divf %15, %16 : vector<8x384xf32>
    %18 = vector.extract_strided_slice %11 {offsets = [0, 384], sizes = [8, 128], strides = [1, 1]} : vector<8x512xf32> to vector<8x128xf32>
    %19 = math.tanh %18 : vector<8x128xf32>
    %20 = vector.extract_strided_slice %17 {offsets = [0, 0], sizes = [8, 128], strides = [1, 1]} : vector<8x384xf32> to vector<8x128xf32>
    %21 = vector.extract_strided_slice %17 {offsets = [0, 128], sizes = [8, 128], strides = [1, 1]} : vector<8x384xf32> to vector<8x128xf32>
    %22 = vector.extract_strided_slice %17 {offsets = [0, 256], sizes = [8, 128], strides = [1, 1]} : vector<8x384xf32> to vector<8x128xf32>
    %23 = arith.mulf %21, %5 : vector<8x128xf32>
    %24 = arith.mulf %20, %19 : vector<8x128xf32>
    %25 = arith.addf %23, %24 : vector<8x128xf32>
    %26 = math.tanh %25 : vector<8x128xf32>
    %27 = arith.mulf %22, %26 : vector<8x128xf32>
    %c0_10 = arith.constant 0 : index
    %c0_11 = arith.constant 0 : index
    %c0_12 = arith.constant 0 : index
    %28 = vector.load %arg4[%c0_10, %c0_11, %c0_12] : memref<8x8x128xf32, #tpu.memory_space<vmem>>, vector<1x8x128xf32>
    %29 = vector.shape_cast %28 : vector<1x8x128xf32> to vector<8x128xf32>
    %30 = vector.shape_cast %27 : vector<8x128xf32> to vector<1x8x128xf32>
    tpu.vector_store %arg4[%c0_10, %c0_11, %c0_12], %30 {strides = array<i32>} : memref<8x8x128xf32, #tpu.memory_space<vmem>>, vector<1x8x128xf32>,
    %c1 = arith.constant 1 : index
    %c0_13 = arith.constant 0 : index
    %c0_14 = arith.constant 0 : index
    %31 = vector.load %arg2[%c1, %c0_13, %c0_14] : memref<8x8x512xbf16, #tpu.memory_space<vmem>>, vector<1x8x512xbf16>
    %32 = vector.shape_cast %31 : vector<1x8x512xbf16> to vector<8x512xbf16>
    %33 = arith.extf %32 : vector<8x512xbf16> to vector<8x512xf32>
    %34 = arith.truncf %27 : vector<8x128xf32> to vector<8x128xbf16>
    %cst_15 = arith.constant dense<0.000000e+00> : vector<8x512xf32>
    %35 = tpu.matmul %34, %3, %cst_15 {dimension_numbers = #tpu.dot_dimension_numbers<[1], [0], [0], [1], [0, 0, 1, 1], [], []>} : vector<8x128xbf16>, vector<128x512xbf16>, vector<8x512xf32> -> vector<8x512xf32>
    %36 = arith.addf %33, %35 : vector<8x512xf32>
    %37 = vector.extract_strided_slice %36 {offsets = [0, 0], sizes = [8, 384], strides = [1, 1]} : vector<8x512xf32> to vector<8x384xf32>
    %38 = arith.negf %37 : vector<8x384xf32>
    %39 = math.exp %38 : vector<8x384xf32>
    %cst_16 = arith.constant 1.000000e+00 : f32
    %40 = vector.broadcast %cst_16 : f32 to vector<8x384xf32>
    %41 = arith.addf %40, %39 : vector<8x384xf32>
    %42 = arith.divf %40, %41 : vector<8x384xf32>
    %43 = vector.extract_strided_slice %36 {offsets = [0, 384], sizes = [8, 128], strides = [1, 1]} : vector<8x512xf32> to vector<8x128xf32>
    %44 = math.tanh %43 : vector<8x128xf32>
    %45 = vector.extract_strided_slice %42 {offsets = [0, 0], sizes = [8, 128], strides = [1, 1]} : vector<8x384xf32> to vector<8x128xf32>
    %46 = vector.extract_strided_slice %42 {offsets = [0, 128], sizes = [8, 128], strides = [1, 1]} : vector<8x384xf32> to vector<8x128xf32>
    %47 = vector.extract_strided_slice %42 {offsets = [0, 256], sizes = [8, 128], strides = [1, 1]} : vector<8x384xf32> to vector<8x128xf32>
    %48 = arith.mulf %46, %25 : vector<8x128xf32>
    %49 = arith.mulf %45, %44 : vector<8x128xf32>
    %50 = arith.addf %48, %49 : vector<8x128xf32>
    %51 = math.tanh %50 : vector<8x128xf32>
    %52 = arith.mulf %47, %51 : vector<8x128xf32>
    %c1_17 = arith.constant 1 : index
    %c0_18 = arith.constant 0 : index
    %c0_19 = arith.constant 0 : index
    %53 = vector.load %arg4[%c1_17, %c0_18, %c0_19] : memref<8x8x128xf32, #tpu.memory_space<vmem>>, vector<1x8x128xf32>
    %54 = vector.shape_cast %53 : vector<1x8x128xf32> to vector<8x128xf32>
    %55 = vector.shape_cast %52 : vector<8x128xf32> to vector<1x8x128xf32>
    tpu.vector_store %arg4[%c1_17, %c0_18, %c0_19], %55 {strides = array<i32>} : memref<8x8x128xf32, #tpu.memory_space<vmem>>, vector<1x8x128xf32>,
    %c2 = arith.constant 2 : index
    %c0_20 = arith.constant 0 : index
    %c0_21 = arith.constant 0 : index
    %56 = vector.load %arg2[%c2, %c0_20, %c0_21] : memref<8x8x512xbf16, #tpu.memory_space<vmem>>, vector<1x8x512xbf16>
    %57 = vector.shape_cast %56 : vector<1x8x512xbf16> to vector<8x512xbf16>
    %58 = arith.extf %57 : vector<8x512xbf16> to vector<8x512xf32>
    %59 = arith.truncf %52 : vector<8x128xf32> to vector<8x128xbf16>
    %cst_22 = arith.constant dense<0.000000e+00> : vector<8x512xf32>
    %60 = tpu.matmul %59, %3, %cst_22 {dimension_numbers = #tpu.dot_dimension_numbers<[1], [0], [0], [1], [0, 0, 1, 1], [], []>} : vector<8x128xbf16>, vector<128x512xbf16>, vector<8x512xf32> -> vector<8x512xf32>
    %61 = arith.addf %58, %60 : vector<8x512xf32>
    %62 = vector.extract_strided_slice %61 {offsets = [0, 0], sizes = [8, 384], strides = [1, 1]} : vector<8x512xf32> to vector<8x384xf32>
    %63 = arith.negf %62 : vector<8x384xf32>
    %64 = math.exp %63 : vector<8x384xf32>
    %cst_23 = arith.constant 1.000000e+00 : f32
    %65 = vector.broadcast %cst_23 : f32 to vector<8x384xf32>
    %66 = arith.addf %65, %64 : vector<8x384xf32>
    %67 = arith.divf %65, %66 : vector<8x384xf32>
    %68 = vector.extract_strided_slice %61 {offsets = [0, 384], sizes = [8, 128], strides = [1, 1]} : vector<8x512xf32> to vector<8x128xf32>
    %69 = math.tanh %68 : vector<8x128xf32>
    %70 = vector.extract_strided_slice %67 {offsets = [0, 0], sizes = [8, 128], strides = [1, 1]} : vector<8x384xf32> to vector<8x128xf32>
    %71 = vector.extract_strided_slice %67 {offsets = [0, 128], sizes = [8, 128], strides = [1, 1]} : vector<8x384xf32> to vector<8x128xf32>
    %72 = vector.extract_strided_slice %67 {offsets = [0, 256], sizes = [8, 128], strides = [1, 1]} : vector<8x384xf32> to vector<8x128xf32>
    %73 = arith.mulf %71, %50 : vector<8x128xf32>
    %74 = arith.mulf %70, %69 : vector<8x128xf32>
    %75 = arith.addf %73, %74 : vector<8x128xf32>
    %76 = math.tanh %75 : vector<8x128xf32>
    %77 = arith.mulf %72, %76 : vector<8x128xf32>
    %c2_24 = arith.constant 2 : index
    %c0_25 = arith.constant 0 : index
    %c0_26 = arith.constant 0 : index
    %78 = vector.load %arg4[%c2_24, %c0_25, %c0_26] : memref<8x8x128xf32, #tpu.memory_space<vmem>>, vector<1x8x128xf32>
    %79 = vector.shape_cast %78 : vector<1x8x128xf32> to vector<8x128xf32>
    %80 = vector.shape_cast %77 : vector<8x128xf32> to vector<1x8x128xf32>
    tpu.vector_store %arg4[%c2_24, %c0_25, %c0_26], %80 {strides = array<i32>} : memref<8x8x128xf32, #tpu.memory_space<vmem>>, vector<1x8x128xf32>,
    %c3 = arith.constant 3 : index
    %c0_27 = arith.constant 0 : index
    %c0_28 = arith.constant 0 : index
    %81 = vector.load %arg2[%c3, %c0_27, %c0_28] : memref<8x8x512xbf16, #tpu.memory_space<vmem>>, vector<1x8x512xbf16>
    %82 = vector.shape_cast %81 : vector<1x8x512xbf16> to vector<8x512xbf16>
    %83 = arith.extf %82 : vector<8x512xbf16> to vector<8x512xf32>
    %84 = arith.truncf %77 : vector<8x128xf32> to vector<8x128xbf16>
    %cst_29 = arith.constant dense<0.000000e+00> : vector<8x512xf32>
    %85 = tpu.matmul %84, %3, %cst_29 {dimension_numbers = #tpu.dot_dimension_numbers<[1], [0], [0], [1], [0, 0, 1, 1], [], []>} : vector<8x128xbf16>, vector<128x512xbf16>, vector<8x512xf32> -> vector<8x512xf32>
    %86 = arith.addf %83, %85 : vector<8x512xf32>
    %87 = vector.extract_strided_slice %86 {offsets = [0, 0], sizes = [8, 384], strides = [1, 1]} : vector<8x512xf32> to vector<8x384xf32>
    %88 = arith.negf %87 : vector<8x384xf32>
    %89 = math.exp %88 : vector<8x384xf32>
    %cst_30 = arith.constant 1.000000e+00 : f32
    %90 = vector.broadcast %cst_30 : f32 to vector<8x384xf32>
    %91 = arith.addf %90, %89 : vector<8x384xf32>
    %92 = arith.divf %90, %91 : vector<8x384xf32>
    %93 = vector.extract_strided_slice %86 {offsets = [0, 384], sizes = [8, 128], strides = [1, 1]} : vector<8x512xf32> to vector<8x128xf32>
    %94 = math.tanh %93 : vector<8x128xf32>
    %95 = vector.extract_strided_slice %92 {offsets = [0, 0], sizes = [8, 128], strides = [1, 1]} : vector<8x384xf32> to vector<8x128xf32>
    %96 = vector.extract_strided_slice %92 {offsets = [0, 128], sizes = [8, 128], strides = [1, 1]} : vector<8x384xf32> to vector<8x128xf32>
    %97 = vector.extract_strided_slice %92 {offsets = [0, 256], sizes = [8, 128], strides = [1, 1]} : vector<8x384xf32> to vector<8x128xf32>
    %98 = arith.mulf %96, %75 : vector<8x128xf32>
    %99 = arith.mulf %95, %94 : vector<8x128xf32>
    %100 = arith.addf %98, %99 : vector<8x128xf32>
    %101 = math.tanh %100 : vector<8x128xf32>
    %102 = arith.mulf %97, %101 : vector<8x128xf32>
    %c3_31 = arith.constant 3 : index
    %c0_32 = arith.constant 0 : index
    %c0_33 = arith.constant 0 : index
    %103 = vector.load %arg4[%c3_31, %c0_32, %c0_33] : memref<8x8x128xf32, #tpu.memory_space<vmem>>, vector<1x8x128xf32>
    %104 = vector.shape_cast %103 : vector<1x8x128xf32> to vector<8x128xf32>
    %105 = vector.shape_cast %102 : vector<8x128xf32> to vector<1x8x128xf32>
    tpu.vector_store %arg4[%c3_31, %c0_32, %c0_33], %105 {strides = array<i32>} : memref<8x8x128xf32, #tpu.memory_space<vmem>>, vector<1x8x128xf32>,
    %c4 = arith.constant 4 : index
    %c0_34 = arith.constant 0 : index
    %c0_35 = arith.constant 0 : index
    %106 = vector.load %arg2[%c4, %c0_34, %c0_35] : memref<8x8x512xbf16, #tpu.memory_space<vmem>>, vector<1x8x512xbf16>
    %107 = vector.shape_cast %106 : vector<1x8x512xbf16> to vector<8x512xbf16>
    %108 = arith.extf %107 : vector<8x512xbf16> to vector<8x512xf32>
    %109 = arith.truncf %102 : vector<8x128xf32> to vector<8x128xbf16>
    %cst_36 = arith.constant dense<0.000000e+00> : vector<8x512xf32>
    %110 = tpu.matmul %109, %3, %cst_36 {dimension_numbers = #tpu.dot_dimension_numbers<[1], [0], [0], [1], [0, 0, 1, 1], [], []>} : vector<8x128xbf16>, vector<128x512xbf16>, vector<8x512xf32> -> vector<8x512xf32>
    %111 = arith.addf %108, %110 : vector<8x512xf32>
    %112 = vector.extract_strided_slice %111 {offsets = [0, 0], sizes = [8, 384], strides = [1, 1]} : vector<8x512xf32> to vector<8x384xf32>
    %113 = arith.negf %112 : vector<8x384xf32>
    %114 = math.exp %113 : vector<8x384xf32>
    %cst_37 = arith.constant 1.000000e+00 : f32
    %115 = vector.broadcast %cst_37 : f32 to vector<8x384xf32>
    %116 = arith.addf %115, %114 : vector<8x384xf32>
    %117 = arith.divf %115, %116 : vector<8x384xf32>
    %118 = vector.extract_strided_slice %111 {offsets = [0, 384], sizes = [8, 128], strides = [1, 1]} : vector<8x512xf32> to vector<8x128xf32>
    %119 = math.tanh %118 : vector<8x128xf32>
    %120 = vector.extract_strided_slice %117 {offsets = [0, 0], sizes = [8, 128], strides = [1, 1]} : vector<8x384xf32> to vector<8x128xf32>
    %121 = vector.extract_strided_slice %117 {offsets = [0, 128], sizes = [8, 128], strides = [1, 1]} : vector<8x384xf32> to vector<8x128xf32>
    %122 = vector.extract_strided_slice %117 {offsets = [0, 256], sizes = [8, 128], strides = [1, 1]} : vector<8x384xf32> to vector<8x128xf32>
    %123 = arith.mulf %121, %100 : vector<8x128xf32>
    %124 = arith.mulf %120, %119 : vector<8x128xf32>
    %125 = arith.addf %123, %124 : vector<8x128xf32>
    %126 = math.tanh %125 : vector<8x128xf32>
    %127 = arith.mulf %122, %126 : vector<8x128xf32>
    %c4_38 = arith.constant 4 : index
    %c0_39 = arith.constant 0 : index
    %c0_40 = arith.constant 0 : index
    %128 = vector.load %arg4[%c4_38, %c0_39, %c0_40] : memref<8x8x128xf32, #tpu.memory_space<vmem>>, vector<1x8x128xf32>
    %129 = vector.shape_cast %128 : vector<1x8x128xf32> to vector<8x128xf32>
    %130 = vector.shape_cast %127 : vector<8x128xf32> to vector<1x8x128xf32>
    tpu.vector_store %arg4[%c4_38, %c0_39, %c0_40], %130 {strides = array<i32>} : memref<8x8x128xf32, #tpu.memory_space<vmem>>, vector<1x8x128xf32>,
    %c5 = arith.constant 5 : index
    %c0_41 = arith.constant 0 : index
    %c0_42 = arith.constant 0 : index
    %131 = vector.load %arg2[%c5, %c0_41, %c0_42] : memref<8x8x512xbf16, #tpu.memory_space<vmem>>, vector<1x8x512xbf16>
    %132 = vector.shape_cast %131 : vector<1x8x512xbf16> to vector<8x512xbf16>
    %133 = arith.extf %132 : vector<8x512xbf16> to vector<8x512xf32>
    %134 = arith.truncf %127 : vector<8x128xf32> to vector<8x128xbf16>
    %cst_43 = arith.constant dense<0.000000e+00> : vector<8x512xf32>
    %135 = tpu.matmul %134, %3, %cst_43 {dimension_numbers = #tpu.dot_dimension_numbers<[1], [0], [0], [1], [0, 0, 1, 1], [], []>} : vector<8x128xbf16>, vector<128x512xbf16>, vector<8x512xf32> -> vector<8x512xf32>
    %136 = arith.addf %133, %135 : vector<8x512xf32>
    %137 = vector.extract_strided_slice %136 {offsets = [0, 0], sizes = [8, 384], strides = [1, 1]} : vector<8x512xf32> to vector<8x384xf32>
    %138 = arith.negf %137 : vector<8x384xf32>
    %139 = math.exp %138 : vector<8x384xf32>
    %cst_44 = arith.constant 1.000000e+00 : f32
    %140 = vector.broadcast %cst_44 : f32 to vector<8x384xf32>
    %141 = arith.addf %140, %139 : vector<8x384xf32>
    %142 = arith.divf %140, %141 : vector<8x384xf32>
    %143 = vector.extract_strided_slice %136 {offsets = [0, 384], sizes = [8, 128], strides = [1, 1]} : vector<8x512xf32> to vector<8x128xf32>
    %144 = math.tanh %143 : vector<8x128xf32>
    %145 = vector.extract_strided_slice %142 {offsets = [0, 0], sizes = [8, 128], strides = [1, 1]} : vector<8x384xf32> to vector<8x128xf32>
    %146 = vector.extract_strided_slice %142 {offsets = [0, 128], sizes = [8, 128], strides = [1, 1]} : vector<8x384xf32> to vector<8x128xf32>
    %147 = vector.extract_strided_slice %142 {offsets = [0, 256], sizes = [8, 128], strides = [1, 1]} : vector<8x384xf32> to vector<8x128xf32>
    %148 = arith.mulf %146, %125 : vector<8x128xf32>
    %149 = arith.mulf %145, %144 : vector<8x128xf32>
    %150 = arith.addf %148, %149 : vector<8x128xf32>
    %151 = math.tanh %150 : vector<8x128xf32>
    %152 = arith.mulf %147, %151 : vector<8x128xf32>
    %c5_45 = arith.constant 5 : index
    %c0_46 = arith.constant 0 : index
    %c0_47 = arith.constant 0 : index
    %153 = vector.load %arg4[%c5_45, %c0_46, %c0_47] : memref<8x8x128xf32, #tpu.memory_space<vmem>>, vector<1x8x128xf32>
    %154 = vector.shape_cast %153 : vector<1x8x128xf32> to vector<8x128xf32>
    %155 = vector.shape_cast %152 : vector<8x128xf32> to vector<1x8x128xf32>
    tpu.vector_store %arg4[%c5_45, %c0_46, %c0_47], %155 {strides = array<i32>} : memref<8x8x128xf32, #tpu.memory_space<vmem>>, vector<1x8x128xf32>,
    %c6 = arith.constant 6 : index
    %c0_48 = arith.constant 0 : index
    %c0_49 = arith.constant 0 : index
    %156 = vector.load %arg2[%c6, %c0_48, %c0_49] : memref<8x8x512xbf16, #tpu.memory_space<vmem>>, vector<1x8x512xbf16>
    %157 = vector.shape_cast %156 : vector<1x8x512xbf16> to vector<8x512xbf16>
    %158 = arith.extf %157 : vector<8x512xbf16> to vector<8x512xf32>
    %159 = arith.truncf %152 : vector<8x128xf32> to vector<8x128xbf16>
    %cst_50 = arith.constant dense<0.000000e+00> : vector<8x512xf32>
    %160 = tpu.matmul %159, %3, %cst_50 {dimension_numbers = #tpu.dot_dimension_numbers<[1], [0], [0], [1], [0, 0, 1, 1], [], []>} : vector<8x128xbf16>, vector<128x512xbf16>, vector<8x512xf32> -> vector<8x512xf32>
    %161 = arith.addf %158, %160 : vector<8x512xf32>
    %162 = vector.extract_strided_slice %161 {offsets = [0, 0], sizes = [8, 384], strides = [1, 1]} : vector<8x512xf32> to vector<8x384xf32>
    %163 = arith.negf %162 : vector<8x384xf32>
    %164 = math.exp %163 : vector<8x384xf32>
    %cst_51 = arith.constant 1.000000e+00 : f32
    %165 = vector.broadcast %cst_51 : f32 to vector<8x384xf32>
    %166 = arith.addf %165, %164 : vector<8x384xf32>
    %167 = arith.divf %165, %166 : vector<8x384xf32>
    %168 = vector.extract_strided_slice %161 {offsets = [0, 384], sizes = [8, 128], strides = [1, 1]} : vector<8x512xf32> to vector<8x128xf32>
    %169 = math.tanh %168 : vector<8x128xf32>
    %170 = vector.extract_strided_slice %167 {offsets = [0, 0], sizes = [8, 128], strides = [1, 1]} : vector<8x384xf32> to vector<8x128xf32>
    %171 = vector.extract_strided_slice %167 {offsets = [0, 128], sizes = [8, 128], strides = [1, 1]} : vector<8x384xf32> to vector<8x128xf32>
    %172 = vector.extract_strided_slice %167 {offsets = [0, 256], sizes = [8, 128], strides = [1, 1]} : vector<8x384xf32> to vector<8x128xf32>
    %173 = arith.mulf %171, %150 : vector<8x128xf32>
    %174 = arith.mulf %170, %169 : vector<8x128xf32>
    %175 = arith.addf %173, %174 : vector<8x128xf32>
    %176 = math.tanh %175 : vector<8x128xf32>
    %177 = arith.mulf %172, %176 : vector<8x128xf32>
    %c6_52 = arith.constant 6 : index
    %c0_53 = arith.constant 0 : index
    %c0_54 = arith.constant 0 : index
    %178 = vector.load %arg4[%c6_52, %c0_53, %c0_54] : memref<8x8x128xf32, #tpu.memory_space<vmem>>, vector<1x8x128xf32>
    %179 = vector.shape_cast %178 : vector<1x8x128xf32> to vector<8x128xf32>
    %180 = vector.shape_cast %177 : vector<8x128xf32> to vector<1x8x128xf32>
    tpu.vector_store %arg4[%c6_52, %c0_53, %c0_54], %180 {strides = array<i32>} : memref<8x8x128xf32, #tpu.memory_space<vmem>>, vector<1x8x128xf32>,
    %c7 = arith.constant 7 : index
    %c0_55 = arith.constant 0 : index
    %c0_56 = arith.constant 0 : index
    %181 = vector.load %arg2[%c7, %c0_55, %c0_56] : memref<8x8x512xbf16, #tpu.memory_space<vmem>>, vector<1x8x512xbf16>
    %182 = vector.shape_cast %181 : vector<1x8x512xbf16> to vector<8x512xbf16>
    %183 = arith.extf %182 : vector<8x512xbf16> to vector<8x512xf32>
    %184 = arith.truncf %177 : vector<8x128xf32> to vector<8x128xbf16>
    %cst_57 = arith.constant dense<0.000000e+00> : vector<8x512xf32>
    %185 = tpu.matmul %184, %3, %cst_57 {dimension_numbers = #tpu.dot_dimension_numbers<[1], [0], [0], [1], [0, 0, 1, 1], [], []>} : vector<8x128xbf16>, vector<128x512xbf16>, vector<8x512xf32> -> vector<8x512xf32>
    %186 = arith.addf %183, %185 : vector<8x512xf32>
    %187 = vector.extract_strided_slice %186 {offsets = [0, 0], sizes = [8, 384], strides = [1, 1]} : vector<8x512xf32> to vector<8x384xf32>
    %188 = arith.negf %187 : vector<8x384xf32>
    %189 = math.exp %188 : vector<8x384xf32>
    %cst_58 = arith.constant 1.000000e+00 : f32
    %190 = vector.broadcast %cst_58 : f32 to vector<8x384xf32>
    %191 = arith.addf %190, %189 : vector<8x384xf32>
    %192 = arith.divf %190, %191 : vector<8x384xf32>
    %193 = vector.extract_strided_slice %186 {offsets = [0, 384], sizes = [8, 128], strides = [1, 1]} : vector<8x512xf32> to vector<8x128xf32>
    %194 = math.tanh %193 : vector<8x128xf32>
    %195 = vector.extract_strided_slice %192 {offsets = [0, 0], sizes = [8, 128], strides = [1, 1]} : vector<8x384xf32> to vector<8x128xf32>
    %196 = vector.extract_strided_slice %192 {offsets = [0, 128], sizes = [8, 128], strides = [1, 1]} : vector<8x384xf32> to vector<8x128xf32>
    %197 = vector.extract_strided_slice %192 {offsets = [0, 256], sizes = [8, 128], strides = [1, 1]} : vector<8x384xf32> to vector<8x128xf32>
    %198 = arith.mulf %196, %175 : vector<8x128xf32>
    %199 = arith.mulf %195, %194 : vector<8x128xf32>
    %200 = arith.addf %198, %199 : vector<8x128xf32>
    %201 = math.tanh %200 : vector<8x128xf32>
    %202 = arith.mulf %197, %201 : vector<8x128xf32>
    %c7_59 = arith.constant 7 : index
    %c0_60 = arith.constant 0 : index
    %c0_61 = arith.constant 0 : index
    %203 = vector.load %arg4[%c7_59, %c0_60, %c0_61] : memref<8x8x128xf32, #tpu.memory_space<vmem>>, vector<1x8x128xf32>
    %204 = vector.shape_cast %203 : vector<1x8x128xf32> to vector<8x128xf32>
    %205 = vector.shape_cast %202 : vector<8x128xf32> to vector<1x8x128xf32>
    tpu.vector_store %arg4[%c7_59, %c0_60, %c0_61], %205 {strides = array<i32>} : memref<8x8x128xf32, #tpu.memory_space<vmem>>, vector<1x8x128xf32>,
    %c0_62 = arith.constant 0 : index
    %c0_63 = arith.constant 0 : index
    %206 = vector.load %arg5[%c0_62, %c0_63] : memref<8x128xf32, #tpu.memory_space<vmem>>, vector<8x128xf32>
    tpu.vector_store %arg5[%c0_62, %c0_63], %202 {strides = array<i32>} : memref<8x128xf32, #tpu.memory_space<vmem>>, vector<8x128xf32>,
    %c0_64 = arith.constant 0 : index
    %c0_65 = arith.constant 0 : index
    %207 = vector.load %arg6[%c0_64, %c0_65] : memref<8x128xf32, #tpu.memory_space<vmem>>, vector<8x128xf32>
    tpu.vector_store %arg6[%c0_64, %c0_65], %200 {strides = array<i32>} : memref<8x128xf32, #tpu.memory_space<vmem>>, vector<8x128xf32>,
    return
  }
  func.func @transform_0(%arg0: i32, %arg1: i32) -> (i32, i32, i32) {
    %c0_i32 = arith.constant 0 : i32
    %c0_i32_0 = arith.constant 0 : i32
    return %arg1, %arg0, %c0_i32 : i32, i32, i32
  }
  func.func @transform_1(%arg0: i32, %arg1: i32) -> (i32, i32) {
    %c0_i32 = arith.constant 0 : i32
    %c0_i32_0 = arith.constant 0 : i32
    %c0_i32_1 = arith.constant 0 : i32
    return %c0_i32, %c0_i32_0 : i32, i32
  }
  func.func @transform_2(%arg0: i32, %arg1: i32) -> (i32, i32, i32) {
    %c0_i32 = arith.constant 0 : i32
    %c0_i32_0 = arith.constant 0 : i32
    return %arg1, %arg0, %c0_i32 : i32, i32, i32
  }
}

module attributes {stable_mosaic.version = 11 : i64} {
  func.func @_lstm_chunk_kernel(%arg0: i32, %arg1: i32, %arg2: memref<8x8x512xbf16, #tpu.memory_space<vmem>>, %arg3: memref<128x512xbf16, #tpu.memory_space<vmem>>, %arg4: memref<8x8x128xf32, #tpu.memory_space<vmem>>, %arg5: memref<8x128xf32, #tpu.memory_space<vmem>>, %arg6: memref<8x128xf32, #tpu.memory_space<vmem>>) attributes {dimension_semantics = [#tpu.dimension_semantics<parallel>, #tpu.dimension_semantics<arbitrary>], iteration_bounds = array<i64: 1, 1>, scalar_prefetch = 0 : i64, scratch_operands = 2 : i64, tpu.core_type = #tpu.core_type<tc>, window_params = [{transform_indices = @transform_0, window_bounds = array<i64: 8, 8, 512>}, {pipeline_mode = #tpu.pipeline_mode<synchronous>, transform_indices = @transform_1, window_bounds = array<i64: 128, 512>}, {transform_indices = @transform_2, window_bounds = array<i64: 8, 8, 128>}]} {
    %c0_i32 = arith.constant 0 : i32
    %0 = arith.cmpi eq, %arg1, %c0_i32 : i32
    %1 = arith.extui %0 : i1 to i32
    %c0_i32_0 = arith.constant 0 : i32
    %2 = arith.cmpi ne, %1, %c0_i32_0 : i32
    scf.if %2 {
      %cst_66 = arith.constant 0.000000e+00 : f32
      %208 = vector.broadcast %cst_66 : f32 to vector<8x128xf32>
      %c0_67 = arith.constant 0 : index
      %c0_68 = arith.constant 0 : index
      %209 = vector.load %arg5[%c0_67, %c0_68] : memref<8x128xf32, #tpu.memory_space<vmem>>, vector<8x128xf32>
      tpu.vector_store %arg5[%c0_67, %c0_68], %208 {strides = array<i32>} : memref<8x128xf32, #tpu.memory_space<vmem>>, vector<8x128xf32>,
      %cst_69 = arith.constant 0.000000e+00 : f32
      %210 = vector.broadcast %cst_69 : f32 to vector<8x128xf32>
      %c0_70 = arith.constant 0 : index
      %c0_71 = arith.constant 0 : index
      %211 = vector.load %arg6[%c0_70, %c0_71] : memref<8x128xf32, #tpu.memory_space<vmem>>, vector<8x128xf32>
      tpu.vector_store %arg6[%c0_70, %c0_71], %210 {strides = array<i32>} : memref<8x128xf32, #tpu.memory_space<vmem>>, vector<8x128xf32>,
    } else {
    }
    %c0 = arith.constant 0 : index
    %c0_1 = arith.constant 0 : index
    %3 = vector.load %arg3[%c0, %c0_1] : memref<128x512xbf16, #tpu.memory_space<vmem>>, vector<128x512xbf16>
    %c0_2 = arith.constant 0 : index
    %c0_3 = arith.constant 0 : index
    %4 = vector.load %arg5[%c0_2, %c0_3] : memref<8x128xf32, #tpu.memory_space<vmem>>, vector<8x128xf32>
    %c0_4 = arith.constant 0 : index
    %c0_5 = arith.constant 0 : index
    %5 = vector.load %arg6[%c0_4, %c0_5] : memref<8x128xf32, #tpu.memory_space<vmem>>, vector<8x128xf32>
    %c0_6 = arith.constant 0 : index
    %c0_7 = arith.constant 0 : index
    %c0_8 = arith.constant 0 : index
    %6 = vector.load %arg2[%c0_6, %c0_7, %c0_8] : memref<8x8x512xbf16, #tpu.memory_space<vmem>>, vector<1x8x512xbf16>
    %7 = vector.shape_cast %6 : vector<1x8x512xbf16> to vector<8x512xbf16>
    %8 = arith.extf %7 : vector<8x512xbf16> to vector<8x512xf32>
    %9 = arith.truncf %4 : vector<8x128xf32> to vector<8x128xbf16>
    %cst = arith.constant dense<0.000000e+00> : vector<8x512xf32>
    %10 = tpu.matmul %9, %3, %cst {dimension_numbers = #tpu.dot_dimension_numbers<[1], [0], [0], [1], [0, 0, 1, 1], [], []>} : vector<8x128xbf16>, vector<128x512xbf16>, vector<8x512xf32> -> vector<8x512xf32>
    %11 = arith.addf %8, %10 : vector<8x512xf32>
    %12 = vector.extract_strided_slice %11 {offsets = [0, 0], sizes = [8, 384], strides = [1, 1]} : vector<8x512xf32> to vector<8x384xf32>
    %13 = arith.negf %12 : vector<8x384xf32>
    %14 = math.exp %13 : vector<8x384xf32>
    %cst_9 = arith.constant 1.000000e+00 : f32
    %15 = vector.broadcast %cst_9 : f32 to vector<8x384xf32>
    %16 = arith.addf %15, %14 : vector<8x384xf32>
    %17 = arith.divf %15, %16 : vector<8x384xf32>
    %18 = vector.extract_strided_slice %11 {offsets = [0, 384], sizes = [8, 128], strides = [1, 1]} : vector<8x512xf32> to vector<8x128xf32>
    %19 = math.tanh %18 : vector<8x128xf32>
    %20 = vector.extract_strided_slice %17 {offsets = [0, 0], sizes = [8, 128], strides = [1, 1]} : vector<8x384xf32> to vector<8x128xf32>
    %21 = vector.extract_strided_slice %17 {offsets = [0, 128], sizes = [8, 128], strides = [1, 1]} : vector<8x384xf32> to vector<8x128xf32>
    %22 = vector.extract_strided_slice %17 {offsets = [0, 256], sizes = [8, 128], strides = [1, 1]} : vector<8x384xf32> to vector<8x128xf32>
    %23 = arith.mulf %21, %5 : vector<8x128xf32>
    %24 = arith.mulf %20, %19 : vector<8x128xf32>
    %25 = arith.addf %23, %24 : vector<8x128xf32>
    %26 = math.tanh %25 : vector<8x128xf32>
    %27 = arith.mulf %22, %26 : vector<8x128xf32>
    %c0_10 = arith.constant 0 : index
    %c0_11 = arith.constant 0 : index
    %c0_12 = arith.constant 0 : index
    %28 = vector.load %arg4[%c0_10, %c0_11, %c0_12] : memref<8x8x128xf32, #tpu.memory_space<vmem>>, vector<1x8x128xf32>
    %29 = vector.shape_cast %28 : vector<1x8x128xf32> to vector<8x128xf32>
    %30 = vector.shape_cast %27 : vector<8x128xf32> to vector<1x8x128xf32>
    tpu.vector_store %arg4[%c0_10, %c0_11, %c0_12], %30 {strides = array<i32>} : memref<8x8x128xf32, #tpu.memory_space<vmem>>, vector<1x8x128xf32>,
    %c1 = arith.constant 1 : index
    %c0_13 = arith.constant 0 : index
    %c0_14 = arith.constant 0 : index
    %31 = vector.load %arg2[%c1, %c0_13, %c0_14] : memref<8x8x512xbf16, #tpu.memory_space<vmem>>, vector<1x8x512xbf16>
    %32 = vector.shape_cast %31 : vector<1x8x512xbf16> to vector<8x512xbf16>
    %33 = arith.extf %32 : vector<8x512xbf16> to vector<8x512xf32>
    %34 = arith.truncf %27 : vector<8x128xf32> to vector<8x128xbf16>
    %cst_15 = arith.constant dense<0.000000e+00> : vector<8x512xf32>
    %35 = tpu.matmul %34, %3, %cst_15 {dimension_numbers = #tpu.dot_dimension_numbers<[1], [0], [0], [1], [0, 0, 1, 1], [], []>} : vector<8x128xbf16>, vector<128x512xbf16>, vector<8x512xf32> -> vector<8x512xf32>
    %36 = arith.addf %33, %35 : vector<8x512xf32>
    %37 = vector.extract_strided_slice %36 {offsets = [0, 0], sizes = [8, 384], strides = [1, 1]} : vector<8x512xf32> to vector<8x384xf32>
    %38 = arith.negf %37 : vector<8x384xf32>
    %39 = math.exp %38 : vector<8x384xf32>
    %cst_16 = arith.constant 1.000000e+00 : f32
    %40 = vector.broadcast %cst_16 : f32 to vector<8x384xf32>
    %41 = arith.addf %40, %39 : vector<8x384xf32>
    %42 = arith.divf %40, %41 : vector<8x384xf32>
    %43 = vector.extract_strided_slice %36 {offsets = [0, 384], sizes = [8, 128], strides = [1, 1]} : vector<8x512xf32> to vector<8x128xf32>
    %44 = math.tanh %43 : vector<8x128xf32>
    %45 = vector.extract_strided_slice %42 {offsets = [0, 0], sizes = [8, 128], strides = [1, 1]} : vector<8x384xf32> to vector<8x128xf32>
    %46 = vector.extract_strided_slice %42 {offsets = [0, 128], sizes = [8, 128], strides = [1, 1]} : vector<8x384xf32> to vector<8x128xf32>
    %47 = vector.extract_strided_slice %42 {offsets = [0, 256], sizes = [8, 128], strides = [1, 1]} : vector<8x384xf32> to vector<8x128xf32>
    %48 = arith.mulf %46, %25 : vector<8x128xf32>
    %49 = arith.mulf %45, %44 : vector<8x128xf32>
    %50 = arith.addf %48, %49 : vector<8x128xf32>
    %51 = math.tanh %50 : vector<8x128xf32>
    %52 = arith.mulf %47, %51 : vector<8x128xf32>
    %c1_17 = arith.constant 1 : index
    %c0_18 = arith.constant 0 : index
    %c0_19 = arith.constant 0 : index
    %53 = vector.load %arg4[%c1_17, %c0_18, %c0_19] : memref<8x8x128xf32, #tpu.memory_space<vmem>>, vector<1x8x128xf32>
    %54 = vector.shape_cast %53 : vector<1x8x128xf32> to vector<8x128xf32>
    %55 = vector.shape_cast %52 : vector<8x128xf32> to vector<1x8x128xf32>
    tpu.vector_store %arg4[%c1_17, %c0_18, %c0_19], %55 {strides = array<i32>} : memref<8x8x128xf32, #tpu.memory_space<vmem>>, vector<1x8x128xf32>,
    %c2 = arith.constant 2 : index
    %c0_20 = arith.constant 0 : index
    %c0_21 = arith.constant 0 : index
    %56 = vector.load %arg2[%c2, %c0_20, %c0_21] : memref<8x8x512xbf16, #tpu.memory_space<vmem>>, vector<1x8x512xbf16>
    %57 = vector.shape_cast %56 : vector<1x8x512xbf16> to vector<8x512xbf16>
    %58 = arith.extf %57 : vector<8x512xbf16> to vector<8x512xf32>
    %59 = arith.truncf %52 : vector<8x128xf32> to vector<8x128xbf16>
    %cst_22 = arith.constant dense<0.000000e+00> : vector<8x512xf32>
    %60 = tpu.matmul %59, %3, %cst_22 {dimension_numbers = #tpu.dot_dimension_numbers<[1], [0], [0], [1], [0, 0, 1, 1], [], []>} : vector<8x128xbf16>, vector<128x512xbf16>, vector<8x512xf32> -> vector<8x512xf32>
    %61 = arith.addf %58, %60 : vector<8x512xf32>
    %62 = vector.extract_strided_slice %61 {offsets = [0, 0], sizes = [8, 384], strides = [1, 1]} : vector<8x512xf32> to vector<8x384xf32>
    %63 = arith.negf %62 : vector<8x384xf32>
    %64 = math.exp %63 : vector<8x384xf32>
    %cst_23 = arith.constant 1.000000e+00 : f32
    %65 = vector.broadcast %cst_23 : f32 to vector<8x384xf32>
    %66 = arith.addf %65, %64 : vector<8x384xf32>
    %67 = arith.divf %65, %66 : vector<8x384xf32>
    %68 = vector.extract_strided_slice %61 {offsets = [0, 384], sizes = [8, 128], strides = [1, 1]} : vector<8x512xf32> to vector<8x128xf32>
    %69 = math.tanh %68 : vector<8x128xf32>
    %70 = vector.extract_strided_slice %67 {offsets = [0, 0], sizes = [8, 128], strides = [1, 1]} : vector<8x384xf32> to vector<8x128xf32>
    %71 = vector.extract_strided_slice %67 {offsets = [0, 128], sizes = [8, 128], strides = [1, 1]} : vector<8x384xf32> to vector<8x128xf32>
    %72 = vector.extract_strided_slice %67 {offsets = [0, 256], sizes = [8, 128], strides = [1, 1]} : vector<8x384xf32> to vector<8x128xf32>
    %73 = arith.mulf %71, %50 : vector<8x128xf32>
    %74 = arith.mulf %70, %69 : vector<8x128xf32>
    %75 = arith.addf %73, %74 : vector<8x128xf32>
    %76 = math.tanh %75 : vector<8x128xf32>
    %77 = arith.mulf %72, %76 : vector<8x128xf32>
    %c2_24 = arith.constant 2 : index
    %c0_25 = arith.constant 0 : index
    %c0_26 = arith.constant 0 : index
    %78 = vector.load %arg4[%c2_24, %c0_25, %c0_26] : memref<8x8x128xf32, #tpu.memory_space<vmem>>, vector<1x8x128xf32>
    %79 = vector.shape_cast %78 : vector<1x8x128xf32> to vector<8x128xf32>
    %80 = vector.shape_cast %77 : vector<8x128xf32> to vector<1x8x128xf32>
    tpu.vector_store %arg4[%c2_24, %c0_25, %c0_26], %80 {strides = array<i32>} : memref<8x8x128xf32, #tpu.memory_space<vmem>>, vector<1x8x128xf32>,
    %c3 = arith.constant 3 : index
    %c0_27 = arith.constant 0 : index
    %c0_28 = arith.constant 0 : index
    %81 = vector.load %arg2[%c3, %c0_27, %c0_28] : memref<8x8x512xbf16, #tpu.memory_space<vmem>>, vector<1x8x512xbf16>
    %82 = vector.shape_cast %81 : vector<1x8x512xbf16> to vector<8x512xbf16>
    %83 = arith.extf %82 : vector<8x512xbf16> to vector<8x512xf32>
    %84 = arith.truncf %77 : vector<8x128xf32> to vector<8x128xbf16>
    %cst_29 = arith.constant dense<0.000000e+00> : vector<8x512xf32>
    %85 = tpu.matmul %84, %3, %cst_29 {dimension_numbers = #tpu.dot_dimension_numbers<[1], [0], [0], [1], [0, 0, 1, 1], [], []>} : vector<8x128xbf16>, vector<128x512xbf16>, vector<8x512xf32> -> vector<8x512xf32>
    %86 = arith.addf %83, %85 : vector<8x512xf32>
    %87 = vector.extract_strided_slice %86 {offsets = [0, 0], sizes = [8, 384], strides = [1, 1]} : vector<8x512xf32> to vector<8x384xf32>
    %88 = arith.negf %87 : vector<8x384xf32>
    %89 = math.exp %88 : vector<8x384xf32>
    %cst_30 = arith.constant 1.000000e+00 : f32
    %90 = vector.broadcast %cst_30 : f32 to vector<8x384xf32>
    %91 = arith.addf %90, %89 : vector<8x384xf32>
    %92 = arith.divf %90, %91 : vector<8x384xf32>
    %93 = vector.extract_strided_slice %86 {offsets = [0, 384], sizes = [8, 128], strides = [1, 1]} : vector<8x512xf32> to vector<8x128xf32>
    %94 = math.tanh %93 : vector<8x128xf32>
    %95 = vector.extract_strided_slice %92 {offsets = [0, 0], sizes = [8, 128], strides = [1, 1]} : vector<8x384xf32> to vector<8x128xf32>
    %96 = vector.extract_strided_slice %92 {offsets = [0, 128], sizes = [8, 128], strides = [1, 1]} : vector<8x384xf32> to vector<8x128xf32>
    %97 = vector.extract_strided_slice %92 {offsets = [0, 256], sizes = [8, 128], strides = [1, 1]} : vector<8x384xf32> to vector<8x128xf32>
    %98 = arith.mulf %96, %75 : vector<8x128xf32>
    %99 = arith.mulf %95, %94 : vector<8x128xf32>
    %100 = arith.addf %98, %99 : vector<8x128xf32>
    %101 = math.tanh %100 : vector<8x128xf32>
    %102 = arith.mulf %97, %101 : vector<8x128xf32>
    %c3_31 = arith.constant 3 : index
    %c0_32 = arith.constant 0 : index
    %c0_33 = arith.constant 0 : index
    %103 = vector.load %arg4[%c3_31, %c0_32, %c0_33] : memref<8x8x128xf32, #tpu.memory_space<vmem>>, vector<1x8x128xf32>
    %104 = vector.shape_cast %103 : vector<1x8x128xf32> to vector<8x128xf32>
    %105 = vector.shape_cast %102 : vector<8x128xf32> to vector<1x8x128xf32>
    tpu.vector_store %arg4[%c3_31, %c0_32, %c0_33], %105 {strides = array<i32>} : memref<8x8x128xf32, #tpu.memory_space<vmem>>, vector<1x8x128xf32>,
    %c4 = arith.constant 4 : index
    %c0_34 = arith.constant 0 : index
    %c0_35 = arith.constant 0 : index
    %106 = vector.load %arg2[%c4, %c0_34, %c0_35] : memref<8x8x512xbf16, #tpu.memory_space<vmem>>, vector<1x8x512xbf16>
    %107 = vector.shape_cast %106 : vector<1x8x512xbf16> to vector<8x512xbf16>
    %108 = arith.extf %107 : vector<8x512xbf16> to vector<8x512xf32>
    %109 = arith.truncf %102 : vector<8x128xf32> to vector<8x128xbf16>
    %cst_36 = arith.constant dense<0.000000e+00> : vector<8x512xf32>
    %110 = tpu.matmul %109, %3, %cst_36 {dimension_numbers = #tpu.dot_dimension_numbers<[1], [0], [0], [1], [0, 0, 1, 1], [], []>} : vector<8x128xbf16>, vector<128x512xbf16>, vector<8x512xf32> -> vector<8x512xf32>
    %111 = arith.addf %108, %110 : vector<8x512xf32>
    %112 = vector.extract_strided_slice %111 {offsets = [0, 0], sizes = [8, 384], strides = [1, 1]} : vector<8x512xf32> to vector<8x384xf32>
    %113 = arith.negf %112 : vector<8x384xf32>
    %114 = math.exp %113 : vector<8x384xf32>
    %cst_37 = arith.constant 1.000000e+00 : f32
    %115 = vector.broadcast %cst_37 : f32 to vector<8x384xf32>
    %116 = arith.addf %115, %114 : vector<8x384xf32>
    %117 = arith.divf %115, %116 : vector<8x384xf32>
    %118 = vector.extract_strided_slice %111 {offsets = [0, 384], sizes = [8, 128], strides = [1, 1]} : vector<8x512xf32> to vector<8x128xf32>
    %119 = math.tanh %118 : vector<8x128xf32>
    %120 = vector.extract_strided_slice %117 {offsets = [0, 0], sizes = [8, 128], strides = [1, 1]} : vector<8x384xf32> to vector<8x128xf32>
    %121 = vector.extract_strided_slice %117 {offsets = [0, 128], sizes = [8, 128], strides = [1, 1]} : vector<8x384xf32> to vector<8x128xf32>
    %122 = vector.extract_strided_slice %117 {offsets = [0, 256], sizes = [8, 128], strides = [1, 1]} : vector<8x384xf32> to vector<8x128xf32>
    %123 = arith.mulf %121, %100 : vector<8x128xf32>
    %124 = arith.mulf %120, %119 : vector<8x128xf32>
    %125 = arith.addf %123, %124 : vector<8x128xf32>
    %126 = math.tanh %125 : vector<8x128xf32>
    %127 = arith.mulf %122, %126 : vector<8x128xf32>
    %c4_38 = arith.constant 4 : index
    %c0_39 = arith.constant 0 : index
    %c0_40 = arith.constant 0 : index
    %128 = vector.load %arg4[%c4_38, %c0_39, %c0_40] : memref<8x8x128xf32, #tpu.memory_space<vmem>>, vector<1x8x128xf32>
    %129 = vector.shape_cast %128 : vector<1x8x128xf32> to vector<8x128xf32>
    %130 = vector.shape_cast %127 : vector<8x128xf32> to vector<1x8x128xf32>
    tpu.vector_store %arg4[%c4_38, %c0_39, %c0_40], %130 {strides = array<i32>} : memref<8x8x128xf32, #tpu.memory_space<vmem>>, vector<1x8x128xf32>,
    %c5 = arith.constant 5 : index
    %c0_41 = arith.constant 0 : index
    %c0_42 = arith.constant 0 : index
    %131 = vector.load %arg2[%c5, %c0_41, %c0_42] : memref<8x8x512xbf16, #tpu.memory_space<vmem>>, vector<1x8x512xbf16>
    %132 = vector.shape_cast %131 : vector<1x8x512xbf16> to vector<8x512xbf16>
    %133 = arith.extf %132 : vector<8x512xbf16> to vector<8x512xf32>
    %134 = arith.truncf %127 : vector<8x128xf32> to vector<8x128xbf16>
    %cst_43 = arith.constant dense<0.000000e+00> : vector<8x512xf32>
    %135 = tpu.matmul %134, %3, %cst_43 {dimension_numbers = #tpu.dot_dimension_numbers<[1], [0], [0], [1], [0, 0, 1, 1], [], []>} : vector<8x128xbf16>, vector<128x512xbf16>, vector<8x512xf32> -> vector<8x512xf32>
    %136 = arith.addf %133, %135 : vector<8x512xf32>
    %137 = vector.extract_strided_slice %136 {offsets = [0, 0], sizes = [8, 384], strides = [1, 1]} : vector<8x512xf32> to vector<8x384xf32>
    %138 = arith.negf %137 : vector<8x384xf32>
    %139 = math.exp %138 : vector<8x384xf32>
    %cst_44 = arith.constant 1.000000e+00 : f32
    %140 = vector.broadcast %cst_44 : f32 to vector<8x384xf32>
    %141 = arith.addf %140, %139 : vector<8x384xf32>
    %142 = arith.divf %140, %141 : vector<8x384xf32>
    %143 = vector.extract_strided_slice %136 {offsets = [0, 384], sizes = [8, 128], strides = [1, 1]} : vector<8x512xf32> to vector<8x128xf32>
    %144 = math.tanh %143 : vector<8x128xf32>
    %145 = vector.extract_strided_slice %142 {offsets = [0, 0], sizes = [8, 128], strides = [1, 1]} : vector<8x384xf32> to vector<8x128xf32>
    %146 = vector.extract_strided_slice %142 {offsets = [0, 128], sizes = [8, 128], strides = [1, 1]} : vector<8x384xf32> to vector<8x128xf32>
    %147 = vector.extract_strided_slice %142 {offsets = [0, 256], sizes = [8, 128], strides = [1, 1]} : vector<8x384xf32> to vector<8x128xf32>
    %148 = arith.mulf %146, %125 : vector<8x128xf32>
    %149 = arith.mulf %145, %144 : vector<8x128xf32>
    %150 = arith.addf %148, %149 : vector<8x128xf32>
    %151 = math.tanh %150 : vector<8x128xf32>
    %152 = arith.mulf %147, %151 : vector<8x128xf32>
    %c5_45 = arith.constant 5 : index
    %c0_46 = arith.constant 0 : index
    %c0_47 = arith.constant 0 : index
    %153 = vector.load %arg4[%c5_45, %c0_46, %c0_47] : memref<8x8x128xf32, #tpu.memory_space<vmem>>, vector<1x8x128xf32>
    %154 = vector.shape_cast %153 : vector<1x8x128xf32> to vector<8x128xf32>
    %155 = vector.shape_cast %152 : vector<8x128xf32> to vector<1x8x128xf32>
    tpu.vector_store %arg4[%c5_45, %c0_46, %c0_47], %155 {strides = array<i32>} : memref<8x8x128xf32, #tpu.memory_space<vmem>>, vector<1x8x128xf32>,
    %c6 = arith.constant 6 : index
    %c0_48 = arith.constant 0 : index
    %c0_49 = arith.constant 0 : index
    %156 = vector.load %arg2[%c6, %c0_48, %c0_49] : memref<8x8x512xbf16, #tpu.memory_space<vmem>>, vector<1x8x512xbf16>
    %157 = vector.shape_cast %156 : vector<1x8x512xbf16> to vector<8x512xbf16>
    %158 = arith.extf %157 : vector<8x512xbf16> to vector<8x512xf32>
    %159 = arith.truncf %152 : vector<8x128xf32> to vector<8x128xbf16>
    %cst_50 = arith.constant dense<0.000000e+00> : vector<8x512xf32>
    %160 = tpu.matmul %159, %3, %cst_50 {dimension_numbers = #tpu.dot_dimension_numbers<[1], [0], [0], [1], [0, 0, 1, 1], [], []>} : vector<8x128xbf16>, vector<128x512xbf16>, vector<8x512xf32> -> vector<8x512xf32>
    %161 = arith.addf %158, %160 : vector<8x512xf32>
    %162 = vector.extract_strided_slice %161 {offsets = [0, 0], sizes = [8, 384], strides = [1, 1]} : vector<8x512xf32> to vector<8x384xf32>
    %163 = arith.negf %162 : vector<8x384xf32>
    %164 = math.exp %163 : vector<8x384xf32>
    %cst_51 = arith.constant 1.000000e+00 : f32
    %165 = vector.broadcast %cst_51 : f32 to vector<8x384xf32>
    %166 = arith.addf %165, %164 : vector<8x384xf32>
    %167 = arith.divf %165, %166 : vector<8x384xf32>
    %168 = vector.extract_strided_slice %161 {offsets = [0, 384], sizes = [8, 128], strides = [1, 1]} : vector<8x512xf32> to vector<8x128xf32>
    %169 = math.tanh %168 : vector<8x128xf32>
    %170 = vector.extract_strided_slice %167 {offsets = [0, 0], sizes = [8, 128], strides = [1, 1]} : vector<8x384xf32> to vector<8x128xf32>
    %171 = vector.extract_strided_slice %167 {offsets = [0, 128], sizes = [8, 128], strides = [1, 1]} : vector<8x384xf32> to vector<8x128xf32>
    %172 = vector.extract_strided_slice %167 {offsets = [0, 256], sizes = [8, 128], strides = [1, 1]} : vector<8x384xf32> to vector<8x128xf32>
    %173 = arith.mulf %171, %150 : vector<8x128xf32>
    %174 = arith.mulf %170, %169 : vector<8x128xf32>
    %175 = arith.addf %173, %174 : vector<8x128xf32>
    %176 = math.tanh %175 : vector<8x128xf32>
    %177 = arith.mulf %172, %176 : vector<8x128xf32>
    %c6_52 = arith.constant 6 : index
    %c0_53 = arith.constant 0 : index
    %c0_54 = arith.constant 0 : index
    %178 = vector.load %arg4[%c6_52, %c0_53, %c0_54] : memref<8x8x128xf32, #tpu.memory_space<vmem>>, vector<1x8x128xf32>
    %179 = vector.shape_cast %178 : vector<1x8x128xf32> to vector<8x128xf32>
    %180 = vector.shape_cast %177 : vector<8x128xf32> to vector<1x8x128xf32>
    tpu.vector_store %arg4[%c6_52, %c0_53, %c0_54], %180 {strides = array<i32>} : memref<8x8x128xf32, #tpu.memory_space<vmem>>, vector<1x8x128xf32>,
    %c7 = arith.constant 7 : index
    %c0_55 = arith.constant 0 : index
    %c0_56 = arith.constant 0 : index
    %181 = vector.load %arg2[%c7, %c0_55, %c0_56] : memref<8x8x512xbf16, #tpu.memory_space<vmem>>, vector<1x8x512xbf16>
    %182 = vector.shape_cast %181 : vector<1x8x512xbf16> to vector<8x512xbf16>
    %183 = arith.extf %182 : vector<8x512xbf16> to vector<8x512xf32>
    %184 = arith.truncf %177 : vector<8x128xf32> to vector<8x128xbf16>
    %cst_57 = arith.constant dense<0.000000e+00> : vector<8x512xf32>
    %185 = tpu.matmul %184, %3, %cst_57 {dimension_numbers = #tpu.dot_dimension_numbers<[1], [0], [0], [1], [0, 0, 1, 1], [], []>} : vector<8x128xbf16>, vector<128x512xbf16>, vector<8x512xf32> -> vector<8x512xf32>
    %186 = arith.addf %183, %185 : vector<8x512xf32>
    %187 = vector.extract_strided_slice %186 {offsets = [0, 0], sizes = [8, 384], strides = [1, 1]} : vector<8x512xf32> to vector<8x384xf32>
    %188 = arith.negf %187 : vector<8x384xf32>
    %189 = math.exp %188 : vector<8x384xf32>
    %cst_58 = arith.constant 1.000000e+00 : f32
    %190 = vector.broadcast %cst_58 : f32 to vector<8x384xf32>
    %191 = arith.addf %190, %189 : vector<8x384xf32>
    %192 = arith.divf %190, %191 : vector<8x384xf32>
    %193 = vector.extract_strided_slice %186 {offsets = [0, 384], sizes = [8, 128], strides = [1, 1]} : vector<8x512xf32> to vector<8x128xf32>
    %194 = math.tanh %193 : vector<8x128xf32>
    %195 = vector.extract_strided_slice %192 {offsets = [0, 0], sizes = [8, 128], strides = [1, 1]} : vector<8x384xf32> to vector<8x128xf32>
    %196 = vector.extract_strided_slice %192 {offsets = [0, 128], sizes = [8, 128], strides = [1, 1]} : vector<8x384xf32> to vector<8x128xf32>
    %197 = vector.extract_strided_slice %192 {offsets = [0, 256], sizes = [8, 128], strides = [1, 1]} : vector<8x384xf32> to vector<8x128xf32>
    %198 = arith.mulf %196, %175 : vector<8x128xf32>
    %199 = arith.mulf %195, %194 : vector<8x128xf32>
    %200 = arith.addf %198, %199 : vector<8x128xf32>
    %201 = math.tanh %200 : vector<8x128xf32>
    %202 = arith.mulf %197, %201 : vector<8x128xf32>
    %c7_59 = arith.constant 7 : index
    %c0_60 = arith.constant 0 : index
    %c0_61 = arith.constant 0 : index
    %203 = vector.load %arg4[%c7_59, %c0_60, %c0_61] : memref<8x8x128xf32, #tpu.memory_space<vmem>>, vector<1x8x128xf32>
    %204 = vector.shape_cast %203 : vector<1x8x128xf32> to vector<8x128xf32>
    %205 = vector.shape_cast %202 : vector<8x128xf32> to vector<1x8x128xf32>
    tpu.vector_store %arg4[%c7_59, %c0_60, %c0_61], %205 {strides = array<i32>} : memref<8x8x128xf32, #tpu.memory_space<vmem>>, vector<1x8x128xf32>,
    %c0_62 = arith.constant 0 : index
    %c0_63 = arith.constant 0 : index
    %206 = vector.load %arg5[%c0_62, %c0_63] : memref<8x128xf32, #tpu.memory_space<vmem>>, vector<8x128xf32>
    tpu.vector_store %arg5[%c0_62, %c0_63], %202 {strides = array<i32>} : memref<8x128xf32, #tpu.memory_space<vmem>>, vector<8x128xf32>,
    %c0_64 = arith.constant 0 : index
    %c0_65 = arith.constant 0 : index
    %207 = vector.load %arg6[%c0_64, %c0_65] : memref<8x128xf32, #tpu.memory_space<vmem>>, vector<8x128xf32>
    tpu.vector_store %arg6[%c0_64, %c0_65], %200 {strides = array<i32>} : memref<8x128xf32, #tpu.memory_space<vmem>>, vector<8x128xf32>,
    return
  }
  func.func @transform_0(%arg0: i32, %arg1: i32) -> (i32, i32, i32) {
    %c0_i32 = arith.constant 0 : i32
    %c0_i32_0 = arith.constant 0 : i32
    return %arg1, %arg0, %c0_i32 : i32, i32, i32
  }
  func.func @transform_1(%arg0: i32, %arg1: i32) -> (i32, i32) {
    %c0_i32 = arith.constant 0 : i32
    %c0_i32_0 = arith.constant 0 : i32
    %c0_i32_1 = arith.constant 0 : i32
    return %c0_i32, %c0_i32_0 : i32, i32
  }
  func.func @transform_2(%arg0: i32, %arg1: i32) -> (i32, i32, i32) {
    %c0_i32 = arith.constant 0 : i32
    %c0_i32_0 = arith.constant 0 : i32
    return %arg1, %arg0, %c0_i32 : i32, i32, i32
  }
}

</mosaic_0001>

<bundles_post_ra>
// kernel: lstm_nlu_forward.1
= control target key start
LH: loop header
LB: loop body
LE: loop exit
PB: predicated region body
PF: predicated region fallthrough
CT: control target
= control target key end

     0   :  { %v1463_v1 = vmov 0   ;;  %v1464_v33 = vmov 0.0|0.0   ;;  %s2072_s1 = inlined_call_operand.vmem [shape: bf16[128,512], index: 1, kind: input, shape index: {}]   ;;  %s2073_s0 = inlined_call_operand.vmem [shape: bf16[8,8,512], index: 0, kind: input, shape index: {}]   ;;  %s2074_s2 = inlined_call_operand.vmem [shape: f32[8,8,128], index: 2, kind: output, shape index: {}]  }
   0x1   :  { %v1483_v0 = vld [vmem:[%s2072_s1 + $0x4] ss:$16 sps:$4 sm:$0xff]   ;;  %251 = vmatprep.mubr.bf16.mxu0 %v1463_v1  ;;  %292 = vmatprep.mubr.bf16.mxu1 %v1463_v1  ;;  %v1490_v2 = vld [vmem:[%s2072_s1] ss:$16 sps:$4 sm:$0xff]   ;;  %v1513_v6 = vld [vmem:[%s2072_s1 + $0xc] ss:$16 sps:$4 sm:$0xff]  }
   0x2   :  { %219 = vmatprep.subr.bf16.mxu0 %v1483_v0  ;;  %v1496_v3 = vld [vmem:[%s2072_s1 + $0x24] ss:$16 sps:$4 sm:$0xff]   ;;  %v1502_v4 = vld [vmem:[%s2072_s1 + $0x20] ss:$16 sps:$4 sm:$0xff]   ;;  %v1518_v7 = vld [vmem:[%s2072_s1 + $0x8] ss:$16 sps:$4 sm:$0xff]   ;;  %260 = vmatprep.subr.bf16.mxu1 %v1513_v6 }
   0x3   :  { %220 = vmatpush1.bf16.msra.mxu0 %v1490_v2  ;;  %v1508_v5 = vld [vmem:[%s2072_s1 + $0x44] ss:$16 sps:$4 sm:$0xff]   ;;  %v1524_v8 = vld [vmem:[%s2072_s1 + $0x40] ss:$16 sps:$4 sm:$0xff]   ;;  %261 = vmatpush1.bf16.msra.mxu1 %v1518_v7  ;;  %v1537_v10 = vld [vmem:[%s2072_s1 + $0x2c] ss:$16 sps:$4 sm:$0xff]  }
   0x4   :  { %221 = vmatprep.subr.bf16.mxu0 %v1496_v3  ;;  %v1531_v9 = vld [vmem:[%s2072_s1 + $0x64] ss:$16 sps:$4 sm:$0xff]   ;;  %v1542_v11 = vld [vmem:[%s2072_s1 + $0x28] ss:$16 sps:$4 sm:$0xff]   ;;  %262 = vmatprep.subr.bf16.mxu1 %v1537_v10  ;;  %v1549_v12 = vld [vmem:[%s2072_s1 + $0x60] ss:$16 sps:$4 sm:$0xff]  }
   0x5   :  { %v1554_v13 = vld [vmem:[%s2072_s1 + $0x84] ss:$16 sps:$4 sm:$0xff]   ;;  %v1559_v14 = vld [vmem:[%s2072_s1 + $0x4c] ss:$16 sps:$4 sm:$0xff]   ;;  %v1566_v15 = vld [vmem:[%s2072_s1 + $0x48] ss:$16 sps:$4 sm:$0xff]  }
   0x6   :  { %v1572_v16 = vld [vmem:[%s2072_s1 + $0x6c] ss:$16 sps:$4 sm:$0xff]   ;;  %v1578_v17 = vld [vmem:[%s2072_s1 + $0x80] ss:$16 sps:$4 sm:$0xff]   ;;  %v1584_v18 = vld [vmem:[%s2072_s1 + $0xa4] ss:$16 sps:$4 sm:$0xff]  }
   0x7   :  { %222 = vmatpush1.bf16.msra.mxu0 %v1502_v4  ;;  %263 = vmatpush1.bf16.msra.mxu1 %v1542_v11  ;;  %v1590_v19 = vld [vmem:[%s2072_s1 + $0x68] ss:$16 sps:$4 sm:$0xff]   ;;  %v1596_v20 = vld [vmem:[%s2072_s1 + $0x8c] ss:$16 sps:$4 sm:$0xff]   ;;  %v1602_v21 = vld [vmem:[%s2072_s1 + $0xa0] ss:$16 sps:$4 sm:$0xff]  }
   0x8   :  { %223 = vmatprep.subr.bf16.mxu0 %v1508_v5  ;;  %264 = vmatprep.subr.bf16.mxu1 %v1559_v14  ;;  %v1607_v22 = vld [vmem:[%s2072_s1 + $0xc4] ss:$16 sps:$4 sm:$0xff]   ;;  %v1614_v23 = vld [vmem:[%s2072_s1 + $0x88] ss:$16 sps:$4 sm:$0xff]   ;;  %v1620_v24 = vld [vmem:[%s2072_s1 + $0xac] ss:$16 sps:$4 sm:$0xff]  }
   0x9   :  { %v1626_v25 = vld [vmem:[%s2072_s1 + $0xc0] ss:$16 sps:$4 sm:$0xff]   ;;  %v1632_v26 = vld [vmem:[%s2072_s1 + $0xe4] ss:$16 sps:$4 sm:$0xff]   ;;  %v1638_v27 = vld [vmem:[%s2072_s1 + $0xa8] ss:$16 sps:$4 sm:$0xff]  }
   0xa   :  { %v1644_v28 = vld [vmem:[%s2072_s1 + $0xcc] ss:$16 sps:$4 sm:$0xff]   ;;  %v1650_v29 = vld [vmem:[%s2072_s1 + $0xe0] ss:$16 sps:$4 sm:$0xff]   ;;  %v1657_v30 = vld [vmem:[%s2072_s1 + $0xc8] ss:$16 sps:$4 sm:$0xff]  }
   0xb   :  { %224 = vmatpush1.bf16.msra.mxu0 %v1524_v8  ;;  %265 = vmatpush1.bf16.msra.mxu1 %v1566_v15  ;;  %v1663_v31 = vld [vmem:[%s2072_s1 + $0xec] ss:$16 sps:$4 sm:$0xff]   ;;  %v1670_v32 = vld [vmem:[%s2072_s1 + $0xe8] ss:$16 sps:$4 sm:$0xff]   ;;  %v52_v34 = vld [vmem:[%s2073_s0] sm:$0xff] }
   0xc   :  { %225 = vmatprep.subr.bf16.mxu0 %v1531_v9  ;;  %266 = vmatprep.subr.bf16.mxu1 %v1572_v16  ;;  %v54_v35 = vunpack.c.l.bf16 %v52_v34  ;;  %v55_v36 = vunpack.c.h.bf16 %v52_v34  ;;  %v53_v38 = vld [vmem:[%s2073_s0 + $0x8] sm:$0xff] }
   0xd   :  { %v56_v45 = vunpack.c.l.bf16 %v53_v38  ;;  %v57_v51 = vunpack.c.h.bf16 %v53_v38 }
   0xf   :  { %226 = vmatpush1.bf16.msra.mxu0 %v1549_v12  ;;  %267 = vmatpush1.bf16.msra.mxu1 %v1590_v19 }
  0x10   :  { %227 = vmatprep.subr.bf16.mxu0 %v1554_v13  ;;  %268 = vmatprep.subr.bf16.mxu1 %v1596_v20 }
  0x13   :  { %228 = vmatpush1.bf16.msra.mxu0 %v1578_v17  ;;  %269 = vmatpush1.bf16.msra.mxu1 %v1614_v23 }
  0x14   :  { %229 = vmatprep.subr.bf16.mxu0 %v1584_v18  ;;  %270 = vmatprep.subr.bf16.mxu1 %v1620_v24 }
  0x17   :  { %230 = vmatpush1.bf16.msra.mxu0 %v1602_v21  ;;  %271 = vmatpush1.bf16.msra.mxu1 %v1638_v27 }
  0x18   :  { %231 = vmatprep.subr.bf16.mxu0 %v1607_v22  ;;  %272 = vmatprep.subr.bf16.mxu1 %v1644_v28 }
  0x1b   :  { %232 = vmatpush1.bf16.msra.mxu0 %v1626_v25  ;;  %273 = vmatpush1.bf16.msra.mxu1 %v1657_v30 }
  0x1c   :  { %233 = vmatprep.subr.bf16.mxu0 %v1632_v26  ;;  %274 = vmatprep.subr.bf16.mxu1 %v1663_v31 }
  0x1f   :  { %234 = vmatpush1.bf16.msra.mxu0 %v1650_v29  ;;  %275 = vmatpush1.bf16.msra.mxu1 %v1670_v32 }
  0x20   :  { %338 = vmatprep.subr.bf16.mxu0 %v1483_v0  ;;  %379 = vmatprep.subr.bf16.mxu1 %v1513_v6 }
  0x22   :  { %252 = vmatmul.mubr.bf16.vlgmr.msra.gmra.mrb[0].mxu0 %v1464_v33  ;;  %293 = vmatmul.mubr.bf16.vlgmr.msra.gmra.mrb[0].mxu1 %v1464_v33 }
  0x23   :  { %339 = vmatpush1.bf16.msra.mxu0 %v1490_v2  ;;  %370 = vmatprep.mubr.bf16.mxu0 %v1463_v1 }
  0x24   :  { %340 = vmatprep.subr.bf16.mxu0 %v1496_v3  ;;  %380 = vmatpush1.bf16.msra.mxu1 %v1518_v7 }
  0x25   :  { %381 = vmatprep.subr.bf16.mxu1 %v1537_v10  ;;  %411 = vmatprep.mubr.bf16.mxu1 %v1463_v1 }
  0x27   :  { %341 = vmatpush1.bf16.msra.mxu0 %v1502_v4 }
  0x28   :  { %342 = vmatprep.subr.bf16.mxu0 %v1508_v5  ;;  %382 = vmatpush1.bf16.msra.mxu1 %v1542_v11 }
  0x29   :  { %383 = vmatprep.subr.bf16.mxu1 %v1559_v14 }
  0x2b   :  { %343 = vmatpush1.bf16.msra.mxu0 %v1524_v8 }
  0x2c   :  { %344 = vmatprep.subr.bf16.mxu0 %v1531_v9  ;;  %384 = vmatpush1.bf16.msra.mxu1 %v1566_v15 }
  0x2d   :  { %385 = vmatprep.subr.bf16.mxu1 %v1572_v16 }
  0x2f   :  { %345 = vmatpush1.bf16.msra.mxu0 %v1549_v12 }
  0x30   :  { %346 = vmatprep.subr.bf16.mxu0 %v1554_v13  ;;  %386 = vmatpush1.bf16.msra.mxu1 %v1590_v19 }
  0x31   :  { %387 = vmatprep.subr.bf16.mxu1 %v1596_v20 }
  0x33   :  { %347 = vmatpush1.bf16.msra.mxu0 %v1578_v17 }
  0x34   :  { %348 = vmatprep.subr.bf16.mxu0 %v1584_v18  ;;  %388 = vmatpush1.bf16.msra.mxu1 %v1614_v23 }
  0x35   :  { %389 = vmatprep.subr.bf16.mxu1 %v1620_v24 }
  0x37   :  { %349 = vmatpush1.bf16.msra.mxu0 %v1602_v21 }
  0x38   :  { %350 = vmatprep.subr.bf16.mxu0 %v1607_v22  ;;  %390 = vmatpush1.bf16.msra.mxu1 %v1638_v27 }
  0x39   :  { %391 = vmatprep.subr.bf16.mxu1 %v1644_v28 }
  0x3b   :  { %351 = vmatpush1.bf16.msra.mxu0 %v1626_v25 }
  0x3c   :  { %352 = vmatprep.subr.bf16.mxu0 %v1632_v26  ;;  %392 = vmatpush1.bf16.msra.mxu1 %v1657_v30 }
  0x3d   :  { %393 = vmatprep.subr.bf16.mxu1 %v1663_v31 }
  0x3f   :  { %353 = vmatpush1.bf16.msra.mxu0 %v1650_v29 }
  0x40   :  { %458 = vmatprep.subr.bf16.mxu0 %v1483_v0  ;;  %394 = vmatpush1.bf16.msra.mxu1 %v1670_v32 }
  0x41   :  { %499 = vmatprep.subr.bf16.mxu1 %v1513_v6 }
  0xf5   :  { %v253_v37 = vpop.f32.mrb[0].mxu0  ;;  %v294_v47 = vpop.f32.mrb[0].mxu1 }
  0xf6   :  { %v301_v39 = vadd.f32 %v253_v37, %v54_v35  ;;  %v255_v40 = vpop.f32.mrb[1].mxu0  ;;  %v296_v48 = vpop.f32.mrb[1].mxu1  ;;  %v303_v49 = vadd.f32 %v294_v47, %v56_v45 }
  0xf7   :  { %v302_v41 = vadd.f32 %v255_v40, %v55_v36  ;;  %v257_v42 = vpop.f32.mrb[2].mxu0  ;;  %v298_v50 = vpop.f32.mrb[2].mxu1  ;;  %v304_v54 = vadd.f32 %v296_v48, %v57_v51  ;;  %v1211_v40 = vld [vmem:[%s2073_s0 + $0x10] sm:$0xff]  ;;  %v1212_v48 = vld [vmem:[%s2073_s0 + $0x18] sm:$0xff] }
  0xf8   :  { %v1208_v43 = vmul.f32 -1.442695, %v301_v39  ;;  %v258_v44 = vpop.f32.mrb[3].mxu0  ;;  %v299_v52 = vpop.f32.mrb[3].mxu1  ;;  %v1210_v53 = vmul.f32 -1.442695, %v303_v49  ;;  %v334_v42 = vunpack.c.h.bf16 %v1211_v40 }
  0xf9   :  { %v1209_v46 = vmul.f32 -1.442695, %v302_v41  ;;  %v333_v41 = vunpack.c.l.bf16 %v1211_v40 }
  0xfa   :  { %1303 = vpow2.f32 %v1208_v43 }
  0xfb   :  { %1305 = vpow2.f32 %v1209_v46 }
  0xfc   :  { %1307 = vpow2.f32 %v1210_v53 }
  0xfd   :  { %1309 = vtanh.f32 %v304_v54 }
 0x104   :  { %v1304_v55 = vpop.eup %1303 }
 0x105   :  { %v1306_v56 = vpop.eup %1305  ;;  %v314_v57 = vadd.f32 1.0, %v1304_v55 }
 0x106   :  { %v315_v58 = vadd.f32 1.0, %v1306_v56  ;;  %v1308_v59 = vpop.eup %1307  ;;  %v335_v56 = vunpack.c.l.bf16 %v1212_v48 }
 0x107   :  { %1311 = vrcp.f32 %v314_v57  ;;  %v1310_v60 = vpop.eup %1309  ;;  %v316_v62 = vadd.f32 1.0, %v1308_v59  ;;  %v336_v57 = vunpack.c.h.bf16 %v1212_v48 }
 0x108   :  { %1313 = vrcp.f32 %v315_v58 }
 0x109   :  { %1315 = vrcp.f32 %v316_v62 }
 0x111   :  { %v1312_v61 = vpop.eup %1311 }
 0x112   :  { %v1314_v63 = vpop.eup %1313  ;;  %v325_v33 = vmul.f32 %v1312_v61, %v1310_v60 }
 0x113   :  { %v324_v34 = vmul.f32 0.0, %v1314_v63  ;;  %v1316_v36 = vpop.eup %1315 }
 0x115   :  { %v1716_v35 = vadd.f32 %v325_v33, %v324_v34 }
 0x117   :  { %1317 = vtanh.f32 %v1716_v35 }
 0x121   :  { %v1318_v37 = vpop.eup %1317 }
 0x122   :  { %v328_v38 = vmul.f32 %v1318_v37, %v1316_v36 }
 0x124   :  { %329 = vst [vmem:[%s2074_s2] sm:$0xff] %v328_v38  ;;  %v337_v39 = vpack.c.bf16 %v328_v38, %v328_v38 }
 0x126   :  { %371 = vmatmul.mubr.bf16.vlgmr.msra.gmra.mrb[4].mxu0 %v337_v39  ;;  %412 = vmatmul.mubr.bf16.vlgmr.msra.gmra.mrb[4].mxu1 %v337_v39 }
 0x127   :  { %459 = vmatpush1.bf16.msra.mxu0 %v1490_v2  ;;  %500 = vmatpush1.bf16.msra.mxu1 %v1518_v7 }
 0x128   :  { %460 = vmatprep.subr.bf16.mxu0 %v1496_v3  ;;  %501 = vmatprep.subr.bf16.mxu1 %v1537_v10 }
 0x129   :  { %490 = vmatprep.mubr.bf16.mxu0 %v1463_v1  ;;  %531 = vmatprep.mubr.bf16.mxu1 %v1463_v1 }
 0x12b   :  { %461 = vmatpush1.bf16.msra.mxu0 %v1502_v4  ;;  %502 = vmatpush1.bf16.msra.mxu1 %v1542_v11 }
 0x12c   :  { %462 = vmatprep.subr.bf16.mxu0 %v1508_v5  ;;  %503 = vmatprep.subr.bf16.mxu1 %v1559_v14 }
 0x12f   :  { %463 = vmatpush1.bf16.msra.mxu0 %v1524_v8  ;;  %504 = vmatpush1.bf16.msra.mxu1 %v1566_v15 }
 0x130   :  { %464 = vmatprep.subr.bf16.mxu0 %v1531_v9  ;;  %505 = vmatprep.subr.bf16.mxu1 %v1572_v16 }
 0x133   :  { %465 = vmatpush1.bf16.msra.mxu0 %v1549_v12  ;;  %506 = vmatpush1.bf16.msra.mxu1 %v1590_v19 }
 0x134   :  { %466 = vmatprep.subr.bf16.mxu0 %v1554_v13  ;;  %507 = vmatprep.subr.bf16.mxu1 %v1596_v20 }
 0x137   :  { %467 = vmatpush1.bf16.msra.mxu0 %v1578_v17  ;;  %508 = vmatpush1.bf16.msra.mxu1 %v1614_v23 }
 0x138   :  { %468 = vmatprep.subr.bf16.mxu0 %v1584_v18  ;;  %509 = vmatprep.subr.bf16.mxu1 %v1620_v24 }
 0x13b   :  { %469 = vmatpush1.bf16.msra.mxu0 %v1602_v21  ;;  %510 = vmatpush1.bf16.msra.mxu1 %v1638_v27 }
 0x13c   :  { %470 = vmatprep.subr.bf16.mxu0 %v1607_v22  ;;  %511 = vmatprep.subr.bf16.mxu1 %v1644_v28 }
 0x13f   :  { %471 = vmatpush1.bf16.msra.mxu0 %v1626_v25  ;;  %512 = vmatpush1.bf16.msra.mxu1 %v1657_v30 }
 0x140   :  { %472 = vmatprep.subr.bf16.mxu0 %v1632_v26  ;;  %513 = vmatprep.subr.bf16.mxu1 %v1663_v31 }
 0x143   :  { %473 = vmatpush1.bf16.msra.mxu0 %v1650_v29  ;;  %514 = vmatpush1.bf16.msra.mxu1 %v1670_v32 }
 0x144   :  { %578 = vmatprep.subr.bf16.mxu0 %v1483_v0  ;;  %619 = vmatprep.subr.bf16.mxu1 %v1513_v6 }
 0x1f9   :  { %v372_v43 = vpop.f32.mrb[4].mxu0  ;;  %v413_v44 = vpop.f32.mrb[4].mxu1 }
 0x1fa   :  { %v420_v45 = vadd.f32 %v372_v43, %v333_v41  ;;  %v374_v46 = vpop.f32.mrb[5].mxu0  ;;  %v415_v47 = vpop.f32.mrb[5].mxu1  ;;  %v422_v58 = vadd.f32 %v413_v44, %v335_v56 }
 0x1fb   :  { %v421_v49 = vadd.f32 %v374_v46, %v334_v42  ;;  %v376_v50 = vpop.f32.mrb[6].mxu0  ;;  %v417_v51 = vpop.f32.mrb[6].mxu1  ;;  %v423_v59 = vadd.f32 %v415_v47, %v336_v57 }
 0x1fc   :  { %v1213_v52 = vmul.f32 -1.442695, %v420_v45  ;;  %v377_v53 = vpop.f32.mrb[7].mxu0  ;;  %v418_v54 = vpop.f32.mrb[7].mxu1  ;;  %v1215_v60 = vmul.f32 -1.442695, %v422_v58 }
 0x1fd   :  { %v1214_v55 = vmul.f32 -1.442695, %v421_v49  ;;  %v1218_v54 = vld [vmem:[%s2073_s0 + $0x28] sm:$0xff] }
 0x1fe   :  { %1319 = vpow2.f32 %v1213_v52 }
 0x1ff   :  { %1321 = vpow2.f32 %v1214_v55 }
 0x200   :  { %1323 = vtanh.f32 %v423_v59 }
 0x201   :  { %1325 = vpow2.f32 %v1215_v60 }
 0x208   :  { %v1320_v61 = vpop.eup %1319 }
 0x209   :  { %v433_v62 = vadd.f32 1.0, %v1320_v61  ;;  %v1322_v63 = vpop.eup %1321 }
 0x20a   :  { %v434_v33 = vadd.f32 1.0, %v1322_v63  ;;  %v1324_v34 = vpop.eup %1323  ;;  %v456_v63 = vunpack.c.h.bf16 %v1218_v54 }
 0x20b   :  { %1327 = vrcp.f32 %v433_v62  ;;  %v1326_v36 = vpop.eup %1325  ;;  %v455_v62 = vunpack.c.l.bf16 %v1218_v54 }
 0x20c   :  { %1329 = vrcp.f32 %v434_v33  ;;  %v435_v40 = vadd.f32 1.0, %v1326_v36 }
 0x20e   :  { %1331 = vrcp.f32 %v435_v40 }
 0x215   :  { %v1328_v37 = vpop.eup %1327 }
 0x216   :  { %v444_v38 = vmul.f32 %v1328_v37, %v1324_v34  ;;  %v1330_v39 = vpop.eup %1329 }
 0x217   :  { %v443_v41 = vmul.f32 %v1330_v39, %v1716_v35  ;;  %v1217_v35 = vld [vmem:[%s2073_s0 + $0x20] sm:$0xff] }
 0x218   :  { %v1332_v43 = vpop.eup %1331  ;;  %v453_v47 = vunpack.c.l.bf16 %v1217_v35  ;;  %v454_v48 = vunpack.c.h.bf16 %v1217_v35 }
 0x219   :  { %v1763_v42 = vadd.f32 %v444_v38, %v443_v41 }
 0x21b   :  { %1333 = vtanh.f32 %v1763_v42 }
 0x225   :  { %v1334_v44 = vpop.eup %1333 }
 0x226   :  { %v447_v45 = vmul.f32 %v1334_v44, %v1332_v43 }
 0x228   :  { %1216 = vst [vmem:[%s2074_s2 + $0x8] sm:$0xff] %v447_v45  ;;  %v457_v46 = vpack.c.bf16 %v447_v45, %v447_v45 }
 0x22a   :  { %491 = vmatmul.mubr.bf16.vlgmr.msra.gmra.mrb[8].mxu0 %v457_v46  ;;  %532 = vmatmul.mubr.bf16.vlgmr.msra.gmra.mrb[8].mxu1 %v457_v46 }
 0x22b   :  { %579 = vmatpush1.bf16.msra.mxu0 %v1490_v2  ;;  %620 = vmatpush1.bf16.msra.mxu1 %v1518_v7 }
 0x22c   :  { %580 = vmatprep.subr.bf16.mxu0 %v1496_v3  ;;  %621 = vmatprep.subr.bf16.mxu1 %v1537_v10 }
 0x22d   :  { %610 = vmatprep.mubr.bf16.mxu0 %v1463_v1  ;;  %651 = vmatprep.mubr.bf16.mxu1 %v1463_v1 }
 0x22f   :  { %581 = vmatpush1.bf16.msra.mxu0 %v1502_v4  ;;  %622 = vmatpush1.bf16.msra.mxu1 %v1542_v11 }
 0x230   :  { %582 = vmatprep.subr.bf16.mxu0 %v1508_v5  ;;  %623 = vmatprep.subr.bf16.mxu1 %v1559_v14 }
 0x233   :  { %583 = vmatpush1.bf16.msra.mxu0 %v1524_v8  ;;  %624 = vmatpush1.bf16.msra.mxu1 %v1566_v15 }
 0x234   :  { %584 = vmatprep.subr.bf16.mxu0 %v1531_v9  ;;  %625 = vmatprep.subr.bf16.mxu1 %v1572_v16 }
 0x237   :  { %585 = vmatpush1.bf16.msra.mxu0 %v1549_v12  ;;  %626 = vmatpush1.bf16.msra.mxu1 %v1590_v19 }
 0x238   :  { %586 = vmatprep.subr.bf16.mxu0 %v1554_v13  ;;  %627 = vmatprep.subr.bf16.mxu1 %v1596_v20 }
 0x23b   :  { %587 = vmatpush1.bf16.msra.mxu0 %v1578_v17  ;;  %628 = vmatpush1.bf16.msra.mxu1 %v1614_v23 }
 0x23c   :  { %588 = vmatprep.subr.bf16.mxu0 %v1584_v18  ;;  %629 = vmatprep.subr.bf16.mxu1 %v1620_v24 }
 0x23f   :  { %589 = vmatpush1.bf16.msra.mxu0 %v1602_v21  ;;  %630 = vmatpush1.bf16.msra.mxu1 %v1638_v27 }
 0x240   :  { %590 = vmatprep.subr.bf16.mxu0 %v1607_v22  ;;  %631 = vmatprep.subr.bf16.mxu1 %v1644_v28 }
 0x243   :  { %591 = vmatpush1.bf16.msra.mxu0 %v1626_v25  ;;  %632 = vmatpush1.bf16.msra.mxu1 %v1657_v30 }
 0x244   :  { %592 = vmatprep.subr.bf16.mxu0 %v1632_v26  ;;  %633 = vmatprep.subr.bf16.mxu1 %v1663_v31 }
 0x247   :  { %593 = vmatpush1.bf16.msra.mxu0 %v1650_v29  ;;  %634 = vmatpush1.bf16.msra.mxu1 %v1670_v32 }
 0x248   :  { %698 = vmatprep.subr.bf16.mxu0 %v1483_v0  ;;  %739 = vmatprep.subr.bf16.mxu1 %v1513_v6 }
 0x2fd   :  { %v492_v49 = vpop.f32.mrb[8].mxu0  ;;  %v533_v50 = vpop.f32.mrb[8].mxu1 }
 0x2fe   :  { %v540_v51 = vadd.f32 %v492_v49, %v453_v47  ;;  %v494_v52 = vpop.f32.mrb[9].mxu0  ;;  %v535_v53 = vpop.f32.mrb[9].mxu1  ;;  %v542_v33 = vadd.f32 %v533_v50, %v455_v62 }
 0x2ff   :  { %v541_v55 = vadd.f32 %v494_v52, %v454_v48  ;;  %v496_v56 = vpop.f32.mrb[10].mxu0  ;;  %v537_v57 = vpop.f32.mrb[10].mxu1  ;;  %v543_v34 = vadd.f32 %v535_v53, %v456_v63 }
 0x300   :  { %v1219_v58 = vmul.f32 -1.442695, %v540_v51  ;;  %v497_v59 = vpop.f32.mrb[11].mxu0  ;;  %v538_v60 = vpop.f32.mrb[11].mxu1  ;;  %v1221_v36 = vmul.f32 -1.442695, %v542_v33 }
 0x301   :  { %v1220_v61 = vmul.f32 -1.442695, %v541_v55  ;;  %v1224_v60 = vld [vmem:[%s2073_s0 + $0x38] sm:$0xff] }
 0x302   :  { %1335 = vpow2.f32 %v1219_v58 }
 0x303   :  { %1337 = vpow2.f32 %v1220_v61 }
 0x304   :  { %1339 = vtanh.f32 %v543_v34 }
 0x305   :  { %1341 = vpow2.f32 %v1221_v36 }
 0x30c   :  { %v1336_v37 = vpop.eup %1335 }
 0x30d   :  { %v553_v38 = vadd.f32 1.0, %v1336_v37  ;;  %v1338_v39 = vpop.eup %1337 }
 0x30e   :  { %v554_v40 = vadd.f32 1.0, %v1338_v39  ;;  %v1340_v41 = vpop.eup %1339  ;;  %v576_v39 = vunpack.c.h.bf16 %v1224_v60 }
 0x30f   :  { %1343 = vrcp.f32 %v553_v38  ;;  %v1342_v43 = vpop.eup %1341  ;;  %v575_v38 = vunpack.c.l.bf16 %v1224_v60 }
 0x310   :  { %1345 = vrcp.f32 %v554_v40  ;;  %v555_v35 = vadd.f32 1.0, %v1342_v43 }
 0x312   :  { %1347 = vrcp.f32 %v555_v35 }
 0x319   :  { %v1344_v44 = vpop.eup %1343 }
 0x31a   :  { %v564_v45 = vmul.f32 %v1344_v44, %v1340_v41  ;;  %v1346_v46 = vpop.eup %1345 }
 0x31b   :  { %v563_v47 = vmul.f32 %v1346_v46, %v1763_v42  ;;  %v1223_v42 = vld [vmem:[%s2073_s0 + $0x30] sm:$0xff] }
 0x31c   :  { %v1348_v49 = vpop.eup %1347  ;;  %v573_v53 = vunpack.c.l.bf16 %v1223_v42  ;;  %v574_v54 = vunpack.c.h.bf16 %v1223_v42 }
 0x31d   :  { %v1810_v48 = vadd.f32 %v564_v45, %v563_v47 }
 0x31f   :  { %1349 = vtanh.f32 %v1810_v48 }
 0x329   :  { %v1350_v50 = vpop.eup %1349 }
 0x32a   :  { %v567_v51 = vmul.f32 %v1350_v50, %v1348_v49 }
 0x32c   :  { %1222 = vst [vmem:[%s2074_s2 + $0x10] sm:$0xff] %v567_v51  ;;  %v577_v52 = vpack.c.bf16 %v567_v51, %v567_v51 }
 0x32e   :  { %611 = vmatmul.mubr.bf16.vlgmr.msra.gmra.mrb[12].mxu0 %v577_v52  ;;  %652 = vmatmul.mubr.bf16.vlgmr.msra.gmra.mrb[12].mxu1 %v577_v52 }
 0x32f   :  { %699 = vmatpush1.bf16.msra.mxu0 %v1490_v2  ;;  %740 = vmatpush1.bf16.msra.mxu1 %v1518_v7 }
 0x330   :  { %700 = vmatprep.subr.bf16.mxu0 %v1496_v3  ;;  %741 = vmatprep.subr.bf16.mxu1 %v1537_v10 }
 0x331   :  { %730 = vmatprep.mubr.bf16.mxu0 %v1463_v1  ;;  %771 = vmatprep.mubr.bf16.mxu1 %v1463_v1 }
 0x333   :  { %701 = vmatpush1.bf16.msra.mxu0 %v1502_v4  ;;  %742 = vmatpush1.bf16.msra.mxu1 %v1542_v11 }
 0x334   :  { %702 = vmatprep.subr.bf16.mxu0 %v1508_v5  ;;  %743 = vmatprep.subr.bf16.mxu1 %v1559_v14 }
 0x337   :  { %703 = vmatpush1.bf16.msra.mxu0 %v1524_v8  ;;  %744 = vmatpush1.bf16.msra.mxu1 %v1566_v15 }
 0x338   :  { %704 = vmatprep.subr.bf16.mxu0 %v1531_v9  ;;  %745 = vmatprep.subr.bf16.mxu1 %v1572_v16 }
 0x33b   :  { %705 = vmatpush1.bf16.msra.mxu0 %v1549_v12  ;;  %746 = vmatpush1.bf16.msra.mxu1 %v1590_v19 }
 0x33c   :  { %706 = vmatprep.subr.bf16.mxu0 %v1554_v13  ;;  %747 = vmatprep.subr.bf16.mxu1 %v1596_v20 }
 0x33f   :  { %707 = vmatpush1.bf16.msra.mxu0 %v1578_v17  ;;  %748 = vmatpush1.bf16.msra.mxu1 %v1614_v23 }
 0x340   :  { %708 = vmatprep.subr.bf16.mxu0 %v1584_v18  ;;  %749 = vmatprep.subr.bf16.mxu1 %v1620_v24 }
 0x343   :  { %709 = vmatpush1.bf16.msra.mxu0 %v1602_v21  ;;  %750 = vmatpush1.bf16.msra.mxu1 %v1638_v27 }
 0x344   :  { %710 = vmatprep.subr.bf16.mxu0 %v1607_v22  ;;  %751 = vmatprep.subr.bf16.mxu1 %v1644_v28 }
 0x347   :  { %711 = vmatpush1.bf16.msra.mxu0 %v1626_v25  ;;  %752 = vmatpush1.bf16.msra.mxu1 %v1657_v30 }
 0x348   :  { %712 = vmatprep.subr.bf16.mxu0 %v1632_v26  ;;  %753 = vmatprep.subr.bf16.mxu1 %v1663_v31 }
 0x34b   :  { %713 = vmatpush1.bf16.msra.mxu0 %v1650_v29  ;;  %754 = vmatpush1.bf16.msra.mxu1 %v1670_v32 }
 0x34c   :  { %818 = vmatprep.subr.bf16.mxu0 %v1483_v0  ;;  %859 = vmatprep.subr.bf16.mxu1 %v1513_v6 }
 0x401   :  { %v612_v55 = vpop.f32.mrb[12].mxu0  ;;  %v653_v56 = vpop.f32.mrb[12].mxu1 }
 0x402   :  { %v660_v57 = vadd.f32 %v612_v55, %v573_v53  ;;  %v614_v58 = vpop.f32.mrb[13].mxu0  ;;  %v655_v59 = vpop.f32.mrb[13].mxu1  ;;  %v662_v40 = vadd.f32 %v653_v56, %v575_v38 }
 0x403   :  { %v661_v61 = vadd.f32 %v614_v58, %v574_v54  ;;  %v616_v62 = vpop.f32.mrb[14].mxu0  ;;  %v657_v63 = vpop.f32.mrb[14].mxu1  ;;  %v663_v41 = vadd.f32 %v655_v59, %v576_v39 }
 0x404   :  { %v1225_v33 = vmul.f32 -1.442695, %v660_v57  ;;  %v617_v34 = vpop.f32.mrb[15].mxu0  ;;  %v658_v36 = vpop.f32.mrb[15].mxu1  ;;  %v1227_v43 = vmul.f32 -1.442695, %v662_v40 }
 0x405   :  { %v1226_v37 = vmul.f32 -1.442695, %v661_v61  ;;  %v1230_v36 = vld [vmem:[%s2073_s0 + $0x48] sm:$0xff] }
 0x406   :  { %1351 = vpow2.f32 %v1225_v33 }
 0x407   :  { %1353 = vpow2.f32 %v1226_v37 }
 0x408   :  { %1355 = vtanh.f32 %v663_v41 }
 0x409   :  { %1357 = vpow2.f32 %v1227_v43  ;;  %v695_v43 = vunpack.c.l.bf16 %v1230_v36 }
 0x410   :  { %v1352_v44 = vpop.eup %1351 }
 0x411   :  { %v673_v45 = vadd.f32 1.0, %v1352_v44  ;;  %v1354_v46 = vpop.eup %1353  ;;  %v696_v44 = vunpack.c.h.bf16 %v1230_v36 }
 0x412   :  { %v674_v35 = vadd.f32 1.0, %v1354_v46  ;;  %v1356_v47 = vpop.eup %1355 }
 0x413   :  { %1359 = vrcp.f32 %v673_v45  ;;  %v1358_v49 = vpop.eup %1357 }
 0x414   :  { %1361 = vrcp.f32 %v674_v35  ;;  %v675_v42 = vadd.f32 1.0, %v1358_v49 }
 0x416   :  { %1363 = vrcp.f32 %v675_v42 }
 0x41d   :  { %v1360_v50 = vpop.eup %1359 }
 0x41e   :  { %v684_v51 = vmul.f32 %v1360_v50, %v1356_v47  ;;  %v1362_v52 = vpop.eup %1361 }
 0x41f   :  { %v683_v53 = vmul.f32 %v1362_v52, %v1810_v48  ;;  %v1229_v48 = vld [vmem:[%s2073_s0 + $0x40] sm:$0xff] }
 0x420   :  { %v1364_v55 = vpop.eup %1363  ;;  %v693_v59 = vunpack.c.l.bf16 %v1229_v48  ;;  %v694_v60 = vunpack.c.h.bf16 %v1229_v48 }
 0x421   :  { %v1857_v54 = vadd.f32 %v684_v51, %v683_v53 }
 0x423   :  { %1365 = vtanh.f32 %v1857_v54 }
 0x42d   :  { %v1366_v56 = vpop.eup %1365 }
 0x42e   :  { %v687_v57 = vmul.f32 %v1366_v56, %v1364_v55 }
 0x430   :  { %1228 = vst [vmem:[%s2074_s2 + $0x18] sm:$0xff] %v687_v57  ;;  %v697_v58 = vpack.c.bf16 %v687_v57, %v687_v57 }
 0x432   :  { %731 = vmatmul.mubr.bf16.vlgmr.msra.gmra.mrb[16].mxu0 %v697_v58  ;;  %772 = vmatmul.mubr.bf16.vlgmr.msra.gmra.mrb[16].mxu1 %v697_v58 }
 0x433   :  { %819 = vmatpush1.bf16.msra.mxu0 %v1490_v2  ;;  %860 = vmatpush1.bf16.msra.mxu1 %v1518_v7 }
 0x434   :  { %820 = vmatprep.subr.bf16.mxu0 %v1496_v3  ;;  %861 = vmatprep.subr.bf16.mxu1 %v1537_v10 }
 0x435   :  { %850 = vmatprep.mubr.bf16.mxu0 %v1463_v1  ;;  %891 = vmatprep.mubr.bf16.mxu1 %v1463_v1 }
 0x437   :  { %821 = vmatpush1.bf16.msra.mxu0 %v1502_v4  ;;  %862 = vmatpush1.bf16.msra.mxu1 %v1542_v11 }
 0x438   :  { %822 = vmatprep.subr.bf16.mxu0 %v1508_v5  ;;  %863 = vmatprep.subr.bf16.mxu1 %v1559_v14 }
 0x43b   :  { %823 = vmatpush1.bf16.msra.mxu0 %v1524_v8  ;;  %864 = vmatpush1.bf16.msra.mxu1 %v1566_v15 }
 0x43c   :  { %824 = vmatprep.subr.bf16.mxu0 %v1531_v9  ;;  %865 = vmatprep.subr.bf16.mxu1 %v1572_v16 }
 0x43f   :  { %825 = vmatpush1.bf16.msra.mxu0 %v1549_v12  ;;  %866 = vmatpush1.bf16.msra.mxu1 %v1590_v19 }
 0x440   :  { %826 = vmatprep.subr.bf16.mxu0 %v1554_v13  ;;  %867 = vmatprep.subr.bf16.mxu1 %v1596_v20 }
 0x443   :  { %827 = vmatpush1.bf16.msra.mxu0 %v1578_v17  ;;  %868 = vmatpush1.bf16.msra.mxu1 %v1614_v23 }
 0x444   :  { %828 = vmatprep.subr.bf16.mxu0 %v1584_v18  ;;  %869 = vmatprep.subr.bf16.mxu1 %v1620_v24 }
 0x447   :  { %829 = vmatpush1.bf16.msra.mxu0 %v1602_v21  ;;  %870 = vmatpush1.bf16.msra.mxu1 %v1638_v27 }
 0x448   :  { %830 = vmatprep.subr.bf16.mxu0 %v1607_v22  ;;  %871 = vmatprep.subr.bf16.mxu1 %v1644_v28 }
 0x44b   :  { %831 = vmatpush1.bf16.msra.mxu0 %v1626_v25  ;;  %872 = vmatpush1.bf16.msra.mxu1 %v1657_v30 }
 0x44c   :  { %832 = vmatprep.subr.bf16.mxu0 %v1632_v26  ;;  %873 = vmatprep.subr.bf16.mxu1 %v1663_v31 }
 0x44f   :  { %833 = vmatpush1.bf16.msra.mxu0 %v1650_v29  ;;  %874 = vmatpush1.bf16.msra.mxu1 %v1670_v32 }
 0x450   :  { %938 = vmatprep.subr.bf16.mxu0 %v1483_v0  ;;  %979 = vmatprep.subr.bf16.mxu1 %v1513_v6 }
 0x505   :  { %v732_v61 = vpop.f32.mrb[16].mxu0  ;;  %v773_v62 = vpop.f32.mrb[16].mxu1 }
 0x506   :  { %v780_v63 = vadd.f32 %v732_v61, %v693_v59  ;;  %v734_v33 = vpop.f32.mrb[17].mxu0  ;;  %v775_v34 = vpop.f32.mrb[17].mxu1  ;;  %v782_v45 = vadd.f32 %v773_v62, %v695_v43  ;;  %v1436_v43 = vld [vmem:[%s2072_s1 + $0x2c] ss:$16 sps:$4 sm:$0xff]  }
 0x507   :  { %v781_v37 = vadd.f32 %v734_v33, %v694_v60  ;;  %v736_v38 = vpop.f32.mrb[18].mxu0  ;;  %v777_v0 = vpop.f32.mrb[18].mxu1  ;;  %v783_v46 = vadd.f32 %v775_v34, %v696_v44  ;;  %v1437_v44 = vld [vmem:[%s2072_s1 + $0x20] ss:$16 sps:$4 sm:$0xff]  }
 0x508   :  { %v1231_v39 = vmul.f32 -1.442695, %v780_v63  ;;  %v737_v6 = vpop.f32.mrb[19].mxu0  ;;  %v778_v40 = vpop.f32.mrb[19].mxu1  ;;  %v1233_v35 = vmul.f32 -1.442695, %v782_v45 }
 0x509   :  { %v1232_v41 = vmul.f32 -1.442695, %v781_v37  ;;  %v1433_v6 = vld [vmem:[%s2072_s1] ss:$16 sps:$4 sm:$0xff]   ;;  %v1434_v40 = vld [vmem:[%s2072_s1 + $0x8] ss:$16 sps:$4 sm:$0xff]  }
 0x50a   :  { %1367 = vpow2.f32 %v1231_v39  ;;  %v1438_v45 = vld [vmem:[%s2072_s1 + $0x28] ss:$16 sps:$4 sm:$0xff]  }
 0x50b   :  { %1369 = vpow2.f32 %v1232_v41  ;;  %v1435_v41 = vld [vmem:[%s2072_s1 + $0x24] ss:$16 sps:$4 sm:$0xff]  }
 0x50c   :  { %1371 = vtanh.f32 %v783_v46  ;;  %v1439_v46 = vld [vmem:[%s2072_s1 + $0x44] ss:$16 sps:$4 sm:$0xff]  }
 0x50d   :  { %1373 = vpow2.f32 %v1233_v35  ;;  %v1440_v35 = vld [vmem:[%s2072_s1 + $0x4c] ss:$16 sps:$4 sm:$0xff]  }
 0x514   :  { %v1368_v47 = vpop.eup %1367 }
 0x515   :  { %v793_v49 = vadd.f32 1.0, %v1368_v47  ;;  %v1370_v50 = vpop.eup %1369  ;;  %v1442_v47 = vld [vmem:[%s2072_s1 + $0x48] ss:$16 sps:$4 sm:$0xff]  }
 0x516   :  { %v794_v51 = vadd.f32 1.0, %v1370_v50  ;;  %v1372_v52 = vpop.eup %1371  ;;  %v1444_v50 = vld [vmem:[%s2072_s1 + $0x6c] ss:$16 sps:$4 sm:$0xff]  }
 0x517   :  { %1375 = vrcp.f32 %v793_v49  ;;  %v1374_v42 = vpop.eup %1373  ;;  %v1443_v49 = vld [vmem:[%s2072_s1 + $0x64] ss:$16 sps:$4 sm:$0xff]  }
 0x518   :  { %1377 = vrcp.f32 %v794_v51  ;;  %v795_v57 = vadd.f32 1.0, %v1374_v42  ;;  %v1445_v51 = vld [vmem:[%s2072_s1 + $0x60] ss:$16 sps:$4 sm:$0xff]   ;;  %v1447_v42 = vld [vmem:[%s2072_s1 + $0x84] ss:$16 sps:$4 sm:$0xff]  }
 0x51a   :  { %1379 = vrcp.f32 %v795_v57  ;;  %v1451_v57 = vld [vmem:[%s2072_s1 + $0xa4] ss:$16 sps:$4 sm:$0xff]  }
 0x521   :  { %v1376_v53 = vpop.eup %1375 }
 0x522   :  { %v804_v55 = vmul.f32 %v1376_v53, %v1372_v52  ;;  %v1378_v56 = vpop.eup %1377  ;;  %v1446_v52 = vld [vmem:[%s2072_s1 + $0x68] ss:$16 sps:$4 sm:$0xff]   ;;  %v1448_v53 = vld [vmem:[%s2072_s1 + $0x8c] ss:$16 sps:$4 sm:$0xff]  }
 0x523   :  { %v803_v58 = vmul.f32 %v1378_v56, %v1857_v54  ;;  %v1450_v56 = vld [vmem:[%s2072_s1 + $0x88] ss:$16 sps:$4 sm:$0xff]  }
 0x524   :  { %v1380_v59 = vpop.eup %1379 }
 0x525   :  { %v1904_v48 = vadd.f32 %v804_v55, %v803_v58  ;;  %v1449_v55 = vld [vmem:[%s2072_s1 + $0x80] ss:$16 sps:$4 sm:$0xff]   ;;  %v1452_v58 = vld [vmem:[%s2072_s1 + $0xac] ss:$16 sps:$4 sm:$0xff]  }
 0x527   :  { %1381 = vtanh.f32 %v1904_v48 }
 0x531   :  { %v1382_v60 = vpop.eup %1381 }
 0x532   :  { %v807_v61 = vmul.f32 %v1382_v60, %v1380_v59  ;;  %v1454_v59 = vld [vmem:[%s2072_s1 + $0xa8] ss:$16 sps:$4 sm:$0xff]   ;;  %v1455_v60 = vld [vmem:[%s2072_s1 + $0xc4] ss:$16 sps:$4 sm:$0xff]  }
 0x534   :  { %1234 = vst [vmem:[%s2074_s2 + $0x20] sm:$0xff] %v807_v61  ;;  %v817_v62 = vpack.c.bf16 %v807_v61, %v807_v61  ;;  %v1456_v61 = vld [vmem:[%s2072_s1 + $0xcc] ss:$16 sps:$4 sm:$0xff]  }
 0x536   :  { %851 = vmatmul.mubr.bf16.vlgmr.msra.gmra.mrb[20].mxu0 %v817_v62  ;;  %892 = vmatmul.mubr.bf16.vlgmr.msra.gmra.mrb[20].mxu1 %v817_v62  ;;  %v1457_v62 = vld [vmem:[%s2072_s1 + $0xc0] ss:$16 sps:$4 sm:$0xff]  }
 0x537   :  { %939 = vmatpush1.bf16.msra.mxu0 %v1490_v2  ;;  %980 = vmatpush1.bf16.msra.mxu1 %v1518_v7  ;;  %v1431_v2 = vld [vmem:[%s2072_s1 + $0x4] ss:$16 sps:$4 sm:$0xff]  }
 0x538   :  { %940 = vmatprep.subr.bf16.mxu0 %v1496_v3  ;;  %981 = vmatprep.subr.bf16.mxu1 %v1537_v10  ;;  %v1432_v3 = vld [vmem:[%s2072_s1 + $0xc] ss:$16 sps:$4 sm:$0xff]  }
 0x539   :  { %970 = vmatprep.mubr.bf16.mxu0 %v1463_v1  ;;  %1011 = vmatprep.mubr.bf16.mxu1 %v1463_v1 }
 0x53b   :  { %941 = vmatpush1.bf16.msra.mxu0 %v1502_v4  ;;  %982 = vmatpush1.bf16.msra.mxu1 %v1542_v11  ;;  %v1235_v4 = vld [vmem:[%s2073_s0 + $0x50] sm:$0xff] }
 0x53c   :  { %942 = vmatprep.subr.bf16.mxu0 %v1508_v5  ;;  %983 = vmatprep.subr.bf16.mxu1 %v1559_v14  ;;  %v813_v5 = vunpack.c.l.bf16 %v1235_v4  ;;  %v814_v7 = vunpack.c.h.bf16 %v1235_v4  ;;  %v1460_v4 = vld [vmem:[%s2072_s1 + $0xec] ss:$16 sps:$4 sm:$0xff]  }
 0x53f   :  { %943 = vmatpush1.bf16.msra.mxu0 %v1524_v8  ;;  %984 = vmatpush1.bf16.msra.mxu1 %v1566_v15 }
 0x540   :  { %944 = vmatprep.subr.bf16.mxu0 %v1531_v9  ;;  %985 = vmatprep.subr.bf16.mxu1 %v1572_v16 }
 0x543   :  { %945 = vmatpush1.bf16.msra.mxu0 %v1549_v12  ;;  %986 = vmatpush1.bf16.msra.mxu1 %v1590_v19 }
 0x544   :  { %946 = vmatprep.subr.bf16.mxu0 %v1554_v13  ;;  %987 = vmatprep.subr.bf16.mxu1 %v1596_v20  ;;  %v1236_v13 = vld [vmem:[%s2073_s0 + $0x58] sm:$0xff] }
 0x547   :  { %947 = vmatpush1.bf16.msra.mxu0 %v1578_v17  ;;  %988 = vmatpush1.bf16.msra.mxu1 %v1614_v23 }
 0x548   :  { %948 = vmatprep.subr.bf16.mxu0 %v1584_v18  ;;  %989 = vmatprep.subr.bf16.mxu1 %v1620_v24 }
 0x54b   :  { %949 = vmatpush1.bf16.msra.mxu0 %v1602_v21  ;;  %990 = vmatpush1.bf16.msra.mxu1 %v1638_v27  ;;  %v815_v21 = vunpack.c.l.bf16 %v1236_v13 }
 0x54c   :  { %950 = vmatprep.subr.bf16.mxu0 %v1607_v22  ;;  %991 = vmatprep.subr.bf16.mxu1 %v1644_v28  ;;  %v816_v22 = vunpack.c.h.bf16 %v1236_v13 }
 0x54f   :  { %951 = vmatpush1.bf16.msra.mxu0 %v1626_v25  ;;  %992 = vmatpush1.bf16.msra.mxu1 %v1657_v30 }
 0x550   :  { %952 = vmatprep.subr.bf16.mxu0 %v1632_v26  ;;  %993 = vmatprep.subr.bf16.mxu1 %v1663_v31 }
 0x553   :  { %953 = vmatpush1.bf16.msra.mxu0 %v1650_v29  ;;  %994 = vmatpush1.bf16.msra.mxu1 %v1670_v32 }
 0x554   :  { %1058 = vmatprep.subr.bf16.mxu0 %v1431_v2  ;;  %1099 = vmatprep.subr.bf16.mxu1 %v1432_v3  ;;  %v1458_v2 = vld [vmem:[%s2072_s1 + $0xc8] ss:$16 sps:$4 sm:$0xff]   ;;  %v1459_v3 = vld [vmem:[%s2072_s1 + $0xe4] ss:$16 sps:$4 sm:$0xff]  }
 0x609   :  { %v852_v8 = vpop.f32.mrb[20].mxu0  ;;  %v893_v9 = vpop.f32.mrb[20].mxu1 }
 0x60a   :  { %v900_v10 = vadd.f32 %v852_v8, %v813_v5  ;;  %v854_v11 = vpop.f32.mrb[21].mxu0  ;;  %v895_v12 = vpop.f32.mrb[21].mxu1  ;;  %v902_v23 = vadd.f32 %v893_v9, %v815_v21  ;;  %v1461_v5 = vld [vmem:[%s2072_s1 + $0xe0] ss:$16 sps:$4 sm:$0xff]  }
 0x60b   :  { %v901_v14 = vadd.f32 %v854_v11, %v814_v7  ;;  %v856_v15 = vpop.f32.mrb[22].mxu0  ;;  %v897_v16 = vpop.f32.mrb[22].mxu1  ;;  %v903_v24 = vadd.f32 %v895_v12, %v816_v22  ;;  %v1462_v7 = vld [vmem:[%s2072_s1 + $0xe8] ss:$16 sps:$4 sm:$0xff]   ;;  %v1241_v8 = vld [vmem:[%s2073_s0 + $0x60] sm:$0xff] }
 0x60c   :  { %v1237_v17 = vmul.f32 -1.442695, %v900_v10  ;;  %v857_v18 = vpop.f32.mrb[23].mxu0  ;;  %v898_v19 = vpop.f32.mrb[23].mxu1  ;;  %v1239_v25 = vmul.f32 -1.442695, %v902_v23  ;;  %v933_v9 = vunpack.c.l.bf16 %v1241_v8  ;;  %v934_v10 = vunpack.c.h.bf16 %v1241_v8 }
 0x60d   :  { %v1238_v20 = vmul.f32 -1.442695, %v901_v14  ;;  %v1242_v16 = vld [vmem:[%s2073_s0 + $0x68] sm:$0xff] }
 0x60e   :  { %1383 = vpow2.f32 %v1237_v17 }
 0x60f   :  { %1385 = vpow2.f32 %v1238_v20 }
 0x610   :  { %1387 = vtanh.f32 %v903_v24  ;;  %v935_v24 = vunpack.c.l.bf16 %v1242_v16 }
 0x611   :  { %1389 = vpow2.f32 %v1239_v25  ;;  %v936_v25 = vunpack.c.h.bf16 %v1242_v16 }
 0x618   :  { %v1384_v26 = vpop.eup %1383 }
 0x619   :  { %v913_v27 = vadd.f32 1.0, %v1384_v26  ;;  %v1386_v28 = vpop.eup %1385 }
 0x61a   :  { %v914_v29 = vadd.f32 1.0, %v1386_v28  ;;  %v1388_v30 = vpop.eup %1387 }
 0x61b   :  { %1391 = vrcp.f32 %v913_v27  ;;  %v1390_v31 = vpop.eup %1389 }
 0x61c   :  { %1393 = vrcp.f32 %v914_v29  ;;  %v915_v33 = vadd.f32 1.0, %v1390_v31 }
 0x61e   :  { %1395 = vrcp.f32 %v915_v33 }
 0x625   :  { %v1392_v32 = vpop.eup %1391 }
 0x626   :  { %v924_v54 = vmul.f32 %v1392_v32, %v1388_v30  ;;  %v1394_v63 = vpop.eup %1393 }
 0x627   :  { %v923_v34 = vmul.f32 %v1394_v63, %v1904_v48  ;;  %v1453_v48 = vld [vmem:[%s2072_s1 + $0xa0] ss:$16 sps:$4 sm:$0xff]  }
 0x628   :  { %v1396_v37 = vpop.eup %1395 }
 0x629   :  { %v1955_v36 = vadd.f32 %v924_v54, %v923_v34 }
 0x62b   :  { %1397 = vtanh.f32 %v1955_v36 }
 0x635   :  { %v1398_v38 = vpop.eup %1397 }
 0x636   :  { %v927_v0 = vmul.f32 %v1398_v38, %v1396_v37 }
 0x638   :  { %1240 = vst [vmem:[%s2074_s2 + $0x28] sm:$0xff] %v927_v0  ;;  %v937_v39 = vpack.c.bf16 %v927_v0, %v927_v0 }
 0x63a   :  { %971 = vmatmul.mubr.bf16.vlgmr.msra.gmra.mrb[24].mxu0 %v937_v39  ;;  %1012 = vmatmul.mubr.bf16.vlgmr.msra.gmra.mrb[24].mxu1 %v937_v39 }
 0x63b   :  { %1059 = vmatpush1.bf16.msra.mxu0 %v1433_v6  ;;  %1100 = vmatpush1.bf16.msra.mxu1 %v1434_v40 }
 0x63c   :  { %1060 = vmatprep.subr.bf16.mxu0 %v1435_v41  ;;  %1101 = vmatprep.subr.bf16.mxu1 %v1436_v43 }
 0x63d   :  { %1090 = vmatprep.mubr.bf16.mxu0 %v1463_v1  ;;  %1131 = vmatprep.mubr.bf16.mxu1 %v1463_v1  ;;  %v1441_v1 = vld [vmem:[%s2072_s1 + $0x40] ss:$16 sps:$4 sm:$0xff]  }
 0x63f   :  { %1061 = vmatpush1.bf16.msra.mxu0 %v1437_v44  ;;  %1102 = vmatpush1.bf16.msra.mxu1 %v1438_v45  ;;  %v1247_v44 = vld [vmem:[%s2073_s0 + $0x70] sm:$0xff] }
 0x640   :  { %1062 = vmatprep.subr.bf16.mxu0 %v1439_v46  ;;  %1103 = vmatprep.subr.bf16.mxu1 %v1440_v35  ;;  %v1053_v45 = vunpack.c.l.bf16 %v1247_v44  ;;  %v1054_v46 = vunpack.c.h.bf16 %v1247_v44 }
 0x643   :  { %1063 = vmatpush1.bf16.msra.mxu0 %v1441_v1  ;;  %1104 = vmatpush1.bf16.msra.mxu1 %v1442_v47 }
 0x644   :  { %1064 = vmatprep.subr.bf16.mxu0 %v1443_v49  ;;  %1105 = vmatprep.subr.bf16.mxu1 %v1444_v50  ;;  %v1248_v50 = vld [vmem:[%s2073_s0 + $0x78] sm:$0xff] }
 0x647   :  { %1065 = vmatpush1.bf16.msra.mxu0 %v1445_v51  ;;  %1106 = vmatpush1.bf16.msra.mxu1 %v1446_v52 }
 0x648   :  { %1066 = vmatprep.subr.bf16.mxu0 %v1447_v42  ;;  %1107 = vmatprep.subr.bf16.mxu1 %v1448_v53 }
 0x64b   :  { %1067 = vmatpush1.bf16.msra.mxu0 %v1449_v55  ;;  %1108 = vmatpush1.bf16.msra.mxu1 %v1450_v56 }
 0x64c   :  { %1068 = vmatprep.subr.bf16.mxu0 %v1451_v57  ;;  %1109 = vmatprep.subr.bf16.mxu1 %v1452_v58  ;;  %v1055_v58 = vunpack.c.l.bf16 %v1248_v50 }
 0x64f   :  { %1069 = vmatpush1.bf16.msra.mxu0 %v1453_v48  ;;  %1110 = vmatpush1.bf16.msra.mxu1 %v1454_v59  ;;  %v1056_v48 = vunpack.c.h.bf16 %v1248_v50 }
 0x650   :  { %1070 = vmatprep.subr.bf16.mxu0 %v1455_v60  ;;  %1111 = vmatprep.subr.bf16.mxu1 %v1456_v61 }
 0x653   :  { %1071 = vmatpush1.bf16.msra.mxu0 %v1457_v62  ;;  %1112 = vmatpush1.bf16.msra.mxu1 %v1458_v2 }
 0x654   :  { %1072 = vmatprep.subr.bf16.mxu0 %v1459_v3  ;;  %1113 = vmatprep.subr.bf16.mxu1 %v1460_v4 }
 0x657   :  { %1073 = vmatpush1.bf16.msra.mxu0 %v1461_v5  ;;  %1114 = vmatpush1.bf16.msra.mxu1 %v1462_v7 }
 0x70d   :  { %v972_v11 = vpop.f32.mrb[24].mxu0  ;;  %v1013_v12 = vpop.f32.mrb[24].mxu1 }
 0x70e   :  { %v1020_v13 = vadd.f32 %v972_v11, %v933_v9  ;;  %v974_v14 = vpop.f32.mrb[25].mxu0  ;;  %v1015_v15 = vpop.f32.mrb[25].mxu1  ;;  %v1022_v26 = vadd.f32 %v1013_v12, %v935_v24 }
 0x70f   :  { %v1021_v17 = vadd.f32 %v974_v14, %v934_v10  ;;  %v976_v18 = vpop.f32.mrb[26].mxu0  ;;  %v1017_v19 = vpop.f32.mrb[26].mxu1  ;;  %v1023_v27 = vadd.f32 %v1015_v15, %v936_v25 }
 0x710   :  { %v1243_v20 = vmul.f32 -1.442695, %v1020_v13  ;;  %v977_v21 = vpop.f32.mrb[27].mxu0  ;;  %v1018_v22 = vpop.f32.mrb[27].mxu1  ;;  %v1245_v28 = vmul.f32 -1.442695, %v1022_v26 }
 0x711   :  { %v1244_v23 = vmul.f32 -1.442695, %v1021_v17 }
 0x712   :  { %1399 = vpow2.f32 %v1243_v20 }
 0x713   :  { %1401 = vpow2.f32 %v1244_v23 }
 0x714   :  { %1403 = vtanh.f32 %v1023_v27 }
 0x715   :  { %1405 = vpow2.f32 %v1245_v28 }
 0x71c   :  { %v1400_v29 = vpop.eup %1399 }
 0x71d   :  { %v1033_v30 = vadd.f32 1.0, %v1400_v29  ;;  %v1402_v31 = vpop.eup %1401 }
 0x71e   :  { %v1034_v32 = vadd.f32 1.0, %v1402_v31  ;;  %v1404_v54 = vpop.eup %1403 }
 0x71f   :  { %1407 = vrcp.f32 %v1033_v30  ;;  %v1406_v63 = vpop.eup %1405 }
 0x720   :  { %1409 = vrcp.f32 %v1034_v32  ;;  %v1035_v38 = vadd.f32 1.0, %v1406_v63 }
 0x722   :  { %1411 = vrcp.f32 %v1035_v38 }
 0x729   :  { %v1408_v33 = vpop.eup %1407 }
 0x72a   :  { %v1044_v34 = vmul.f32 %v1408_v33, %v1404_v54  ;;  %v1410_v37 = vpop.eup %1409 }
 0x72b   :  { %v1043_v0 = vmul.f32 %v1410_v37, %v1955_v36 }
 0x72c   :  { %v1412_v6 = vpop.eup %1411 }
 0x72d   :  { %v1045_v39 = vadd.f32 %v1044_v34, %v1043_v0 }
 0x72f   :  { %1413 = vtanh.f32 %v1045_v39 }
 0x739   :  { %v1414_v40 = vpop.eup %1413 }
 0x73a   :  { %v1047_v41 = vmul.f32 %v1414_v40, %v1412_v6 }
 0x73c   :  { %1246 = vst [vmem:[%s2074_s2 + $0x30] sm:$0xff] %v1047_v41  ;;  %v1057_v43 = vpack.c.bf16 %v1047_v41, %v1047_v41 }
 0x73e   :  { %1091 = vmatmul.mubr.bf16.vlgmr.msra.gmra.mrb[28].mxu0 %v1057_v43  ;;  %1132 = vmatmul.mubr.bf16.vlgmr.msra.gmra.mrb[28].mxu1 %v1057_v43 }
 0x811   :  { %v1092_v36 = vpop.f32.mrb[28].mxu0  ;;  %v1133_v35 = vpop.f32.mrb[28].mxu1 }
 0x812   :  { %v1140_v1 = vadd.f32 %v1092_v36, %v1053_v45  ;;  %v1094_v47 = vpop.f32.mrb[29].mxu0  ;;  %v1135_v49 = vpop.f32.mrb[29].mxu1  ;;  %v1142_v59 = vadd.f32 %v1133_v35, %v1055_v58 }
 0x813   :  { %v1141_v51 = vadd.f32 %v1094_v47, %v1054_v46  ;;  %v1096_v52 = vpop.f32.mrb[30].mxu0  ;;  %v1137_v42 = vpop.f32.mrb[30].mxu1  ;;  %v1143_v60 = vadd.f32 %v1135_v49, %v1056_v48 }
 0x814   :  { %v1249_v53 = vmul.f32 -1.442695, %v1140_v1  ;;  %v1097_v55 = vpop.f32.mrb[31].mxu0  ;;  %v1138_v56 = vpop.f32.mrb[31].mxu1  ;;  %v1251_v61 = vmul.f32 -1.442695, %v1142_v59 }
 0x815   :  { %v1250_v57 = vmul.f32 -1.442695, %v1141_v51 }
 0x816   :  { %1415 = vpow2.f32 %v1249_v53 }
 0x817   :  { %1417 = vpow2.f32 %v1250_v57 }
 0x818   :  { %1419 = vtanh.f32 %v1143_v60 }
 0x819   :  { %1421 = vpow2.f32 %v1251_v61 }
 0x820   :  { %v1416_v62 = vpop.eup %1415 }
 0x821   :  { %v1153_v2 = vadd.f32 1.0, %v1416_v62  ;;  %v1418_v3 = vpop.eup %1417 }
 0x822   :  { %v1154_v4 = vadd.f32 1.0, %v1418_v3  ;;  %v1420_v5 = vpop.eup %1419 }
 0x823   :  { %1423 = vrcp.f32 %v1153_v2  ;;  %v1422_v7 = vpop.eup %1421 }
 0x824   :  { %1425 = vrcp.f32 %v1154_v4  ;;  %v1155_v11 = vadd.f32 1.0, %v1422_v7 }
 0x826   :  { %1427 = vrcp.f32 %v1155_v11 }
 0x82d   :  { %v1424_v8 = vpop.eup %1423 }
 0x82e   :  { %v1164_v9 = vmul.f32 %v1424_v8, %v1420_v5  ;;  %v1426_v10 = vpop.eup %1425 }
 0x82f   :  { %v1163_v12 = vmul.f32 %v1426_v10, %v1045_v39 }
 0x830   :  { %v1428_v14 = vpop.eup %1427 }
 0x831   :  { %v1165_v13 = vadd.f32 %v1164_v9, %v1163_v12 }
 0x833   :  { %1429 = vtanh.f32 %v1165_v13 }
 0x83d   :  { %v1430_v15 = vpop.eup %1429 }
 0x83e   :  { %v1167_v16 = vmul.f32 %v1430_v15, %v1428_v14 }
 0x840   :  { %1252 = vst [vmem:[%s2074_s2 + $0x38] sm:$0xff] %v1167_v16 }

// kernel: lstm_nlu_forward.1
= control target key start
LH: loop header
LB: loop body
LE: loop exit
PB: predicated region body
PF: predicated region fallthrough
CT: control target
= control target key end

     0   :  { %v1463_v1 = vmov 0   ;;  %v1464_v33 = vmov 0.0|0.0   ;;  %s2072_s1 = inlined_call_operand.vmem [shape: bf16[128,512], index: 1, kind: input, shape index: {}]   ;;  %s2073_s0 = inlined_call_operand.vmem [shape: bf16[8,8,512], index: 0, kind: input, shape index: {}]   ;;  %s2074_s2 = inlined_call_operand.vmem [shape: f32[8,8,128], index: 2, kind: output, shape index: {}]  }
   0x1   :  { %v1483_v0 = vld [vmem:[%s2072_s1 + $0x4] ss:$16 sps:$4 sm:$0xff]   ;;  %251 = vmatprep.mubr.bf16.mxu0 %v1463_v1  ;;  %292 = vmatprep.mubr.bf16.mxu1 %v1463_v1  ;;  %v1490_v2 = vld [vmem:[%s2072_s1] ss:$16 sps:$4 sm:$0xff]   ;;  %v1513_v6 = vld [vmem:[%s2072_s1 + $0xc] ss:$16 sps:$4 sm:$0xff]  }
   0x2   :  { %219 = vmatprep.subr.bf16.mxu0 %v1483_v0  ;;  %v1496_v3 = vld [vmem:[%s2072_s1 + $0x24] ss:$16 sps:$4 sm:$0xff]   ;;  %v1502_v4 = vld [vmem:[%s2072_s1 + $0x20] ss:$16 sps:$4 sm:$0xff]   ;;  %v1518_v7 = vld [vmem:[%s2072_s1 + $0x8] ss:$16 sps:$4 sm:$0xff]   ;;  %260 = vmatprep.subr.bf16.mxu1 %v1513_v6 }
   0x3   :  { %220 = vmatpush1.bf16.msra.mxu0 %v1490_v2  ;;  %v1508_v5 = vld [vmem:[%s2072_s1 + $0x44] ss:$16 sps:$4 sm:$0xff]   ;;  %v1524_v8 = vld [vmem:[%s2072_s1 + $0x40] ss:$16 sps:$4 sm:$0xff]   ;;  %261 = vmatpush1.bf16.msra.mxu1 %v1518_v7  ;;  %v1537_v10 = vld [vmem:[%s2072_s1 + $0x2c] ss:$16 sps:$4 sm:$0xff]  }
   0x4   :  { %221 = vmatprep.subr.bf16.mxu0 %v1496_v3  ;;  %v1531_v9 = vld [vmem:[%s2072_s1 + $0x64] ss:$16 sps:$4 sm:$0xff]   ;;  %v1542_v11 = vld [vmem:[%s2072_s1 + $0x28] ss:$16 sps:$4 sm:$0xff]   ;;  %262 = vmatprep.subr.bf16.mxu1 %v1537_v10  ;;  %v1549_v12 = vld [vmem:[%s2072_s1 + $0x60] ss:$16 sps:$4 sm:$0xff]  }
   0x5   :  { %v1554_v13 = vld [vmem:[%s2072_s1 + $0x84] ss:$16 sps:$4 sm:$0xff]   ;;  %v1559_v14 = vld [vmem:[%s2072_s1 + $0x4c] ss:$16 sps:$4 sm:$0xff]   ;;  %v1566_v15 = vld [vmem:[%s2072_s1 + $0x48] ss:$16 sps:$4 sm:$0xff]  }
   0x6   :  { %v1572_v16 = vld [vmem:[%s2072_s1 + $0x6c] ss:$16 sps:$4 sm:$0xff]   ;;  %v1578_v17 = vld [vmem:[%s2072_s1 + $0x80] ss:$16 sps:$4 sm:$0xff]   ;;  %v1584_v18 = vld [vmem:[%s2072_s1 + $0xa4] ss:$16 sps:$4 sm:$0xff]  }
   0x7   :  { %222 = vmatpush1.bf16.msra.mxu0 %v1502_v4  ;;  %263 = vmatpush1.bf16.msra.mxu1 %v1542_v11  ;;  %v1590_v19 = vld [vmem:[%s2072_s1 + $0x68] ss:$16 sps:$4 sm:$0xff]   ;;  %v1596_v20 = vld [vmem:[%s2072_s1 + $0x8c] ss:$16 sps:$4 sm:$0xff]   ;;  %v1602_v21 = vld [vmem:[%s2072_s1 + $0xa0] ss:$16 sps:$4 sm:$0xff]  }
   0x8   :  { %223 = vmatprep.subr.bf16.mxu0 %v1508_v5  ;;  %264 = vmatprep.subr.bf16.mxu1 %v1559_v14  ;;  %v1607_v22 = vld [vmem:[%s2072_s1 + $0xc4] ss:$16 sps:$4 sm:$0xff]   ;;  %v1614_v23 = vld [vmem:[%s2072_s1 + $0x88] ss:$16 sps:$4 sm:$0xff]   ;;  %v1620_v24 = vld [vmem:[%s2072_s1 + $0xac] ss:$16 sps:$4 sm:$0xff]  }
   0x9   :  { %v1626_v25 = vld [vmem:[%s2072_s1 + $0xc0] ss:$16 sps:$4 sm:$0xff]   ;;  %v1632_v26 = vld [vmem:[%s2072_s1 + $0xe4] ss:$16 sps:$4 sm:$0xff]   ;;  %v1638_v27 = vld [vmem:[%s2072_s1 + $0xa8] ss:$16 sps:$4 sm:$0xff]  }
   0xa   :  { %v1644_v28 = vld [vmem:[%s2072_s1 + $0xcc] ss:$16 sps:$4 sm:$0xff]   ;;  %v1650_v29 = vld [vmem:[%s2072_s1 + $0xe0] ss:$16 sps:$4 sm:$0xff]   ;;  %v1657_v30 = vld [vmem:[%s2072_s1 + $0xc8] ss:$16 sps:$4 sm:$0xff]  }
   0xb   :  { %224 = vmatpush1.bf16.msra.mxu0 %v1524_v8  ;;  %265 = vmatpush1.bf16.msra.mxu1 %v1566_v15  ;;  %v1663_v31 = vld [vmem:[%s2072_s1 + $0xec] ss:$16 sps:$4 sm:$0xff]   ;;  %v1670_v32 = vld [vmem:[%s2072_s1 + $0xe8] ss:$16 sps:$4 sm:$0xff]   ;;  %v52_v34 = vld [vmem:[%s2073_s0] sm:$0xff] }
   0xc   :  { %225 = vmatprep.subr.bf16.mxu0 %v1531_v9  ;;  %266 = vmatprep.subr.bf16.mxu1 %v1572_v16  ;;  %v54_v35 = vunpack.c.l.bf16 %v52_v34  ;;  %v55_v36 = vunpack.c.h.bf16 %v52_v34  ;;  %v53_v38 = vld [vmem:[%s2073_s0 + $0x8] sm:$0xff] }
   0xd   :  { %v56_v45 = vunpack.c.l.bf16 %v53_v38  ;;  %v57_v51 = vunpack.c.h.bf16 %v53_v38 }
   0xf   :  { %226 = vmatpush1.bf16.msra.mxu0 %v1549_v12  ;;  %267 = vmatpush1.bf16.msra.mxu1 %v1590_v19 }
  0x10   :  { %227 = vmatprep.subr.bf16.mxu0 %v1554_v13  ;;  %268 = vmatprep.subr.bf16.mxu1 %v1596_v20 }
  0x13   :  { %228 = vmatpush1.bf16.msra.mxu0 %v1578_v17  ;;  %269 = vmatpush1.bf16.msra.mxu1 %v1614_v23 }
  0x14   :  { %229 = vmatprep.subr.bf16.mxu0 %v1584_v18  ;;  %270 = vmatprep.subr.bf16.mxu1 %v1620_v24 }
  0x17   :  { %230 = vmatpush1.bf16.msra.mxu0 %v1602_v21  ;;  %271 = vmatpush1.bf16.msra.mxu1 %v1638_v27 }
  0x18   :  { %231 = vmatprep.subr.bf16.mxu0 %v1607_v22  ;;  %272 = vmatprep.subr.bf16.mxu1 %v1644_v28 }
  0x1b   :  { %232 = vmatpush1.bf16.msra.mxu0 %v1626_v25  ;;  %273 = vmatpush1.bf16.msra.mxu1 %v1657_v30 }
  0x1c   :  { %233 = vmatprep.subr.bf16.mxu0 %v1632_v26  ;;  %274 = vmatprep.subr.bf16.mxu1 %v1663_v31 }
  0x1f   :  { %234 = vmatpush1.bf16.msra.mxu0 %v1650_v29  ;;  %275 = vmatpush1.bf16.msra.mxu1 %v1670_v32 }
  0x20   :  { %338 = vmatprep.subr.bf16.mxu0 %v1483_v0  ;;  %379 = vmatprep.subr.bf16.mxu1 %v1513_v6 }
  0x22   :  { %252 = vmatmul.mubr.bf16.vlgmr.msra.gmra.mrb[0].mxu0 %v1464_v33  ;;  %293 = vmatmul.mubr.bf16.vlgmr.msra.gmra.mrb[0].mxu1 %v1464_v33 }
  0x23   :  { %339 = vmatpush1.bf16.msra.mxu0 %v1490_v2  ;;  %370 = vmatprep.mubr.bf16.mxu0 %v1463_v1 }
  0x24   :  { %340 = vmatprep.subr.bf16.mxu0 %v1496_v3  ;;  %380 = vmatpush1.bf16.msra.mxu1 %v1518_v7 }
  0x25   :  { %381 = vmatprep.subr.bf16.mxu1 %v1537_v10  ;;  %411 = vmatprep.mubr.bf16.mxu1 %v1463_v1 }
  0x27   :  { %341 = vmatpush1.bf16.msra.mxu0 %v1502_v4 }
  0x28   :  { %342 = vmatprep.subr.bf16.mxu0 %v1508_v5  ;;  %382 = vmatpush1.bf16.msra.mxu1 %v1542_v11 }
  0x29   :  { %383 = vmatprep.subr.bf16.mxu1 %v1559_v14 }
  0x2b   :  { %343 = vmatpush1.bf16.msra.mxu0 %v1524_v8 }
  0x2c   :  { %344 = vmatprep.subr.bf16.mxu0 %v1531_v9  ;;  %384 = vmatpush1.bf16.msra.mxu1 %v1566_v15 }
  0x2d   :  { %385 = vmatprep.subr.bf16.mxu1 %v1572_v16 }
  0x2f   :  { %345 = vmatpush1.bf16.msra.mxu0 %v1549_v12 }
  0x30   :  { %346 = vmatprep.subr.bf16.mxu0 %v1554_v13  ;;  %386 = vmatpush1.bf16.msra.mxu1 %v1590_v19 }
  0x31   :  { %387 = vmatprep.subr.bf16.mxu1 %v1596_v20 }
  0x33   :  { %347 = vmatpush1.bf16.msra.mxu0 %v1578_v17 }
  0x34   :  { %348 = vmatprep.subr.bf16.mxu0 %v1584_v18  ;;  %388 = vmatpush1.bf16.msra.mxu1 %v1614_v23 }
  0x35   :  { %389 = vmatprep.subr.bf16.mxu1 %v1620_v24 }
  0x37   :  { %349 = vmatpush1.bf16.msra.mxu0 %v1602_v21 }
  0x38   :  { %350 = vmatprep.subr.bf16.mxu0 %v1607_v22  ;;  %390 = vmatpush1.bf16.msra.mxu1 %v1638_v27 }
  0x39   :  { %391 = vmatprep.subr.bf16.mxu1 %v1644_v28 }
  0x3b   :  { %351 = vmatpush1.bf16.msra.mxu0 %v1626_v25 }
  0x3c   :  { %352 = vmatprep.subr.bf16.mxu0 %v1632_v26  ;;  %392 = vmatpush1.bf16.msra.mxu1 %v1657_v30 }
  0x3d   :  { %393 = vmatprep.subr.bf16.mxu1 %v1663_v31 }
  0x3f   :  { %353 = vmatpush1.bf16.msra.mxu0 %v1650_v29 }
  0x40   :  { %458 = vmatprep.subr.bf16.mxu0 %v1483_v0  ;;  %394 = vmatpush1.bf16.msra.mxu1 %v1670_v32 }
  0x41   :  { %499 = vmatprep.subr.bf16.mxu1 %v1513_v6 }
  0xf5   :  { %v253_v37 = vpop.f32.mrb[0].mxu0  ;;  %v294_v47 = vpop.f32.mrb[0].mxu1 }
  0xf6   :  { %v301_v39 = vadd.f32 %v253_v37, %v54_v35  ;;  %v255_v40 = vpop.f32.mrb[1].mxu0  ;;  %v296_v48 = vpop.f32.mrb[1].mxu1  ;;  %v303_v49 = vadd.f32 %v294_v47, %v56_v45 }
  0xf7   :  { %v302_v41 = vadd.f32 %v255_v40, %v55_v36  ;;  %v257_v42 = vpop.f32.mrb[2].mxu0  ;;  %v298_v50 = vpop.f32.mrb[2].mxu1  ;;  %v304_v54 = vadd.f32 %v296_v48, %v57_v51  ;;  %v1211_v40 = vld [vmem:[%s2073_s0 + $0x10] sm:$0xff]  ;;  %v1212_v48 = vld [vmem:[%s2073_s0 + $0x18] sm:$0xff] }
  0xf8   :  { %v1208_v43 = vmul.f32 -1.442695, %v301_v39  ;;  %v258_v44 = vpop.f32.mrb[3].mxu0  ;;  %v299_v52 = vpop.f32.mrb[3].mxu1  ;;  %v1210_v53 = vmul.f32 -1.442695, %v303_v49  ;;  %v334_v42 = vunpack.c.h.bf16 %v1211_v40 }
  0xf9   :  { %v1209_v46 = vmul.f32 -1.442695, %v302_v41  ;;  %v333_v41 = vunpack.c.l.bf16 %v1211_v40 }
  0xfa   :  { %1303 = vpow2.f32 %v1208_v43 }
  0xfb   :  { %1305 = vpow2.f32 %v1209_v46 }
  0xfc   :  { %1307 = vpow2.f32 %v1210_v53 }
  0xfd   :  { %1309 = vtanh.f32 %v304_v54 }
 0x104   :  { %v1304_v55 = vpop.eup %1303 }
 0x105   :  { %v1306_v56 = vpop.eup %1305  ;;  %v314_v57 = vadd.f32 1.0, %v1304_v55 }
 0x106   :  { %v315_v58 = vadd.f32 1.0, %v1306_v56  ;;  %v1308_v59 = vpop.eup %1307  ;;  %v335_v56 = vunpack.c.l.bf16 %v1212_v48 }
 0x107   :  { %1311 = vrcp.f32 %v314_v57  ;;  %v1310_v60 = vpop.eup %1309  ;;  %v316_v62 = vadd.f32 1.0, %v1308_v59  ;;  %v336_v57 = vunpack.c.h.bf16 %v1212_v48 }
 0x108   :  { %1313 = vrcp.f32 %v315_v58 }
 0x109   :  { %1315 = vrcp.f32 %v316_v62 }
 0x111   :  { %v1312_v61 = vpop.eup %1311 }
 0x112   :  { %v1314_v63 = vpop.eup %1313  ;;  %v325_v33 = vmul.f32 %v1312_v61, %v1310_v60 }
 0x113   :  { %v324_v34 = vmul.f32 0.0, %v1314_v63  ;;  %v1316_v36 = vpop.eup %1315 }
 0x115   :  { %v1716_v35 = vadd.f32 %v325_v33, %v324_v34 }
 0x117   :  { %1317 = vtanh.f32 %v1716_v35 }
 0x121   :  { %v1318_v37 = vpop.eup %1317 }
 0x122   :  { %v328_v38 = vmul.f32 %v1318_v37, %v1316_v36 }
 0x124   :  { %329 = vst [vmem:[%s2074_s2] sm:$0xff] %v328_v38  ;;  %v337_v39 = vpack.c.bf16 %v328_v38, %v328_v38 }
 0x126   :  { %371 = vmatmul.mubr.bf16.vlgmr.msra.gmra.mrb[4].mxu0 %v337_v39  ;;  %412 = vmatmul.mubr.bf16.vlgmr.msra.gmra.mrb[4].mxu1 %v337_v39 }
 0x127   :  { %459 = vmatpush1.bf16.msra.mxu0 %v1490_v2  ;;  %500 = vmatpush1.bf16.msra.mxu1 %v1518_v7 }
 0x128   :  { %460 = vmatprep.subr.bf16.mxu0 %v1496_v3  ;;  %501 = vmatprep.subr.bf16.mxu1 %v1537_v10 }
 0x129   :  { %490 = vmatprep.mubr.bf16.mxu0 %v1463_v1  ;;  %531 = vmatprep.mubr.bf16.mxu1 %v1463_v1 }
 0x12b   :  { %461 = vmatpush1.bf16.msra.mxu0 %v1502_v4  ;;  %502 = vmatpush1.bf16.msra.mxu1 %v1542_v11 }
 0x12c   :  { %462 = vmatprep.subr.bf16.mxu0 %v1508_v5  ;;  %503 = vmatprep.subr.bf16.mxu1 %v1559_v14 }
 0x12f   :  { %463 = vmatpush1.bf16.msra.mxu0 %v1524_v8  ;;  %504 = vmatpush1.bf16.msra.mxu1 %v1566_v15 }
 0x130   :  { %464 = vmatprep.subr.bf16.mxu0 %v1531_v9  ;;  %505 = vmatprep.subr.bf16.mxu1 %v1572_v16 }
 0x133   :  { %465 = vmatpush1.bf16.msra.mxu0 %v1549_v12  ;;  %506 = vmatpush1.bf16.msra.mxu1 %v1590_v19 }
 0x134   :  { %466 = vmatprep.subr.bf16.mxu0 %v1554_v13  ;;  %507 = vmatprep.subr.bf16.mxu1 %v1596_v20 }
 0x137   :  { %467 = vmatpush1.bf16.msra.mxu0 %v1578_v17  ;;  %508 = vmatpush1.bf16.msra.mxu1 %v1614_v23 }
 0x138   :  { %468 = vmatprep.subr.bf16.mxu0 %v1584_v18  ;;  %509 = vmatprep.subr.bf16.mxu1 %v1620_v24 }
 0x13b   :  { %469 = vmatpush1.bf16.msra.mxu0 %v1602_v21  ;;  %510 = vmatpush1.bf16.msra.mxu1 %v1638_v27 }
 0x13c   :  { %470 = vmatprep.subr.bf16.mxu0 %v1607_v22  ;;  %511 = vmatprep.subr.bf16.mxu1 %v1644_v28 }
 0x13f   :  { %471 = vmatpush1.bf16.msra.mxu0 %v1626_v25  ;;  %512 = vmatpush1.bf16.msra.mxu1 %v1657_v30 }
 0x140   :  { %472 = vmatprep.subr.bf16.mxu0 %v1632_v26  ;;  %513 = vmatprep.subr.bf16.mxu1 %v1663_v31 }
 0x143   :  { %473 = vmatpush1.bf16.msra.mxu0 %v1650_v29  ;;  %514 = vmatpush1.bf16.msra.mxu1 %v1670_v32 }
 0x144   :  { %578 = vmatprep.subr.bf16.mxu0 %v1483_v0  ;;  %619 = vmatprep.subr.bf16.mxu1 %v1513_v6 }
 0x1f9   :  { %v372_v43 = vpop.f32.mrb[4].mxu0  ;;  %v413_v44 = vpop.f32.mrb[4].mxu1 }
 0x1fa   :  { %v420_v45 = vadd.f32 %v372_v43, %v333_v41  ;;  %v374_v46 = vpop.f32.mrb[5].mxu0  ;;  %v415_v47 = vpop.f32.mrb[5].mxu1  ;;  %v422_v58 = vadd.f32 %v413_v44, %v335_v56 }
 0x1fb   :  { %v421_v49 = vadd.f32 %v374_v46, %v334_v42  ;;  %v376_v50 = vpop.f32.mrb[6].mxu0  ;;  %v417_v51 = vpop.f32.mrb[6].mxu1  ;;  %v423_v59 = vadd.f32 %v415_v47, %v336_v57 }
 0x1fc   :  { %v1213_v52 = vmul.f32 -1.442695, %v420_v45  ;;  %v377_v53 = vpop.f32.mrb[7].mxu0  ;;  %v418_v54 = vpop.f32.mrb[7].mxu1  ;;  %v1215_v60 = vmul.f32 -1.442695, %v422_v58 }
 0x1fd   :  { %v1214_v55 = vmul.f32 -1.442695, %v421_v49  ;;  %v1218_v54 = vld [vmem:[%s2073_s0 + $0x28] sm:$0xff] }
 0x1fe   :  { %1319 = vpow2.f32 %v1213_v52 }
 0x1ff   :  { %1321 = vpow2.f32 %v1214_v55 }
 0x200   :  { %1323 = vtanh.f32 %v423_v59 }
 0x201   :  { %1325 = vpow2.f32 %v1215_v60 }
 0x208   :  { %v1320_v61 = vpop.eup %1319 }
 0x209   :  { %v433_v62 = vadd.f32 1.0, %v1320_v61  ;;  %v1322_v63 = vpop.eup %1321 }
 0x20a   :  { %v434_v33 = vadd.f32 1.0, %v1322_v63  ;;  %v1324_v34 = vpop.eup %1323  ;;  %v456_v63 = vunpack.c.h.bf16 %v1218_v54 }
 0x20b   :  { %1327 = vrcp.f32 %v433_v62  ;;  %v1326_v36 = vpop.eup %1325  ;;  %v455_v62 = vunpack.c.l.bf16 %v1218_v54 }
 0x20c   :  { %1329 = vrcp.f32 %v434_v33  ;;  %v435_v40 = vadd.f32 1.0, %v1326_v36 }
 0x20e   :  { %1331 = vrcp.f32 %v435_v40 }
 0x215   :  { %v1328_v37 = vpop.eup %1327 }
 0x216   :  { %v444_v38 = vmul.f32 %v1328_v37, %v1324_v34  ;;  %v1330_v39 = vpop.eup %1329 }
 0x217   :  { %v443_v41 = vmul.f32 %v1330_v39, %v1716_v35  ;;  %v1217_v35 = vld [vmem:[%s2073_s0 + $0x20] sm:$0xff] }
 0x218   :  { %v1332_v43 = vpop.eup %1331  ;;  %v453_v47 = vunpack.c.l.bf16 %v1217_v35  ;;  %v454_v48 = vunpack.c.h.bf16 %v1217_v35 }
 0x219   :  { %v1763_v42 = vadd.f32 %v444_v38, %v443_v41 }
 0x21b   :  { %1333 = vtanh.f32 %v1763_v42 }
 0x225   :  { %v1334_v44 = vpop.eup %1333 }
 0x226   :  { %v447_v45 = vmul.f32 %v1334_v44, %v1332_v43 }
 0x228   :  { %1216 = vst [vmem:[%s2074_s2 + $0x8] sm:$0xff] %v447_v45  ;;  %v457_v46 = vpack.c.bf16 %v447_v45, %v447_v45 }
 0x22a   :  { %491 = vmatmul.mubr.bf16.vlgmr.msra.gmra.mrb[8].mxu0 %v457_v46  ;;  %532 = vmatmul.mubr.bf16.vlgmr.msra.gmra.mrb[8].mxu1 %v457_v46 }
 0x22b   :  { %579 = vmatpush1.bf16.msra.mxu0 %v1490_v2  ;;  %620 = vmatpush1.bf16.msra.mxu1 %v1518_v7 }
 0x22c   :  { %580 = vmatprep.subr.bf16.mxu0 %v1496_v3  ;;  %621 = vmatprep.subr.bf16.mxu1 %v1537_v10 }
 0x22d   :  { %610 = vmatprep.mubr.bf16.mxu0 %v1463_v1  ;;  %651 = vmatprep.mubr.bf16.mxu1 %v1463_v1 }
 0x22f   :  { %581 = vmatpush1.bf16.msra.mxu0 %v1502_v4  ;;  %622 = vmatpush1.bf16.msra.mxu1 %v1542_v11 }
 0x230   :  { %582 = vmatprep.subr.bf16.mxu0 %v1508_v5  ;;  %623 = vmatprep.subr.bf16.mxu1 %v1559_v14 }
 0x233   :  { %583 = vmatpush1.bf16.msra.mxu0 %v1524_v8  ;;  %624 = vmatpush1.bf16.msra.mxu1 %v1566_v15 }
 0x234   :  { %584 = vmatprep.subr.bf16.mxu0 %v1531_v9  ;;  %625 = vmatprep.subr.bf16.mxu1 %v1572_v16 }
 0x237   :  { %585 = vmatpush1.bf16.msra.mxu0 %v1549_v12  ;;  %626 = vmatpush1.bf16.msra.mxu1 %v1590_v19 }
 0x238   :  { %586 = vmatprep.subr.bf16.mxu0 %v1554_v13  ;;  %627 = vmatprep.subr.bf16.mxu1 %v1596_v20 }
 0x23b   :  { %587 = vmatpush1.bf16.msra.mxu0 %v1578_v17  ;;  %628 = vmatpush1.bf16.msra.mxu1 %v1614_v23 }
 0x23c   :  { %588 = vmatprep.subr.bf16.mxu0 %v1584_v18  ;;  %629 = vmatprep.subr.bf16.mxu1 %v1620_v24 }
 0x23f   :  { %589 = vmatpush1.bf16.msra.mxu0 %v1602_v21  ;;  %630 = vmatpush1.bf16.msra.mxu1 %v1638_v27 }
 0x240   :  { %590 = vmatprep.subr.bf16.mxu0 %v1607_v22  ;;  %631 = vmatprep.subr.bf16.mxu1 %v1644_v28 }
 0x243   :  { %591 = vmatpush1.bf16.msra.mxu0 %v1626_v25  ;;  %632 = vmatpush1.bf16.msra.mxu1 %v1657_v30 }
 0x244   :  { %592 = vmatprep.subr.bf16.mxu0 %v1632_v26  ;;  %633 = vmatprep.subr.bf16.mxu1 %v1663_v31 }
 0x247   :  { %593 = vmatpush1.bf16.msra.mxu0 %v1650_v29  ;;  %634 = vmatpush1.bf16.msra.mxu1 %v1670_v32 }
 0x248   :  { %698 = vmatprep.subr.bf16.mxu0 %v1483_v0  ;;  %739 = vmatprep.subr.bf16.mxu1 %v1513_v6 }
 0x2fd   :  { %v492_v49 = vpop.f32.mrb[8].mxu0  ;;  %v533_v50 = vpop.f32.mrb[8].mxu1 }
 0x2fe   :  { %v540_v51 = vadd.f32 %v492_v49, %v453_v47  ;;  %v494_v52 = vpop.f32.mrb[9].mxu0  ;;  %v535_v53 = vpop.f32.mrb[9].mxu1  ;;  %v542_v33 = vadd.f32 %v533_v50, %v455_v62 }
 0x2ff   :  { %v541_v55 = vadd.f32 %v494_v52, %v454_v48  ;;  %v496_v56 = vpop.f32.mrb[10].mxu0  ;;  %v537_v57 = vpop.f32.mrb[10].mxu1  ;;  %v543_v34 = vadd.f32 %v535_v53, %v456_v63 }
 0x300   :  { %v1219_v58 = vmul.f32 -1.442695, %v540_v51  ;;  %v497_v59 = vpop.f32.mrb[11].mxu0  ;;  %v538_v60 = vpop.f32.mrb[11].mxu1  ;;  %v1221_v36 = vmul.f32 -1.442695, %v542_v33 }
 0x301   :  { %v1220_v61 = vmul.f32 -1.442695, %v541_v55  ;;  %v1224_v60 = vld [vmem:[%s2073_s0 + $0x38] sm:$0xff] }
 0x302   :  { %1335 = vpow2.f32 %v1219_v58 }
 0x303   :  { %1337 = vpow2.f32 %v1220_v61 }
 0x304   :  { %1339 = vtanh.f32 %v543_v34 }
 0x305   :  { %1341 = vpow2.f32 %v1221_v36 }
 0x30c   :  { %v1336_v37 = vpop.eup %1335 }
 0x30d   :  { %v553_v38 = vadd.f32 1.0, %v1336_v37  ;;  %v1338_v39 = vpop.eup %1337 }
 0x30e   :  { %v554_v40 = vadd.f32 1.0, %v1338_v39  ;;  %v1340_v41 = vpop.eup %1339  ;;  %v576_v39 = vunpack.c.h.bf16 %v1224_v60 }
 0x30f   :  { %1343 = vrcp.f32 %v553_v38  ;;  %v1342_v43 = vpop.eup %1341  ;;  %v575_v38 = vunpack.c.l.bf16 %v1224_v60 }
 0x310   :  { %1345 = vrcp.f32 %v554_v40  ;;  %v555_v35 = vadd.f32 1.0, %v1342_v43 }
 0x312   :  { %1347 = vrcp.f32 %v555_v35 }
 0x319   :  { %v1344_v44 = vpop.eup %1343 }
 0x31a   :  { %v564_v45 = vmul.f32 %v1344_v44, %v1340_v41  ;;  %v1346_v46 = vpop.eup %1345 }
 0x31b   :  { %v563_v47 = vmul.f32 %v1346_v46, %v1763_v42  ;;  %v1223_v42 = vld [vmem:[%s2073_s0 + $0x30] sm:$0xff] }
 0x31c   :  { %v1348_v49 = vpop.eup %1347  ;;  %v573_v53 = vunpack.c.l.bf16 %v1223_v42  ;;  %v574_v54 = vunpack.c.h.bf16 %v1223_v42 }
 0x31d   :  { %v1810_v48 = vadd.f32 %v564_v45, %v563_v47 }
 0x31f   :  { %1349 = vtanh.f32 %v1810_v48 }
 0x329   :  { %v1350_v50 = vpop.eup %1349 }
 0x32a   :  { %v567_v51 = vmul.f32 %v1350_v50, %v1348_v49 }
 0x32c   :  { %1222 = vst [vmem:[%s2074_s2 + $0x10] sm:$0xff] %v567_v51  ;;  %v577_v52 = vpack.c.bf16 %v567_v51, %v567_v51 }
 0x32e   :  { %611 = vmatmul.mubr.bf16.vlgmr.msra.gmra.mrb[12].mxu0 %v577_v52  ;;  %652 = vmatmul.mubr.bf16.vlgmr.msra.gmra.mrb[12].mxu1 %v577_v52 }
 0x32f   :  { %699 = vmatpush1.bf16.msra.mxu0 %v1490_v2  ;;  %740 = vmatpush1.bf16.msra.mxu1 %v1518_v7 }
 0x330   :  { %700 = vmatprep.subr.bf16.mxu0 %v1496_v3  ;;  %741 = vmatprep.subr.bf16.mxu1 %v1537_v10 }
 0x331   :  { %730 = vmatprep.mubr.bf16.mxu0 %v1463_v1  ;;  %771 = vmatprep.mubr.bf16.mxu1 %v1463_v1 }
 0x333   :  { %701 = vmatpush1.bf16.msra.mxu0 %v1502_v4  ;;  %742 = vmatpush1.bf16.msra.mxu1 %v1542_v11 }
 0x334   :  { %702 = vmatprep.subr.bf16.mxu0 %v1508_v5  ;;  %743 = vmatprep.subr.bf16.mxu1 %v1559_v14 }
 0x337   :  { %703 = vmatpush1.bf16.msra.mxu0 %v1524_v8  ;;  %744 = vmatpush1.bf16.msra.mxu1 %v1566_v15 }
 0x338   :  { %704 = vmatprep.subr.bf16.mxu0 %v1531_v9  ;;  %745 = vmatprep.subr.bf16.mxu1 %v1572_v16 }
 0x33b   :  { %705 = vmatpush1.bf16.msra.mxu0 %v1549_v12  ;;  %746 = vmatpush1.bf16.msra.mxu1 %v1590_v19 }
 0x33c   :  { %706 = vmatprep.subr.bf16.mxu0 %v1554_v13  ;;  %747 = vmatprep.subr.bf16.mxu1 %v1596_v20 }
 0x33f   :  { %707 = vmatpush1.bf16.msra.mxu0 %v1578_v17  ;;  %748 = vmatpush1.bf16.msra.mxu1 %v1614_v23 }
 0x340   :  { %708 = vmatprep.subr.bf16.mxu0 %v1584_v18  ;;  %749 = vmatprep.subr.bf16.mxu1 %v1620_v24 }
 0x343   :  { %709 = vmatpush1.bf16.msra.mxu0 %v1602_v21  ;;  %750 = vmatpush1.bf16.msra.mxu1 %v1638_v27 }
 0x344   :  { %710 = vmatprep.subr.bf16.mxu0 %v1607_v22  ;;  %751 = vmatprep.subr.bf16.mxu1 %v1644_v28 }
 0x347   :  { %711 = vmatpush1.bf16.msra.mxu0 %v1626_v25  ;;  %752 = vmatpush1.bf16.msra.mxu1 %v1657_v30 }
 0x348   :  { %712 = vmatprep.subr.bf16.mxu0 %v1632_v26  ;;  %753 = vmatprep.subr.bf16.mxu1 %v1663_v31 }
 0x34b   :  { %713 = vmatpush1.bf16.msra.mxu0 %v1650_v29  ;;  %754 = vmatpush1.bf16.msra.mxu1 %v1670_v32 }
 0x34c   :  { %818 = vmatprep.subr.bf16.mxu0 %v1483_v0  ;;  %859 = vmatprep.subr.bf16.mxu1 %v1513_v6 }
 0x401   :  { %v612_v55 = vpop.f32.mrb[12].mxu0  ;;  %v653_v56 = vpop.f32.mrb[12].mxu1 }
 0x402   :  { %v660_v57 = vadd.f32 %v612_v55, %v573_v53  ;;  %v614_v58 = vpop.f32.mrb[13].mxu0  ;;  %v655_v59 = vpop.f32.mrb[13].mxu1  ;;  %v662_v40 = vadd.f32 %v653_v56, %v575_v38 }
 0x403   :  { %v661_v61 = vadd.f32 %v614_v58, %v574_v54  ;;  %v616_v62 = vpop.f32.mrb[14].mxu0  ;;  %v657_v63 = vpop.f32.mrb[14].mxu1  ;;  %v663_v41 = vadd.f32 %v655_v59, %v576_v39 }
 0x404   :  { %v1225_v33 = vmul.f32 -1.442695, %v660_v57  ;;  %v617_v34 = vpop.f32.mrb[15].mxu0  ;;  %v658_v36 = vpop.f32.mrb[15].mxu1  ;;  %v1227_v43 = vmul.f32 -1.442695, %v662_v40 }
 0x405   :  { %v1226_v37 = vmul.f32 -1.442695, %v661_v61  ;;  %v1230_v36 = vld [vmem:[%s2073_s0 + $0x48] sm:$0xff] }
 0x406   :  { %1351 = vpow2.f32 %v1225_v33 }
 0x407   :  { %1353 = vpow2.f32 %v1226_v37 }
 0x408   :  { %1355 = vtanh.f32 %v663_v41 }
 0x409   :  { %1357 = vpow2.f32 %v1227_v43  ;;  %v695_v43 = vunpack.c.l.bf16 %v1230_v36 }
 0x410   :  { %v1352_v44 = vpop.eup %1351 }
 0x411   :  { %v673_v45 = vadd.f32 1.0, %v1352_v44  ;;  %v1354_v46 = vpop.eup %1353  ;;  %v696_v44 = vunpack.c.h.bf16 %v1230_v36 }
 0x412   :  { %v674_v35 = vadd.f32 1.0, %v1354_v46  ;;  %v1356_v47 = vpop.eup %1355 }
 0x413   :  { %1359 = vrcp.f32 %v673_v45  ;;  %v1358_v49 = vpop.eup %1357 }
 0x414   :  { %1361 = vrcp.f32 %v674_v35  ;;  %v675_v42 = vadd.f32 1.0, %v1358_v49 }
 0x416   :  { %1363 = vrcp.f32 %v675_v42 }
 0x41d   :  { %v1360_v50 = vpop.eup %1359 }
 0x41e   :  { %v684_v51 = vmul.f32 %v1360_v50, %v1356_v47  ;;  %v1362_v52 = vpop.eup %1361 }
 0x41f   :  { %v683_v53 = vmul.f32 %v1362_v52, %v1810_v48  ;;  %v1229_v48 = vld [vmem:[%s2073_s0 + $0x40] sm:$0xff] }
 0x420   :  { %v1364_v55 = vpop.eup %1363  ;;  %v693_v59 = vunpack.c.l.bf16 %v1229_v48  ;;  %v694_v60 = vunpack.c.h.bf16 %v1229_v48 }
 0x421   :  { %v1857_v54 = vadd.f32 %v684_v51, %v683_v53 }
 0x423   :  { %1365 = vtanh.f32 %v1857_v54 }
 0x42d   :  { %v1366_v56 = vpop.eup %1365 }
 0x42e   :  { %v687_v57 = vmul.f32 %v1366_v56, %v1364_v55 }
 0x430   :  { %1228 = vst [vmem:[%s2074_s2 + $0x18] sm:$0xff] %v687_v57  ;;  %v697_v58 = vpack.c.bf16 %v687_v57, %v687_v57 }
 0x432   :  { %731 = vmatmul.mubr.bf16.vlgmr.msra.gmra.mrb[16].mxu0 %v697_v58  ;;  %772 = vmatmul.mubr.bf16.vlgmr.msra.gmra.mrb[16].mxu1 %v697_v58 }
 0x433   :  { %819 = vmatpush1.bf16.msra.mxu0 %v1490_v2  ;;  %860 = vmatpush1.bf16.msra.mxu1 %v1518_v7 }
 0x434   :  { %820 = vmatprep.subr.bf16.mxu0 %v1496_v3  ;;  %861 = vmatprep.subr.bf16.mxu1 %v1537_v10 }
 0x435   :  { %850 = vmatprep.mubr.bf16.mxu0 %v1463_v1  ;;  %891 = vmatprep.mubr.bf16.mxu1 %v1463_v1 }
 0x437   :  { %821 = vmatpush1.bf16.msra.mxu0 %v1502_v4  ;;  %862 = vmatpush1.bf16.msra.mxu1 %v1542_v11 }
 0x438   :  { %822 = vmatprep.subr.bf16.mxu0 %v1508_v5  ;;  %863 = vmatprep.subr.bf16.mxu1 %v1559_v14 }
 0x43b   :  { %823 = vmatpush1.bf16.msra.mxu0 %v1524_v8  ;;  %864 = vmatpush1.bf16.msra.mxu1 %v1566_v15 }
 0x43c   :  { %824 = vmatprep.subr.bf16.mxu0 %v1531_v9  ;;  %865 = vmatprep.subr.bf16.mxu1 %v1572_v16 }
 0x43f   :  { %825 = vmatpush1.bf16.msra.mxu0 %v1549_v12  ;;  %866 = vmatpush1.bf16.msra.mxu1 %v1590_v19 }
 0x440   :  { %826 = vmatprep.subr.bf16.mxu0 %v1554_v13  ;;  %867 = vmatprep.subr.bf16.mxu1 %v1596_v20 }
 0x443   :  { %827 = vmatpush1.bf16.msra.mxu0 %v1578_v17  ;;  %868 = vmatpush1.bf16.msra.mxu1 %v1614_v23 }
 0x444   :  { %828 = vmatprep.subr.bf16.mxu0 %v1584_v18  ;;  %869 = vmatprep.subr.bf16.mxu1 %v1620_v24 }
 0x447   :  { %829 = vmatpush1.bf16.msra.mxu0 %v1602_v21  ;;  %870 = vmatpush1.bf16.msra.mxu1 %v1638_v27 }
 0x448   :  { %830 = vmatprep.subr.bf16.mxu0 %v1607_v22  ;;  %871 = vmatprep.subr.bf16.mxu1 %v1644_v28 }
 0x44b   :  { %831 = vmatpush1.bf16.msra.mxu0 %v1626_v25  ;;  %872 = vmatpush1.bf16.msra.mxu1 %v1657_v30 }
 0x44c   :  { %832 = vmatprep.subr.bf16.mxu0 %v1632_v26  ;;  %873 = vmatprep.subr.bf16.mxu1 %v1663_v31 }
 0x44f   :  { %833 = vmatpush1.bf16.msra.mxu0 %v1650_v29  ;;  %874 = vmatpush1.bf16.msra.mxu1 %v1670_v32 }
 0x450   :  { %938 = vmatprep.subr.bf16.mxu0 %v1483_v0  ;;  %979 = vmatprep.subr.bf16.mxu1 %v1513_v6 }
 0x505   :  { %v732_v61 = vpop.f32.mrb[16].mxu0  ;;  %v773_v62 = vpop.f32.mrb[16].mxu1 }
 0x506   :  { %v780_v63 = vadd.f32 %v732_v61, %v693_v59  ;;  %v734_v33 = vpop.f32.mrb[17].mxu0  ;;  %v775_v34 = vpop.f32.mrb[17].mxu1  ;;  %v782_v45 = vadd.f32 %v773_v62, %v695_v43  ;;  %v1436_v43 = vld [vmem:[%s2072_s1 + $0x2c] ss:$16 sps:$4 sm:$0xff]  }
 0x507   :  { %v781_v37 = vadd.f32 %v734_v33, %v694_v60  ;;  %v736_v38 = vpop.f32.mrb[18].mxu0  ;;  %v777_v0 = vpop.f32.mrb[18].mxu1  ;;  %v783_v46 = vadd.f32 %v775_v34, %v696_v44  ;;  %v1437_v44 = vld [vmem:[%s2072_s1 + $0x20] ss:$16 sps:$4 sm:$0xff]  }
 0x508   :  { %v1231_v39 = vmul.f32 -1.442695, %v780_v63  ;;  %v737_v6 = vpop.f32.mrb[19].mxu0  ;;  %v778_v40 = vpop.f32.mrb[19].mxu1  ;;  %v1233_v35 = vmul.f32 -1.442695, %v782_v45 }
 0x509   :  { %v1232_v41 = vmul.f32 -1.442695, %v781_v37  ;;  %v1433_v6 = vld [vmem:[%s2072_s1] ss:$16 sps:$4 sm:$0xff]   ;;  %v1434_v40 = vld [vmem:[%s2072_s1 + $0x8] ss:$16 sps:$4 sm:$0xff]  }
 0x50a   :  { %1367 = vpow2.f32 %v1231_v39  ;;  %v1438_v45 = vld [vmem:[%s2072_s1 + $0x28] ss:$16 sps:$4 sm:$0xff]  }
 0x50b   :  { %1369 = vpow2.f32 %v1232_v41  ;;  %v1435_v41 = vld [vmem:[%s2072_s1 + $0x24] ss:$16 sps:$4 sm:$0xff]  }
 0x50c   :  { %1371 = vtanh.f32 %v783_v46  ;;  %v1439_v46 = vld [vmem:[%s2072_s1 + $0x44] ss:$16 sps:$4 sm:$0xff]  }
 0x50d   :  { %1373 = vpow2.f32 %v1233_v35  ;;  %v1440_v35 = vld [vmem:[%s2072_s1 + $0x4c] ss:$16 sps:$4 sm:$0xff]  }
 0x514   :  { %v1368_v47 = vpop.eup %1367 }
 0x515   :  { %v793_v49 = vadd.f32 1.0, %v1368_v47  ;;  %v1370_v50 = vpop.eup %1369  ;;  %v1442_v47 = vld [vmem:[%s2072_s1 + $0x48] ss:$16 sps:$4 sm:$0xff]  }
 0x516   :  { %v794_v51 = vadd.f32 1.0, %v1370_v50  ;;  %v1372_v52 = vpop.eup %1371  ;;  %v1444_v50 = vld [vmem:[%s2072_s1 + $0x6c] ss:$16 sps:$4 sm:$0xff]  }
 0x517   :  { %1375 = vrcp.f32 %v793_v49  ;;  %v1374_v42 = vpop.eup %1373  ;;  %v1443_v49 = vld [vmem:[%s2072_s1 + $0x64] ss:$16 sps:$4 sm:$0xff]  }
 0x518   :  { %1377 = vrcp.f32 %v794_v51  ;;  %v795_v57 = vadd.f32 1.0, %v1374_v42  ;;  %v1445_v51 = vld [vmem:[%s2072_s1 + $0x60] ss:$16 sps:$4 sm:$0xff]   ;;  %v1447_v42 = vld [vmem:[%s2072_s1 + $0x84] ss:$16 sps:$4 sm:$0xff]  }
 0x51a   :  { %1379 = vrcp.f32 %v795_v57  ;;  %v1451_v57 = vld [vmem:[%s2072_s1 + $0xa4] ss:$16 sps:$4 sm:$0xff]  }
 0x521   :  { %v1376_v53 = vpop.eup %1375 }
 0x522   :  { %v804_v55 = vmul.f32 %v1376_v53, %v1372_v52  ;;  %v1378_v56 = vpop.eup %1377  ;;  %v1446_v52 = vld [vmem:[%s2072_s1 + $0x68] ss:$16 sps:$4 sm:$0xff]   ;;  %v1448_v53 = vld [vmem:[%s2072_s1 + $0x8c] ss:$16 sps:$4 sm:$0xff]  }
 0x523   :  { %v803_v58 = vmul.f32 %v1378_v56, %v1857_v54  ;;  %v1450_v56 = vld [vmem:[%s2072_s1 + $0x88] ss:$16 sps:$4 sm:$0xff]  }
 0x524   :  { %v1380_v59 = vpop.eup %1379 }
 0x525   :  { %v1904_v48 = vadd.f32 %v804_v55, %v803_v58  ;;  %v1449_v55 = vld [vmem:[%s2072_s1 + $0x80] ss:$16 sps:$4 sm:$0xff]   ;;  %v1452_v58 = vld [vmem:[%s2072_s1 + $0xac] ss:$16 sps:$4 sm:$0xff]  }
 0x527   :  { %1381 = vtanh.f32 %v1904_v48 }
 0x531   :  { %v1382_v60 = vpop.eup %1381 }
 0x532   :  { %v807_v61 = vmul.f32 %v1382_v60, %v1380_v59  ;;  %v1454_v59 = vld [vmem:[%s2072_s1 + $0xa8] ss:$16 sps:$4 sm:$0xff]   ;;  %v1455_v60 = vld [vmem:[%s2072_s1 + $0xc4] ss:$16 sps:$4 sm:$0xff]  }
 0x534   :  { %1234 = vst [vmem:[%s2074_s2 + $0x20] sm:$0xff] %v807_v61  ;;  %v817_v62 = vpack.c.bf16 %v807_v61, %v807_v61  ;;  %v1456_v61 = vld [vmem:[%s2072_s1 + $0xcc] ss:$16 sps:$4 sm:$0xff]  }
 0x536   :  { %851 = vmatmul.mubr.bf16.vlgmr.msra.gmra.mrb[20].mxu0 %v817_v62  ;;  %892 = vmatmul.mubr.bf16.vlgmr.msra.gmra.mrb[20].mxu1 %v817_v62  ;;  %v1457_v62 = vld [vmem:[%s2072_s1 + $0xc0] ss:$16 sps:$4 sm:$0xff]  }
 0x537   :  { %939 = vmatpush1.bf16.msra.mxu0 %v1490_v2  ;;  %980 = vmatpush1.bf16.msra.mxu1 %v1518_v7  ;;  %v1431_v2 = vld [vmem:[%s2072_s1 + $0x4] ss:$16 sps:$4 sm:$0xff]  }
 0x538   :  { %940 = vmatprep.subr.bf16.mxu0 %v1496_v3  ;;  %981 = vmatprep.subr.bf16.mxu1 %v1537_v10  ;;  %v1432_v3 = vld [vmem:[%s2072_s1 + $0xc] ss:$16 sps:$4 sm:$0xff]  }
 0x539   :  { %970 = vmatprep.mubr.bf16.mxu0 %v1463_v1  ;;  %1011 = vmatprep.mubr.bf16.mxu1 %v1463_v1 }
 0x53b   :  { %941 = vmatpush1.bf16.msra.mxu0 %v1502_v4  ;;  %982 = vmatpush1.bf16.msra.mxu1 %v1542_v11  ;;  %v1235_v4 = vld [vmem:[%s2073_s0 + $0x50] sm:$0xff] }
 0x53c   :  { %942 = vmatprep.subr.bf16.mxu0 %v1508_v5  ;;  %983 = vmatprep.subr.bf16.mxu1 %v1559_v14  ;;  %v813_v5 = vunpack.c.l.bf16 %v1235_v4  ;;  %v814_v7 = vunpack.c.h.bf16 %v1235_v4  ;;  %v1460_v4 = vld [vmem:[%s2072_s1 + $0xec] ss:$16 sps:$4 sm:$0xff]  }
 0x53f   :  { %943 = vmatpush1.bf16.msra.mxu0 %v1524_v8  ;;  %984 = vmatpush1.bf16.msra.mxu1 %v1566_v15 }
 0x540   :  { %944 = vmatprep.subr.bf16.mxu0 %v1531_v9  ;;  %985 = vmatprep.subr.bf16.mxu1 %v1572_v16 }
 0x543   :  { %945 = vmatpush1.bf16.msra.mxu0 %v1549_v12  ;;  %986 = vmatpush1.bf16.msra.mxu1 %v1590_v19 }
 0x544   :  { %946 = vmatprep.subr.bf16.mxu0 %v1554_v13  ;;  %987 = vmatprep.subr.bf16.mxu1 %v1596_v20  ;;  %v1236_v13 = vld [vmem:[%s2073_s0 + $0x58] sm:$0xff] }
 0x547   :  { %947 = vmatpush1.bf16.msra.mxu0 %v1578_v17  ;;  %988 = vmatpush1.bf16.msra.mxu1 %v1614_v23 }
 0x548   :  { %948 = vmatprep.subr.bf16.mxu0 %v1584_v18  ;;  %989 = vmatprep.subr.bf16.mxu1 %v1620_v24 }
 0x54b   :  { %949 = vmatpush1.bf16.msra.mxu0 %v1602_v21  ;;  %990 = vmatpush1.bf16.msra.mxu1 %v1638_v27  ;;  %v815_v21 = vunpack.c.l.bf16 %v1236_v13 }
 0x54c   :  { %950 = vmatprep.subr.bf16.mxu0 %v1607_v22  ;;  %991 = vmatprep.subr.bf16.mxu1 %v1644_v28  ;;  %v816_v22 = vunpack.c.h.bf16 %v1236_v13 }
 0x54f   :  { %951 = vmatpush1.bf16.msra.mxu0 %v1626_v25  ;;  %992 = vmatpush1.bf16.msra.mxu1 %v1657_v30 }
 0x550   :  { %952 = vmatprep.subr.bf16.mxu0 %v1632_v26  ;;  %993 = vmatprep.subr.bf16.mxu1 %v1663_v31 }
 0x553   :  { %953 = vmatpush1.bf16.msra.mxu0 %v1650_v29  ;;  %994 = vmatpush1.bf16.msra.mxu1 %v1670_v32 }
 0x554   :  { %1058 = vmatprep.subr.bf16.mxu0 %v1431_v2  ;;  %1099 = vmatprep.subr.bf16.mxu1 %v1432_v3  ;;  %v1458_v2 = vld [vmem:[%s2072_s1 + $0xc8] ss:$16 sps:$4 sm:$0xff]   ;;  %v1459_v3 = vld [vmem:[%s2072_s1 + $0xe4] ss:$16 sps:$4 sm:$0xff]  }
 0x609   :  { %v852_v8 = vpop.f32.mrb[20].mxu0  ;;  %v893_v9 = vpop.f32.mrb[20].mxu1 }
 0x60a   :  { %v900_v10 = vadd.f32 %v852_v8, %v813_v5  ;;  %v854_v11 = vpop.f32.mrb[21].mxu0  ;;  %v895_v12 = vpop.f32.mrb[21].mxu1  ;;  %v902_v23 = vadd.f32 %v893_v9, %v815_v21  ;;  %v1461_v5 = vld [vmem:[%s2072_s1 + $0xe0] ss:$16 sps:$4 sm:$0xff]  }
 0x60b   :  { %v901_v14 = vadd.f32 %v854_v11, %v814_v7  ;;  %v856_v15 = vpop.f32.mrb[22].mxu0  ;;  %v897_v16 = vpop.f32.mrb[22].mxu1  ;;  %v903_v24 = vadd.f32 %v895_v12, %v816_v22  ;;  %v1462_v7 = vld [vmem:[%s2072_s1 + $0xe8] ss:$16 sps:$4 sm:$0xff]   ;;  %v1241_v8 = vld [vmem:[%s2073_s0 + $0x60] sm:$0xff] }
 0x60c   :  { %v1237_v17 = vmul.f32 -1.442695, %v900_v10  ;;  %v857_v18 = vpop.f32.mrb[23].mxu0  ;;  %v898_v19 = vpop.f32.mrb[23].mxu1  ;;  %v1239_v25 = vmul.f32 -1.442695, %v902_v23  ;;  %v933_v9 = vunpack.c.l.bf16 %v1241_v8  ;;  %v934_v10 = vunpack.c.h.bf16 %v1241_v8 }
 0x60d   :  { %v1238_v20 = vmul.f32 -1.442695, %v901_v14  ;;  %v1242_v16 = vld [vmem:[%s2073_s0 + $0x68] sm:$0xff] }
 0x60e   :  { %1383 = vpow2.f32 %v1237_v17 }
 0x60f   :  { %1385 = vpow2.f32 %v1238_v20 }
 0x610   :  { %1387 = vtanh.f32 %v903_v24  ;;  %v935_v24 = vunpack.c.l.bf16 %v1242_v16 }
 0x611   :  { %1389 = vpow2.f32 %v1239_v25  ;;  %v936_v25 = vunpack.c.h.bf16 %v1242_v16 }
 0x618   :  { %v1384_v26 = vpop.eup %1383 }
 0x619   :  { %v913_v27 = vadd.f32 1.0, %v1384_v26  ;;  %v1386_v28 = vpop.eup %1385 }
 0x61a   :  { %v914_v29 = vadd.f32 1.0, %v1386_v28  ;;  %v1388_v30 = vpop.eup %1387 }
 0x61b   :  { %1391 = vrcp.f32 %v913_v27  ;;  %v1390_v31 = vpop.eup %1389 }
 0x61c   :  { %1393 = vrcp.f32 %v914_v29  ;;  %v915_v33 = vadd.f32 1.0, %v1390_v31 }
 0x61e   :  { %1395 = vrcp.f32 %v915_v33 }
 0x625   :  { %v1392_v32 = vpop.eup %1391 }
 0x626   :  { %v924_v54 = vmul.f32 %v1392_v32, %v1388_v30  ;;  %v1394_v63 = vpop.eup %1393 }
 0x627   :  { %v923_v34 = vmul.f32 %v1394_v63, %v1904_v48  ;;  %v1453_v48 = vld [vmem:[%s2072_s1 + $0xa0] ss:$16 sps:$4 sm:$0xff]  }
 0x628   :  { %v1396_v37 = vpop.eup %1395 }
 0x629   :  { %v1955_v36 = vadd.f32 %v924_v54, %v923_v34 }
 0x62b   :  { %1397 = vtanh.f32 %v1955_v36 }
 0x635   :  { %v1398_v38 = vpop.eup %1397 }
 0x636   :  { %v927_v0 = vmul.f32 %v1398_v38, %v1396_v37 }
 0x638   :  { %1240 = vst [vmem:[%s2074_s2 + $0x28] sm:$0xff] %v927_v0  ;;  %v937_v39 = vpack.c.bf16 %v927_v0, %v927_v0 }
 0x63a   :  { %971 = vmatmul.mubr.bf16.vlgmr.msra.gmra.mrb[24].mxu0 %v937_v39  ;;  %1012 = vmatmul.mubr.bf16.vlgmr.msra.gmra.mrb[24].mxu1 %v937_v39 }
 0x63b   :  { %1059 = vmatpush1.bf16.msra.mxu0 %v1433_v6  ;;  %1100 = vmatpush1.bf16.msra.mxu1 %v1434_v40 }
 0x63c   :  { %1060 = vmatprep.subr.bf16.mxu0 %v1435_v41  ;;  %1101 = vmatprep.subr.bf16.mxu1 %v1436_v43 }
 0x63d   :  { %1090 = vmatprep.mubr.bf16.mxu0 %v1463_v1  ;;  %1131 = vmatprep.mubr.bf16.mxu1 %v1463_v1  ;;  %v1441_v1 = vld [vmem:[%s2072_s1 + $0x40] ss:$16 sps:$4 sm:$0xff]  }
 0x63f   :  { %1061 = vmatpush1.bf16.msra.mxu0 %v1437_v44  ;;  %1102 = vmatpush1.bf16.msra.mxu1 %v1438_v45  ;;  %v1247_v44 = vld [vmem:[%s2073_s0 + $0x70] sm:$0xff] }
 0x640   :  { %1062 = vmatprep.subr.bf16.mxu0 %v1439_v46  ;;  %1103 = vmatprep.subr.bf16.mxu1 %v1440_v35  ;;  %v1053_v45 = vunpack.c.l.bf16 %v1247_v44  ;;  %v1054_v46 = vunpack.c.h.bf16 %v1247_v44 }
 0x643   :  { %1063 = vmatpush1.bf16.msra.mxu0 %v1441_v1  ;;  %1104 = vmatpush1.bf16.msra.mxu1 %v1442_v47 }
 0x644   :  { %1064 = vmatprep.subr.bf16.mxu0 %v1443_v49  ;;  %1105 = vmatprep.subr.bf16.mxu1 %v1444_v50  ;;  %v1248_v50 = vld [vmem:[%s2073_s0 + $0x78] sm:$0xff] }
 0x647   :  { %1065 = vmatpush1.bf16.msra.mxu0 %v1445_v51  ;;  %1106 = vmatpush1.bf16.msra.mxu1 %v1446_v52 }
 0x648   :  { %1066 = vmatprep.subr.bf16.mxu0 %v1447_v42  ;;  %1107 = vmatprep.subr.bf16.mxu1 %v1448_v53 }
 0x64b   :  { %1067 = vmatpush1.bf16.msra.mxu0 %v1449_v55  ;;  %1108 = vmatpush1.bf16.msra.mxu1 %v1450_v56 }
 0x64c   :  { %1068 = vmatprep.subr.bf16.mxu0 %v1451_v57  ;;  %1109 = vmatprep.subr.bf16.mxu1 %v1452_v58  ;;  %v1055_v58 = vunpack.c.l.bf16 %v1248_v50 }
 0x64f   :  { %1069 = vmatpush1.bf16.msra.mxu0 %v1453_v48  ;;  %1110 = vmatpush1.bf16.msra.mxu1 %v1454_v59  ;;  %v1056_v48 = vunpack.c.h.bf16 %v1248_v50 }
 0x650   :  { %1070 = vmatprep.subr.bf16.mxu0 %v1455_v60  ;;  %1111 = vmatprep.subr.bf16.mxu1 %v1456_v61 }
 0x653   :  { %1071 = vmatpush1.bf16.msra.mxu0 %v1457_v62  ;;  %1112 = vmatpush1.bf16.msra.mxu1 %v1458_v2 }
 0x654   :  { %1072 = vmatprep.subr.bf16.mxu0 %v1459_v3  ;;  %1113 = vmatprep.subr.bf16.mxu1 %v1460_v4 }
 0x657   :  { %1073 = vmatpush1.bf16.msra.mxu0 %v1461_v5  ;;  %1114 = vmatpush1.bf16.msra.mxu1 %v1462_v7 }
 0x70d   :  { %v972_v11 = vpop.f32.mrb[24].mxu0  ;;  %v1013_v12 = vpop.f32.mrb[24].mxu1 }
 0x70e   :  { %v1020_v13 = vadd.f32 %v972_v11, %v933_v9  ;;  %v974_v14 = vpop.f32.mrb[25].mxu0  ;;  %v1015_v15 = vpop.f32.mrb[25].mxu1  ;;  %v1022_v26 = vadd.f32 %v1013_v12, %v935_v24 }
 0x70f   :  { %v1021_v17 = vadd.f32 %v974_v14, %v934_v10  ;;  %v976_v18 = vpop.f32.mrb[26].mxu0  ;;  %v1017_v19 = vpop.f32.mrb[26].mxu1  ;;  %v1023_v27 = vadd.f32 %v1015_v15, %v936_v25 }
 0x710   :  { %v1243_v20 = vmul.f32 -1.442695, %v1020_v13  ;;  %v977_v21 = vpop.f32.mrb[27].mxu0  ;;  %v1018_v22 = vpop.f32.mrb[27].mxu1  ;;  %v1245_v28 = vmul.f32 -1.442695, %v1022_v26 }
 0x711   :  { %v1244_v23 = vmul.f32 -1.442695, %v1021_v17 }
 0x712   :  { %1399 = vpow2.f32 %v1243_v20 }
 0x713   :  { %1401 = vpow2.f32 %v1244_v23 }
 0x714   :  { %1403 = vtanh.f32 %v1023_v27 }
 0x715   :  { %1405 = vpow2.f32 %v1245_v28 }
 0x71c   :  { %v1400_v29 = vpop.eup %1399 }
 0x71d   :  { %v1033_v30 = vadd.f32 1.0, %v1400_v29  ;;  %v1402_v31 = vpop.eup %1401 }
 0x71e   :  { %v1034_v32 = vadd.f32 1.0, %v1402_v31  ;;  %v1404_v54 = vpop.eup %1403 }
 0x71f   :  { %1407 = vrcp.f32 %v1033_v30  ;;  %v1406_v63 = vpop.eup %1405 }
 0x720   :  { %1409 = vrcp.f32 %v1034_v32  ;;  %v1035_v38 = vadd.f32 1.0, %v1406_v63 }
 0x722   :  { %1411 = vrcp.f32 %v1035_v38 }
 0x729   :  { %v1408_v33 = vpop.eup %1407 }
 0x72a   :  { %v1044_v34 = vmul.f32 %v1408_v33, %v1404_v54  ;;  %v1410_v37 = vpop.eup %1409 }
 0x72b   :  { %v1043_v0 = vmul.f32 %v1410_v37, %v1955_v36 }
 0x72c   :  { %v1412_v6 = vpop.eup %1411 }
 0x72d   :  { %v1045_v39 = vadd.f32 %v1044_v34, %v1043_v0 }
 0x72f   :  { %1413 = vtanh.f32 %v1045_v39 }
 0x739   :  { %v1414_v40 = vpop.eup %1413 }
 0x73a   :  { %v1047_v41 = vmul.f32 %v1414_v40, %v1412_v6 }
 0x73c   :  { %1246 = vst [vmem:[%s2074_s2 + $0x30] sm:$0xff] %v1047_v41  ;;  %v1057_v43 = vpack.c.bf16 %v1047_v41, %v1047_v41 }
 0x73e   :  { %1091 = vmatmul.mubr.bf16.vlgmr.msra.gmra.mrb[28].mxu0 %v1057_v43  ;;  %1132 = vmatmul.mubr.bf16.vlgmr.msra.gmra.mrb[28].mxu1 %v1057_v43 }
 0x811   :  { %v1092_v36 = vpop.f32.mrb[28].mxu0  ;;  %v1133_v35 = vpop.f32.mrb[28].mxu1 }
 0x812   :  { %v1140_v1 = vadd.f32 %v1092_v36, %v1053_v45  ;;  %v1094_v47 = vpop.f32.mrb[29].mxu0  ;;  %v1135_v49 = vpop.f32.mrb[29].mxu1  ;;  %v1142_v59 = vadd.f32 %v1133_v35, %v1055_v58 }
 0x813   :  { %v1141_v51 = vadd.f32 %v1094_v47, %v1054_v46  ;;  %v1096_v52 = vpop.f32.mrb[30].mxu0  ;;  %v1137_v42 = vpop.f32.mrb[30].mxu1  ;;  %v1143_v60 = vadd.f32 %v1135_v49, %v1056_v48 }
 0x814   :  { %v1249_v53 = vmul.f32 -1.442695, %v1140_v1  ;;  %v1097_v55 = vpop.f32.mrb[31].mxu0  ;;  %v1138_v56 = vpop.f32.mrb[31].mxu1  ;;  %v1251_v61 = vmul.f32 -1.442695, %v1142_v59 }
 0x815   :  { %v1250_v57 = vmul.f32 -1.442695, %v1141_v51 }
 0x816   :  { %1415 = vpow2.f32 %v1249_v53 }
 0x817   :  { %1417 = vpow2.f32 %v1250_v57 }
 0x818   :  { %1419 = vtanh.f32 %v1143_v60 }
 0x819   :  { %1421 = vpow2.f32 %v1251_v61 }
 0x820   :  { %v1416_v62 = vpop.eup %1415 }
 0x821   :  { %v1153_v2 = vadd.f32 1.0, %v1416_v62  ;;  %v1418_v3 = vpop.eup %1417 }
 0x822   :  { %v1154_v4 = vadd.f32 1.0, %v1418_v3  ;;  %v1420_v5 = vpop.eup %1419 }
 0x823   :  { %1423 = vrcp.f32 %v1153_v2  ;;  %v1422_v7 = vpop.eup %1421 }
 0x824   :  { %1425 = vrcp.f32 %v1154_v4  ;;  %v1155_v11 = vadd.f32 1.0, %v1422_v7 }
 0x826   :  { %1427 = vrcp.f32 %v1155_v11 }
 0x82d   :  { %v1424_v8 = vpop.eup %1423 }
 0x82e   :  { %v1164_v9 = vmul.f32 %v1424_v8, %v1420_v5  ;;  %v1426_v10 = vpop.eup %1425 }
 0x82f   :  { %v1163_v12 = vmul.f32 %v1426_v10, %v1045_v39 }
 0x830   :  { %v1428_v14 = vpop.eup %1427 }
 0x831   :  { %v1165_v13 = vadd.f32 %v1164_v9, %v1163_v12 }
 0x833   :  { %1429 = vtanh.f32 %v1165_v13 }
 0x83d   :  { %v1430_v15 = vpop.eup %1429 }
 0x83e   :  { %v1167_v16 = vmul.f32 %v1430_v15, %v1428_v14 }
 0x840   :  { %1252 = vst [vmem:[%s2074_s2 + $0x38] sm:$0xff] %v1167_v16 }

</bundles_post_ra>
